<compile_context>
chip_gen: v7x
topology: tpu7x:2x2x1
jax: 0.10.0
libtpu: 0.0.40
codegen_flags: <defaults>
</compile_context>

<pallas_src>
import math
import functools
import numpy as np
import jax
import jax.numpy as jnp
from jax.experimental import pallas as pl
from jax.experimental.pallas import tpu as pltpu

LN_EPS = 1e-5
L2_EPS = 5e-5
SM_EPS = 1e-4
LANE = 128

_CompilerParams = getattr(pltpu, "CompilerParams", None) or getattr(pltpu, "TPUCompilerParams")
_pl_reciprocal = getattr(pl, "reciprocal", None)


def _round_up(x, m):
    return ((x + m - 1) // m) * m


def _recip(x):
    if _pl_reciprocal is not None:
        return _pl_reciprocal(x, approx=True)     # EUP slot; frees VALU in the epilogue
    return 1.0 / x


def _vmem_capacity_bytes():
    """Detected per-core VMEM; conservative 64 MiB (v7x) fallback."""
    try:
        info = pltpu.get_tpu_info()
        cap = int(getattr(info, "vmem_capacity_bytes", 0))
        if cap > 0:
            return cap
    except Exception:
        pass
    return 64 * 1024 * 1024


def _plan(n, c_pad, f_pad, h_pad, weight_bytes, single_buffer_weights,
          force_two_phase, max_tile):
    """Pick single-pass vs two-phase, the token tile TN, padded N and vmem_limit_bytes."""
    vmem = _vmem_capacity_bytes()
    w_live = weight_bytes * (1 if single_buffer_weights else 2)
    scratch = f_pad * c_pad * 4 + f_pad * 4
    # Rough live bytes per token inside one grid step:
    #   bf16 x tile (double-buffered) + f32 out tile (double-buffered) +
    #   f32 temporaries (xn, kv, q/k, qf/kf, x1, xn2, h, m) + bf16 cast copies.
    per_token = (2 * c_pad * 2 + 2 * c_pad * 4
                 + 4 * (8 * c_pad + 2 * f_pad + h_pad)
                 + 2 * (2 * c_pad + f_pad + h_pad))
    budget = vmem - w_live - scratch - (8 << 20)
    tile_cap = max(8, (max(budget, 0) // per_token) // 8 * 8)

    n8 = _round_up(n, 8)
    if (not force_two_phase) and n8 <= min(tile_cap, 2048):
        single_pass, tn, n_pad, t = True, n8, n8, 1
    else:
        single_pass = False
        tn = min(tile_cap, (max_tile if max_tile else 512), n8)
        tn = max(8, (tn // 8) * 8)
        n_pad = _round_up(n, tn)
        t = n_pad // tn

    est = w_live + scratch + per_token * tn + (16 << 20)
    vmem_limit = int(min(vmem, max(32 << 20, est)))
    vmem_limit = min(vmem_limit, 128 << 20)
    return single_pass, tn, n_pad, t, vmem_limit


def _make_kernel(c_real, c_pad, f_real, f_pad, n_real, n_padded, token_tile,
                 two_phase, gelu_exact):
    ratio = float(f_real) ** (-0.5)      # nb_features == dim
    inv_c = 1.0 / float(c_real)
    need_ch_mask = c_real != c_pad
    need_feat_mask = f_real != f_pad
    need_row_mask = n_padded != n_real
    bf16 = jnp.bfloat16

    def _ch_mask():
        if not need_ch_mask:
            return None
        return (jax.lax.broadcasted_iota(jnp.int32, (1, c_pad), 1)
                < c_real).astype(jnp.float32)

    def _feat_mask():
        if not need_feat_mask:
            return None
        return (jax.lax.broadcasted_iota(jnp.int32, (1, f_pad), 1)
                < f_real).astype(jnp.float32)

    def _row_mask(tile_start):
        if not need_row_mask:
            return None
        rows = tile_start + jax.lax.broadcasted_iota(jnp.int32, (token_tile, 1), 0)
        return (rows < n_real).astype(jnp.float32)

    def _layernorm(v, g, b, ch_mask):
        # Statistics over the real channel count only; padded lanes stay exactly zero
        # because gamma/beta are zero-padded.
        mean = jnp.sum(v, axis=-1, keepdims=True) * inv_c
        cen = v - mean
        if ch_mask is not None:
            cen = cen * ch_mask
        var = jnp.sum(cen * cen, axis=-1, keepdims=True) * inv_c
        return cen * jax.lax.rsqrt(var + LN_EPS) * g + b

    def _l2norm(v):
        ss = jnp.sum(v * v, axis=-1, keepdims=True)
        return v * jax.lax.rsqrt(jnp.maximum(ss, L2_EPS * L2_EPS))

    def _features(z, pT_bf, feat_mask, row_mask):
        # Performer softmax-kernel features: bf16 MXU operands, f32 accumulation,
        # exp argument built in f32.
        z_dash = jnp.dot(z.astype(bf16), pT_bf, preferred_element_type=jnp.float32)
        z_diag = 0.5 * jnp.sum(z * z, axis=-1, keepdims=True)
        zf = ratio * (jnp.exp(z_dash - z_diag) + SM_EPS)
        if feat_mask is not None:
            zf = zf * feat_mask
        if row_mask is not None:
            zf = zf * row_mask
        return zf

    def _gelu(h):
        return jax.nn.gelu(h, approximate=not gelu_exact)

    def _kv_stats(xn, wkv_bf, bkv, pT_bf, feat_mask, row_mask):
        kv = jnp.dot(xn.astype(bf16), wkv_bf, preferred_element_type=jnp.float32) + bkv
        k = _l2norm(kv[:, :c_pad])
        v = kv[:, c_pad:]
        kf = _features(k, pT_bf, feat_mask, row_mask)           # (TN, Fp)
        ksum = jnp.sum(kf, axis=0, keepdims=True)               # (1, Fp)
        # kf^T @ v: contract the (leading) token axis of both operands directly, no
        # materialized transpose on the critical path.
        ctx = jax.lax.dot_general(kf.astype(bf16), v.astype(bf16),
                                  dimension_numbers=(((0,), (0,)), ((), ())),
                                  preferred_element_type=jnp.float32)   # (Fp, Cp)
        return ksum, ctx

    def _tile_out(x, xn, ksum, ctx, wq_bf, bq, pT_bf, g2, be2,
                  wf1_bf, bf1, wf2_bf, bf2, ch_mask):
        q = _l2norm(jnp.dot(xn.astype(bf16), wq_bf,
                            preferred_element_type=jnp.float32) + bq)
        # Padded feature lanes of qf are harmless: ksum/ctx are zero there.
        qf = _features(q, pT_bf, None, None)
        denom = jnp.sum(qf * ksum, axis=-1, keepdims=True)
        d_inv = _recip(denom)
        attn = jnp.dot(qf.astype(bf16), ctx.astype(bf16),
                       preferred_element_type=jnp.float32) * d_inv
        x1 = x + attn                                            # residual 1
        xn2 = _layernorm(x1, g2, be2, ch_mask)
        h = jnp.dot(xn2.astype(bf16), wf1_bf, preferred_element_type=jnp.float32) + bf1
        h = _gelu(h)
        m = jnp.dot(h.astype(bf16), wf2_bf, preferred_element_type=jnp.float32) + bf2
        return x1 + m                                            # residual 2

    if not two_phase:
        # -------- single-pass fast path: grid=(B,), everything in one invocation --------
        def kernel(x_ref, wq_ref, bq_ref, wkv_ref, bkv_ref, g1_ref, be1_ref, pT_ref,
                   g2_ref, be2_ref, wf1_ref, bf1_ref, wf2_ref, bf2_ref, o_ref):
            ch_mask, feat_mask = _ch_mask(), _feat_mask()
            x = x_ref[0].astype(jnp.float32)
            xn = _layernorm(x, g1_ref[...], be1_ref[...], ch_mask)
            ksum, ctx = _kv_stats(xn, wkv_ref[...], bkv_ref[...], pT_ref[...],
                                  feat_mask, _row_mask(0))
            o_ref[0] = _tile_out(x, xn, ksum, ctx, wq_ref[...], bq_ref[...], pT_ref[...],
                                 g2_ref[...], be2_ref[...], wf1_ref[...], bf1_ref[...],
                                 wf2_ref[...], bf2_ref[...], ch_mask)
        return kernel

    # -------- two-phase token-tiled path: grid=(B, 2, T), scratch accumulation ----------
    def kernel(x_ref, wq_ref, bq_ref, wkv_ref, bkv_ref, g1_ref, be1_ref, pT_ref,
               g2_ref, be2_ref, wf1_ref, bf1_ref, wf2_ref, bf2_ref, o_ref,
               ctx_ref, ksum_ref):
        phase = pl.program_id(1)
        t = pl.program_id(2)
        ch_mask, feat_mask = _ch_mask(), _feat_mask()
        x = x_ref[0].astype(jnp.float32)
        xn = _layernorm(x, g1_ref[...], be1_ref[...], ch_mask)

        @pl.when(phase == 0)
        def _phase_kv():
            @pl.when(t == 0)
            def _init():
                ctx_ref[...] = jnp.zeros_like(ctx_ref)
                ksum_ref[...] = jnp.zeros_like(ksum_ref)
                # Insurance: the (b, 0) output block is resident-but-unwritten for all of
                # phase 0; zero it so any forced per-step writeback cannot leak garbage.
                o_ref[...] = jnp.zeros_like(o_ref)

            ksum, ctx = _kv_stats(xn, wkv_ref[...], bkv_ref[...], pT_ref[...],
                                  feat_mask, _row_mask(t * token_tile))
            ksum_ref[...] += ksum
            ctx_ref[...] += ctx

        @pl.when(phase == 1)
        def _phase_out():
            o_ref[0] = _tile_out(x, xn, ksum_ref[...], ctx_ref[...],
                                 wq_ref[...], bq_ref[...], pT_ref[...],
                                 g2_ref[...], be2_ref[...], wf1_ref[...], bf1_ref[...],
                                 wf2_ref[...], bf2_ref[...], ch_mask)

    return kernel


def enltb_forward(x_nchw, packed, *, single_buffer_weights=True, gelu_exact=True,
                  force_two_phase=False, max_tile=None):
    """x_nchw: (B, C, H, W) float32; packed: padded/fused params. Returns (B, C, H, W) f32."""
    B, C, H, W = x_nchw.shape
    N = H * W
    Cp = packed["wq"].shape[0]
    Fp = packed["pT"].shape[1]
    Hp = packed["wf1"].shape[1]

    weight_bytes = int(sum(int(v.size) * v.dtype.itemsize for v in packed.values()))
    single_pass, TN, N_pad, T, vmem_limit = _plan(
        N, Cp, Fp, Hp, weight_bytes, single_buffer_weights, force_two_phase, max_tile)

    # NCHW -> token-major (B, N, C): cast to bf16 first (halves transpose + kernel x-stream
    # bytes), then zero-pad channels to Cp lanes and tokens to the tile multiple.
    xb = x_nchw.astype(jnp.bfloat16)
    x_bnc = jnp.transpose(xb.reshape(B, C, N), (0, 2, 1))
    x_bnc = jnp.pad(x_bnc, ((0, 0), (0, N_pad - N), (0, Cp - C)))
    # TODO(synk): callers that supply/consume token-major (B, N, C) directly would avoid
    # this HBM round trip entirely.

    kernel = _make_kernel(C, Cp, C, Fp, N, N_pad, TN, not single_pass, gelu_exact)

    def const_spec(shape):
        nd = len(shape)
        index_map = lambda *args, _nd=nd: (0,) * _nd
        if single_buffer_weights and hasattr(pl, "Buffered"):
            try:
                # Grid-invariant weights: single buffer (no second never-used copy).
                return pl.BlockSpec(shape, index_map, pipeline_mode=pl.Buffered(1))
            except Exception:
                pass
        return pl.BlockSpec(shape, index_map)

    weight_specs = [
        const_spec((Cp, Cp)), const_spec((1, Cp)),            # wq, bq
        const_spec((Cp, 2 * Cp)), const_spec((1, 2 * Cp)),    # wkv, bkv (fused K|V)
        const_spec((1, Cp)), const_spec((1, Cp)),             # norm1 gamma/beta
        const_spec((Cp, Fp)),                                 # projection^T
        const_spec((1, Cp)), const_spec((1, Cp)),             # norm2 gamma/beta
        const_spec((Cp, Hp)), const_spec((1, Hp)),            # mlp fc1
        const_spec((Hp, Cp)), const_spec((1, Cp)),            # mlp fc2
    ]

    if single_pass:
        grid = (B,)
        x_spec = pl.BlockSpec((1, N_pad, Cp), lambda b: (b, 0, 0))
        out_spec = pl.BlockSpec((1, N_pad, Cp), lambda b: (b, 0, 0))
        scratch = []
        semantics = ("parallel",)
    else:
        grid = (B, 2, T)
        x_spec = pl.BlockSpec((1, TN, Cp), lambda b, p, t: (b, t, 0))
        # Phase 0 pins the output block to (b, 0) (zero-initialized at t==0 as insurance);
        # phase 1 writes each (b, t) tile exactly once.
        out_spec = pl.BlockSpec((1, TN, Cp), lambda b, p, t: (b, p * t, 0))
        scratch = [pltpu.VMEM((Fp, Cp), jnp.float32),    # context accumulator (F, C)
                   pltpu.VMEM((1, Fp), jnp.float32)]     # k_cumsum accumulator
        semantics = ("parallel", "arbitrary", "arbitrary")

    out = pl.pallas_call(
        kernel,
        out_shape=jax.ShapeDtypeStruct((B, N_pad, Cp), jnp.float32),
        grid=grid,
        in_specs=[x_spec] + weight_specs,
        out_specs=out_spec,
        scratch_shapes=scratch,
        compiler_params=_CompilerParams(
            dimension_semantics=semantics,
            vmem_limit_bytes=vmem_limit,
        ),
    )(
        x_bnc,
        packed["wq"], packed["bq"],
        packed["wkv"], packed["bkv"],
        packed["g1"], packed["be1"],
        packed["pT"],
        packed["g2"], packed["be2"],
        packed["wf1"], packed["bf1"],
        packed["wf2"], packed["bf2"],
    )

    out = out[:, :N, :C]
    return jnp.transpose(out.reshape(B, H, W, C), (0, 3, 1, 2))


def pack_params(params):
    """Pad to lane multiples, fuse K/V projections and cast MXU weights to bf16."""
    C = params["w1_t"].shape[0]
    hidden = params["wf1_t"].shape[1]
    F = params["proj_t"].shape[1]
    Cp, Fp, Hp = _round_up(C, LANE), _round_up(F, LANE), _round_up(hidden, LANE)
    bf16 = jnp.bfloat16

    def pad2(a, r, c, dtype=jnp.float32):
        a = jnp.pad(a, ((0, r - a.shape[0]), (0, c - a.shape[1])))
        return a.astype(dtype)

    wk = pad2(params["w2_t"], Cp, Cp, bf16)
    wv = pad2(params["wa_t"], Cp, Cp, bf16)
    bk = pad2(params["b2"], 1, Cp)
    bv = pad2(params["ba"], 1, Cp)
    return {
        # bf16 MXU operands; biases / norm affine stay f32 (added after f32 accumulation).
        "wq": pad2(params["w1_t"], Cp, Cp, bf16), "bq": pad2(params["b1"], 1, Cp),
        "wkv": jnp.concatenate([wk, wv], axis=1),
        "bkv": jnp.concatenate([bk, bv], axis=1),
        "g1": pad2(params["g1"], 1, Cp), "be1": pad2(params["be1"], 1, Cp),
        "pT": pad2(params["proj_t"], Cp, Fp, bf16),
        "g2": pad2(params["g2"], 1, Cp), "be2": pad2(params["be2"], 1, Cp),
        "wf1": pad2(params["wf1_t"], Cp, Hp, bf16), "bf1": pad2(params["bf1"], 1, Hp),
        "wf2": pad2(params["wf2_t"], Hp, Cp, bf16), "bf2": pad2(params["bf2"], 1, Cp),
    }


def enltb_reference(x_nchw, params):
    """Pure-JAX f32 reference mirroring the PyTorch forward (eval mode)."""
    B, C, H, W = x_nchw.shape
    N = H * W
    x = jnp.transpose(x_nchw.reshape(B, C, N), (0, 2, 1))    # (B,N,C)
    shortcut = x

    def ln(t, g, b):
        mu = jnp.mean(t, axis=-1, keepdims=True)
        var = jnp.mean((t - mu) ** 2, axis=-1, keepdims=True)
        return (t - mu) / jnp.sqrt(var + LN_EPS) * g + b

    xn = ln(x, params["g1"][0], params["be1"][0])
    q = xn @ params["w1_t"] + params["b1"][0]
    k = xn @ params["w2_t"] + params["b2"][0]
    v = xn @ params["wa_t"] + params["ba"][0]

    def l2n(t):
        nrm = jnp.sqrt(jnp.sum(t * t, axis=-1, keepdims=True))
        return t / jnp.maximum(nrm, L2_EPS)

    q, k = l2n(q), l2n(k)
    ratio = C ** (-0.5)
    pT = params["proj_t"]
    qf = ratio * (jnp.exp(q @ pT - 0.5 * jnp.sum(q * q, -1, keepdims=True)) + SM_EPS)
    kf = ratio * (jnp.exp(k @ pT - 0.5 * jnp.sum(k * k, -1, keepdims=True)) + SM_EPS)

    k_cumsum = jnp.sum(kf, axis=1)                                      # (B,F)
    d_inv = 1.0 / jnp.einsum("bnf,bf->bn", qf, k_cumsum)                # (B,N)
    context = jnp.einsum("bnf,bnc->bfc", kf, v)                         # (B,F,C)
    attn = jnp.einsum("bfc,bnf,bn->bnc", context, qf, d_inv)

    x1 = shortcut + attn
    xn2 = ln(x1, params["g2"][0], params["be2"][0])
    h = jax.nn.gelu(xn2 @ params["wf1_t"] + params["bf1"][0], approximate=False)
    m = h @ params["wf2_t"] + params["bf2"][0]
    out = x1 + m
    return jnp.transpose(out.reshape(B, H, W, C), (0, 3, 1, 2))


def make_params(key, dim, mlp_ratio=4.0):
    hidden = int(dim * mlp_ratio)
    ks = jax.random.split(key, 12)
    scale = 1.0 / math.sqrt(dim)

    def lin(k, shape, s):
        return jax.random.uniform(k, shape, jnp.float32, -1.0, 1.0) * s

    # 1x1 conv weights (C_out, C_in) stored pre-transposed as (C_in, C_out)
    w1 = lin(ks[0], (dim, dim), scale)
    w2 = lin(ks[1], (dim, dim), scale)
    wa = lin(ks[2], (dim, dim), scale)
    b1 = lin(ks[3], (1, dim), scale)
    b2 = lin(ks[4], (1, dim), scale)
    ba = lin(ks[5], (1, dim), scale)

    # Gaussian orthogonal random projection (nb_features = dim, scaling = 0)
    g = jax.random.normal(ks[6], (dim, dim), jnp.float32)
    qmat, _ = jnp.linalg.qr(g)
    qmat = qmat.T                                                    # (nb_features, dim)
    mult = jnp.linalg.norm(jax.random.normal(ks[7], (dim, dim)), axis=1)
    proj = mult[:, None] * qmat                                      # (nb_features, dim)

    wf1 = lin(ks[8], (hidden, dim), scale)
    bf1 = lin(ks[9], (1, hidden), scale)
    wf2 = lin(ks[10], (dim, hidden), 1.0 / math.sqrt(hidden))
    bf2 = lin(ks[11], (1, dim), 1.0 / math.sqrt(hidden))

    return {
        "w1_t": w1.T, "b1": b1,
        "w2_t": w2.T, "b2": b2,
        "wa_t": wa.T, "ba": ba,
        "g1": jnp.ones((1, dim), jnp.float32), "be1": jnp.zeros((1, dim), jnp.float32),
        "proj_t": proj.T,                                            # (dim, nb_features)
        "g2": jnp.ones((1, dim), jnp.float32), "be2": jnp.zeros((1, dim), jnp.float32),
        "wf1_t": wf1.T, "bf1": bf1,
        "wf2_t": wf2.T, "bf2": bf2,
    }


def _run(x, packed, **kw):
    """Run the kernel, falling back to progressively more conservative configs."""
    attempts = (
        dict(single_buffer_weights=True, gelu_exact=True),
        dict(single_buffer_weights=False, gelu_exact=True),
        dict(single_buffer_weights=True, gelu_exact=False),
        dict(single_buffer_weights=False, gelu_exact=False),
    )
    err = None
    for extra in attempts:
        try:
            fwd = jax.jit(functools.partial(enltb_forward, **kw, **extra))
            return jax.block_until_ready(fwd(x, packed))
        except Exception as e:      # try a more conservative configuration
            err = e
    raise err


if __name__ == "__main__":
    key = jax.random.PRNGKey(0)
    kp, kx1, kx2 = jax.random.split(key, 3)

    dim = 32                                     # ENLTB(dim=32), mlp_hidden = 128
    params = make_params(kp, dim)
    packed = pack_params(params)
    ref_fn = jax.jit(enltb_reference)

    # bf16 MXU operands + bf16 x -> standard bf16 matmul tolerance vs the f32 reference.
    RTOL = ATOL = 5e-2

    # (1) Small N -> single-pass fast path (grid=(B,), one fused invocation per batch).
    x1 = jax.random.normal(kx1, (2, dim, 8, 8), jnp.float32)
    out1 = _run(x1, packed)
    ref1 = jax.block_until_ready(ref_fn(x1, params))
    assert out1.shape == x1.shape
    np.testing.assert_allclose(np.asarray(out1), np.asarray(ref1), rtol=RTOL, atol=ATOL)

    # (2) Ragged N forced through the tiled two-phase path
    #     (multi-tile scratch accumulation + tail-token masking).
    x2 = jax.random.normal(kx2, (1, dim, 15, 15), jnp.float32)
    out2 = _run(x2, packed, force_two_phase=True, max_tile=128)
    ref2 = jax.block_until_ready(ref_fn(x2, params))
    assert out2.shape == x2.shape
    np.testing.assert_allclose(np.asarray(out2), np.asarray(ref2), rtol=RTOL, atol=ATOL)

    print("KERNEL_OK")
</pallas_src>

<mosaic_0001>
module attributes {stable_mosaic.version = 11 : i64} {
  func.func @kernel(%arg0: i32, %arg1: memref<1x64x128xbf16, #tpu.memory_space<vmem>>, %arg2: memref<128x128xbf16, #tpu.memory_space<vmem>>, %arg3: memref<1x128xf32, #tpu.memory_space<vmem>>, %arg4: memref<128x256xbf16, #tpu.memory_space<vmem>>, %arg5: memref<1x256xf32, #tpu.memory_space<vmem>>, %arg6: memref<1x128xf32, #tpu.memory_space<vmem>>, %arg7: memref<1x128xf32, #tpu.memory_space<vmem>>, %arg8: memref<128x128xbf16, #tpu.memory_space<vmem>>, %arg9: memref<1x128xf32, #tpu.memory_space<vmem>>, %arg10: memref<1x128xf32, #tpu.memory_space<vmem>>, %arg11: memref<128x128xbf16, #tpu.memory_space<vmem>>, %arg12: memref<1x128xf32, #tpu.memory_space<vmem>>, %arg13: memref<128x128xbf16, #tpu.memory_space<vmem>>, %arg14: memref<1x128xf32, #tpu.memory_space<vmem>>, %arg15: memref<1x64x128xf32, #tpu.memory_space<vmem>>) attributes {dimension_semantics = [#tpu.dimension_semantics<parallel>], iteration_bounds = array<i64: 2>, scalar_prefetch = 0 : i64, scratch_operands = 0 : i64, tpu.core_type = #tpu.core_type<tc>, window_params = [{transform_indices = @transform_0, window_bounds = array<i64: 1, 64, 128>}, {pipeline_mode = #tpu.pipeline_mode<synchronous>, transform_indices = @transform_1, window_bounds = array<i64: 128, 128>}, {pipeline_mode = #tpu.pipeline_mode<synchronous>, transform_indices = @transform_2, window_bounds = array<i64: 1, 128>}, {pipeline_mode = #tpu.pipeline_mode<synchronous>, transform_indices = @transform_3, window_bounds = array<i64: 128, 256>}, {pipeline_mode = #tpu.pipeline_mode<synchronous>, transform_indices = @transform_4, window_bounds = array<i64: 1, 256>}, {pipeline_mode = #tpu.pipeline_mode<synchronous>, transform_indices = @transform_5, window_bounds = array<i64: 1, 128>}, {pipeline_mode = #tpu.pipeline_mode<synchronous>, transform_indices = @transform_6, window_bounds = array<i64: 1, 128>}, {pipeline_mode = #tpu.pipeline_mode<synchronous>, transform_indices = @transform_7, window_bounds = array<i64: 128, 128>}, {pipeline_mode = #tpu.pipeline_mode<synchronous>, transform_indices = @transform_8, window_bounds = array<i64: 1, 128>}, {pipeline_mode = #tpu.pipeline_mode<synchronous>, transform_indices = @transform_9, window_bounds = array<i64: 1, 128>}, {pipeline_mode = #tpu.pipeline_mode<synchronous>, transform_indices = @transform_10, window_bounds = array<i64: 128, 128>}, {pipeline_mode = #tpu.pipeline_mode<synchronous>, transform_indices = @transform_11, window_bounds = array<i64: 1, 128>}, {pipeline_mode = #tpu.pipeline_mode<synchronous>, transform_indices = @transform_12, window_bounds = array<i64: 128, 128>}, {pipeline_mode = #tpu.pipeline_mode<synchronous>, transform_indices = @transform_13, window_bounds = array<i64: 1, 128>}, {transform_indices = @transform_14, window_bounds = array<i64: 1, 64, 128>}]} {
    %0 = tpu.iota {dimensions = array<i32: 1>} : vector<1x128xi32>
    %c32_i32 = arith.constant 32 : i32
    %1 = vector.broadcast %c32_i32 : i32 to vector<1x128xi32>
    %2 = arith.cmpi slt, %0, %1 : vector<1x128xi32>
    %3 = arith.extui %2 : vector<1x128xi1> to vector<1x128xi32>
    %4 = arith.sitofp %3 : vector<1x128xi32> to vector<1x128xf32>
    %5 = tpu.iota {dimensions = array<i32: 1>} : vector<1x128xi32>
    %c32_i32_0 = arith.constant 32 : i32
    %6 = vector.broadcast %c32_i32_0 : i32 to vector<1x128xi32>
    %7 = arith.cmpi slt, %5, %6 : vector<1x128xi32>
    %8 = arith.extui %7 : vector<1x128xi1> to vector<1x128xi32>
    %9 = arith.sitofp %8 : vector<1x128xi32> to vector<1x128xf32>
    %c0 = arith.constant 0 : index
    %c0_1 = arith.constant 0 : index
    %c0_2 = arith.constant 0 : index
    %10 = vector.load %arg1[%c0, %c0_1, %c0_2] : memref<1x64x128xbf16, #tpu.memory_space<vmem>>, vector<1x64x128xbf16>
    %11 = vector.shape_cast %10 : vector<1x64x128xbf16> to vector<64x128xbf16>
    %12 = arith.extf %11 : vector<64x128xbf16> to vector<64x128xf32>
    %c0_3 = arith.constant 0 : index
    %c0_4 = arith.constant 0 : index
    %13 = vector.load %arg6[%c0_3, %c0_4] : memref<1x128xf32, #tpu.memory_space<vmem>>, vector<1x128xf32>
    %c0_5 = arith.constant 0 : index
    %c0_6 = arith.constant 0 : index
    %14 = vector.load %arg7[%c0_5, %c0_6] : memref<1x128xf32, #tpu.memory_space<vmem>>, vector<1x128xf32>
    %cst = arith.constant dense<0.000000e+00> : vector<64xf32>
    %15 = vector.multi_reduction <add>, %12, %cst [1] : vector<64x128xf32> to vector<64xf32>
    %16 = vector.shape_cast %15 : vector<64xf32> to vector<64x1xf32>
    %cst_7 = arith.constant 3.125000e-02 : f32
    %17 = vector.broadcast %cst_7 : f32 to vector<64x1xf32>
    %18 = arith.mulf %16, %17 : vector<64x1xf32>
    %19 = vector.broadcast %18 : vector<64x1xf32> to vector<64x128xf32>
    %20 = arith.subf %12, %19 : vector<64x128xf32>
    %21 = vector.broadcast %4 : vector<1x128xf32> to vector<64x128xf32>
    %22 = arith.mulf %20, %21 : vector<64x128xf32>
    %23 = arith.mulf %22, %22 : vector<64x128xf32>
    %cst_8 = arith.constant dense<0.000000e+00> : vector<64xf32>
    %24 = vector.multi_reduction <add>, %23, %cst_8 [1] : vector<64x128xf32> to vector<64xf32>
    %25 = vector.shape_cast %24 : vector<64xf32> to vector<64x1xf32>
    %cst_9 = arith.constant 3.125000e-02 : f32
    %26 = vector.broadcast %cst_9 : f32 to vector<64x1xf32>
    %27 = arith.mulf %25, %26 : vector<64x1xf32>
    %cst_10 = arith.constant 9.99999974E-6 : f32
    %28 = vector.broadcast %cst_10 : f32 to vector<64x1xf32>
    %29 = arith.addf %27, %28 : vector<64x1xf32>
    %30 = math.rsqrt %29 : vector<64x1xf32>
    %31 = vector.broadcast %30 : vector<64x1xf32> to vector<64x128xf32>
    %32 = arith.mulf %22, %31 : vector<64x128xf32>
    %33 = vector.broadcast %13 : vector<1x128xf32> to vector<64x128xf32>
    %34 = arith.mulf %32, %33 : vector<64x128xf32>
    %35 = vector.broadcast %14 : vector<1x128xf32> to vector<64x128xf32>
    %36 = arith.addf %34, %35 : vector<64x128xf32>
    %c0_11 = arith.constant 0 : index
    %c0_12 = arith.constant 0 : index
    %37 = vector.load %arg4[%c0_11, %c0_12] : memref<128x256xbf16, #tpu.memory_space<vmem>>, vector<128x256xbf16>
    %c0_13 = arith.constant 0 : index
    %c0_14 = arith.constant 0 : index
    %38 = vector.load %arg5[%c0_13, %c0_14] : memref<1x256xf32, #tpu.memory_space<vmem>>, vector<1x256xf32>
    %c0_15 = arith.constant 0 : index
    %c0_16 = arith.constant 0 : index
    %39 = vector.load %arg8[%c0_15, %c0_16] : memref<128x128xbf16, #tpu.memory_space<vmem>>, vector<128x128xbf16>
    %40 = arith.truncf %36 : vector<64x128xf32> to vector<64x128xbf16>
    %cst_17 = arith.constant dense<0.000000e+00> : vector<64x256xf32>
    %41 = tpu.matmul %40, %37, %cst_17 {dimension_numbers = #tpu.dot_dimension_numbers<[1], [0], [0], [1], [0, 0, 1, 1], [], []>} : vector<64x128xbf16>, vector<128x256xbf16>, vector<64x256xf32> -> vector<64x256xf32>
    %42 = vector.broadcast %38 : vector<1x256xf32> to vector<64x256xf32>
    %43 = arith.addf %41, %42 : vector<64x256xf32>
    %44 = vector.extract_strided_slice %43 {offsets = [0, 0], sizes = [64, 128], strides = [1, 1]} : vector<64x256xf32> to vector<64x128xf32>
    %45 = arith.mulf %44, %44 : vector<64x128xf32>
    %cst_18 = arith.constant dense<0.000000e+00> : vector<64xf32>
    %46 = vector.multi_reduction <add>, %45, %cst_18 [1] : vector<64x128xf32> to vector<64xf32>
    %47 = vector.shape_cast %46 : vector<64xf32> to vector<64x1xf32>
    %cst_19 = arith.constant 2.500000e-09 : f32
    %48 = vector.broadcast %cst_19 : f32 to vector<64x1xf32>
    %49 = arith.maximumf %47, %48 : vector<64x1xf32>
    %50 = math.rsqrt %49 : vector<64x1xf32>
    %51 = vector.broadcast %50 : vector<64x1xf32> to vector<64x128xf32>
    %52 = arith.mulf %44, %51 : vector<64x128xf32>
    %53 = vector.extract_strided_slice %43 {offsets = [0, 128], sizes = [64, 128], strides = [1, 1]} : vector<64x256xf32> to vector<64x128xf32>
    %54 = arith.truncf %52 : vector<64x128xf32> to vector<64x128xbf16>
    %cst_20 = arith.constant dense<0.000000e+00> : vector<64x128xf32>
    %55 = tpu.matmul %54, %39, %cst_20 {dimension_numbers = #tpu.dot_dimension_numbers<[1], [0], [0], [1], [0, 0, 1, 1], [], []>} : vector<64x128xbf16>, vector<128x128xbf16>, vector<64x128xf32> -> vector<64x128xf32>
    %56 = arith.mulf %52, %52 : vector<64x128xf32>
    %cst_21 = arith.constant dense<0.000000e+00> : vector<64xf32>
    %57 = vector.multi_reduction <add>, %56, %cst_21 [1] : vector<64x128xf32> to vector<64xf32>
    %58 = vector.shape_cast %57 : vector<64xf32> to vector<64x1xf32>
    %cst_22 = arith.constant 5.000000e-01 : f32
    %59 = vector.broadcast %cst_22 : f32 to vector<64x1xf32>
    %60 = arith.mulf %59, %58 : vector<64x1xf32>
    %61 = vector.broadcast %60 : vector<64x1xf32> to vector<64x128xf32>
    %62 = arith.subf %55, %61 : vector<64x128xf32>
    %63 = math.exp %62 : vector<64x128xf32>
    %cst_23 = arith.constant 9.99999974E-5 : f32
    %64 = vector.broadcast %cst_23 : f32 to vector<64x128xf32>
    %65 = arith.addf %63, %64 : vector<64x128xf32>
    %cst_24 = arith.constant 0.176776692 : f32
    %66 = vector.broadcast %cst_24 : f32 to vector<64x128xf32>
    %67 = arith.mulf %66, %65 : vector<64x128xf32>
    %68 = vector.broadcast %9 : vector<1x128xf32> to vector<64x128xf32>
    %69 = arith.mulf %67, %68 : vector<64x128xf32>
    %cst_25 = arith.constant dense<0.000000e+00> : vector<128xf32>
    %70 = vector.multi_reduction <add>, %69, %cst_25 [0] : vector<64x128xf32> to vector<128xf32>
    %71 = vector.shape_cast %70 : vector<128xf32> to vector<1x128xf32>
    %72 = arith.truncf %69 : vector<64x128xf32> to vector<64x128xbf16>
    %73 = arith.truncf %53 : vector<64x128xf32> to vector<64x128xbf16>
    %cst_26 = arith.constant dense<0.000000e+00> : vector<128x128xf32>
    %74 = tpu.matmul %72, %73, %cst_26 {dimension_numbers = #tpu.dot_dimension_numbers<[0], [0], [1], [1], [0, 1, 1, 1], [], []>} : vector<64x128xbf16>, vector<64x128xbf16>, vector<128x128xf32> -> vector<128x128xf32>
    %c0_27 = arith.constant 0 : index
    %c0_28 = arith.constant 0 : index
    %75 = vector.load %arg2[%c0_27, %c0_28] : memref<128x128xbf16, #tpu.memory_space<vmem>>, vector<128x128xbf16>
    %c0_29 = arith.constant 0 : index
    %c0_30 = arith.constant 0 : index
    %76 = vector.load %arg3[%c0_29, %c0_30] : memref<1x128xf32, #tpu.memory_space<vmem>>, vector<1x128xf32>
    %c0_31 = arith.constant 0 : index
    %c0_32 = arith.constant 0 : index
    %77 = vector.load %arg8[%c0_31, %c0_32] : memref<128x128xbf16, #tpu.memory_space<vmem>>, vector<128x128xbf16>
    %c0_33 = arith.constant 0 : index
    %c0_34 = arith.constant 0 : index
    %78 = vector.load %arg9[%c0_33, %c0_34] : memref<1x128xf32, #tpu.memory_space<vmem>>, vector<1x128xf32>
    %c0_35 = arith.constant 0 : index
    %c0_36 = arith.constant 0 : index
    %79 = vector.load %arg10[%c0_35, %c0_36] : memref<1x128xf32, #tpu.memory_space<vmem>>, vector<1x128xf32>
    %c0_37 = arith.constant 0 : index
    %c0_38 = arith.constant 0 : index
    %80 = vector.load %arg11[%c0_37, %c0_38] : memref<128x128xbf16, #tpu.memory_space<vmem>>, vector<128x128xbf16>
    %c0_39 = arith.constant 0 : index
    %c0_40 = arith.constant 0 : index
    %81 = vector.load %arg12[%c0_39, %c0_40] : memref<1x128xf32, #tpu.memory_space<vmem>>, vector<1x128xf32>
    %c0_41 = arith.constant 0 : index
    %c0_42 = arith.constant 0 : index
    %82 = vector.load %arg13[%c0_41, %c0_42] : memref<128x128xbf16, #tpu.memory_space<vmem>>, vector<128x128xbf16>
    %c0_43 = arith.constant 0 : index
    %c0_44 = arith.constant 0 : index
    %83 = vector.load %arg14[%c0_43, %c0_44] : memref<1x128xf32, #tpu.memory_space<vmem>>, vector<1x128xf32>
    %84 = arith.truncf %36 : vector<64x128xf32> to vector<64x128xbf16>
    %cst_45 = arith.constant dense<0.000000e+00> : vector<64x128xf32>
    %85 = tpu.matmul %84, %75, %cst_45 {dimension_numbers = #tpu.dot_dimension_numbers<[1], [0], [0], [1], [0, 0, 1, 1], [], []>} : vector<64x128xbf16>, vector<128x128xbf16>, vector<64x128xf32> -> vector<64x128xf32>
    %86 = vector.broadcast %76 : vector<1x128xf32> to vector<64x128xf32>
    %87 = arith.addf %85, %86 : vector<64x128xf32>
    %88 = arith.mulf %87, %87 : vector<64x128xf32>
    %cst_46 = arith.constant dense<0.000000e+00> : vector<64xf32>
    %89 = vector.multi_reduction <add>, %88, %cst_46 [1] : vector<64x128xf32> to vector<64xf32>
    %90 = vector.shape_cast %89 : vector<64xf32> to vector<64x1xf32>
    %cst_47 = arith.constant 2.500000e-09 : f32
    %91 = vector.broadcast %cst_47 : f32 to vector<64x1xf32>
    %92 = arith.maximumf %90, %91 : vector<64x1xf32>
    %93 = math.rsqrt %92 : vector<64x1xf32>
    %94 = vector.broadcast %93 : vector<64x1xf32> to vector<64x128xf32>
    %95 = arith.mulf %87, %94 : vector<64x128xf32>
    %96 = arith.truncf %95 : vector<64x128xf32> to vector<64x128xbf16>
    %cst_48 = arith.constant dense<0.000000e+00> : vector<64x128xf32>
    %97 = tpu.matmul %96, %77, %cst_48 {dimension_numbers = #tpu.dot_dimension_numbers<[1], [0], [0], [1], [0, 0, 1, 1], [], []>} : vector<64x128xbf16>, vector<128x128xbf16>, vector<64x128xf32> -> vector<64x128xf32>
    %98 = arith.mulf %95, %95 : vector<64x128xf32>
    %cst_49 = arith.constant dense<0.000000e+00> : vector<64xf32>
    %99 = vector.multi_reduction <add>, %98, %cst_49 [1] : vector<64x128xf32> to vector<64xf32>
    %100 = vector.shape_cast %99 : vector<64xf32> to vector<64x1xf32>
    %cst_50 = arith.constant 5.000000e-01 : f32
    %101 = vector.broadcast %cst_50 : f32 to vector<64x1xf32>
    %102 = arith.mulf %101, %100 : vector<64x1xf32>
    %103 = vector.broadcast %102 : vector<64x1xf32> to vector<64x128xf32>
    %104 = arith.subf %97, %103 : vector<64x128xf32>
    %105 = math.exp %104 : vector<64x128xf32>
    %cst_51 = arith.constant 9.99999974E-5 : f32
    %106 = vector.broadcast %cst_51 : f32 to vector<64x128xf32>
    %107 = arith.addf %105, %106 : vector<64x128xf32>
    %cst_52 = arith.constant 0.176776692 : f32
    %108 = vector.broadcast %cst_52 : f32 to vector<64x128xf32>
    %109 = arith.mulf %108, %107 : vector<64x128xf32>
    %110 = vector.broadcast %71 : vector<1x128xf32> to vector<64x128xf32>
    %111 = arith.mulf %109, %110 : vector<64x128xf32>
    %cst_53 = arith.constant dense<0.000000e+00> : vector<64xf32>
    %112 = vector.multi_reduction <add>, %111, %cst_53 [1] : vector<64x128xf32> to vector<64xf32>
    %113 = vector.shape_cast %112 : vector<64xf32> to vector<64x1xf32>
    %114 = tpu.reciprocal %113 {approx = true} : vector<64x1xf32> -> vector<64x1xf32>
    %115 = arith.truncf %109 : vector<64x128xf32> to vector<64x128xbf16>
    %116 = arith.truncf %74 : vector<128x128xf32> to vector<128x128xbf16>
    %cst_54 = arith.constant dense<0.000000e+00> : vector<64x128xf32>
    %117 = tpu.matmul %115, %116, %cst_54 {dimension_numbers = #tpu.dot_dimension_numbers<[1], [0], [0], [1], [0, 0, 1, 1], [], []>} : vector<64x128xbf16>, vector<128x128xbf16>, vector<64x128xf32> -> vector<64x128xf32>
    %118 = vector.broadcast %114 : vector<64x1xf32> to vector<64x128xf32>
    %119 = arith.mulf %117, %118 : vector<64x128xf32>
    %120 = arith.addf %12, %119 : vector<64x128xf32>
    %cst_55 = arith.constant dense<0.000000e+00> : vector<64xf32>
    %121 = vector.multi_reduction <add>, %120, %cst_55 [1] : vector<64x128xf32> to vector<64xf32>
    %122 = vector.shape_cast %121 : vector<64xf32> to vector<64x1xf32>
    %cst_56 = arith.constant 3.125000e-02 : f32
    %123 = vector.broadcast %cst_56 : f32 to vector<64x1xf32>
    %124 = arith.mulf %122, %123 : vector<64x1xf32>
    %125 = vector.broadcast %124 : vector<64x1xf32> to vector<64x128xf32>
    %126 = arith.subf %120, %125 : vector<64x128xf32>
    %127 = vector.broadcast %4 : vector<1x128xf32> to vector<64x128xf32>
    %128 = arith.mulf %126, %127 : vector<64x128xf32>
    %129 = arith.mulf %128, %128 : vector<64x128xf32>
    %cst_57 = arith.constant dense<0.000000e+00> : vector<64xf32>
    %130 = vector.multi_reduction <add>, %129, %cst_57 [1] : vector<64x128xf32> to vector<64xf32>
    %131 = vector.shape_cast %130 : vector<64xf32> to vector<64x1xf32>
    %cst_58 = arith.constant 3.125000e-02 : f32
    %132 = vector.broadcast %cst_58 : f32 to vector<64x1xf32>
    %133 = arith.mulf %131, %132 : vector<64x1xf32>
    %cst_59 = arith.constant 9.99999974E-6 : f32
    %134 = vector.broadcast %cst_59 : f32 to vector<64x1xf32>
    %135 = arith.addf %133, %134 : vector<64x1xf32>
    %136 = math.rsqrt %135 : vector<64x1xf32>
    %137 = vector.broadcast %136 : vector<64x1xf32> to vector<64x128xf32>
    %138 = arith.mulf %128, %137 : vector<64x128xf32>
    %139 = vector.broadcast %78 : vector<1x128xf32> to vector<64x128xf32>
    %140 = arith.mulf %138, %139 : vector<64x128xf32>
    %141 = vector.broadcast %79 : vector<1x128xf32> to vector<64x128xf32>
    %142 = arith.addf %140, %141 : vector<64x128xf32>
    %143 = arith.truncf %142 : vector<64x128xf32> to vector<64x128xbf16>
    %cst_60 = arith.constant dense<0.000000e+00> : vector<64x128xf32>
    %144 = tpu.matmul %143, %80, %cst_60 {dimension_numbers = #tpu.dot_dimension_numbers<[1], [0], [0], [1], [0, 0, 1, 1], [], []>} : vector<64x128xbf16>, vector<128x128xbf16>, vector<64x128xf32> -> vector<64x128xf32>
    %145 = vector.broadcast %81 : vector<1x128xf32> to vector<64x128xf32>
    %146 = arith.addf %144, %145 : vector<64x128xf32>
    %147 = arith.mulf %146, %146 : vector<64x128xf32>
    %148 = arith.mulf %146, %147 : vector<64x128xf32>
    %cst_61 = arith.constant 4.471500e-02 : f32
    %149 = vector.broadcast %cst_61 : f32 to vector<64x128xf32>
    %150 = arith.mulf %149, %148 : vector<64x128xf32>
    %151 = arith.addf %146, %150 : vector<64x128xf32>
    %cst_62 = arith.constant 0.797884583 : f32
    %152 = vector.broadcast %cst_62 : f32 to vector<64x128xf32>
    %153 = arith.mulf %152, %151 : vector<64x128xf32>
    %154 = math.tanh %153 : vector<64x128xf32>
    %cst_63 = arith.constant 1.000000e+00 : f32
    %155 = vector.broadcast %cst_63 : f32 to vector<64x128xf32>
    %156 = arith.addf %155, %154 : vector<64x128xf32>
    %cst_64 = arith.constant 5.000000e-01 : f32
    %157 = vector.broadcast %cst_64 : f32 to vector<64x128xf32>
    %158 = arith.mulf %157, %156 : vector<64x128xf32>
    %159 = arith.mulf %146, %158 : vector<64x128xf32>
    %160 = arith.truncf %159 : vector<64x128xf32> to vector<64x128xbf16>
    %cst_65 = arith.constant dense<0.000000e+00> : vector<64x128xf32>
    %161 = tpu.matmul %160, %82, %cst_65 {dimension_numbers = #tpu.dot_dimension_numbers<[1], [0], [0], [1], [0, 0, 1, 1], [], []>} : vector<64x128xbf16>, vector<128x128xbf16>, vector<64x128xf32> -> vector<64x128xf32>
    %162 = vector.broadcast %83 : vector<1x128xf32> to vector<64x128xf32>
    %163 = arith.addf %161, %162 : vector<64x128xf32>
    %164 = arith.addf %120, %163 : vector<64x128xf32>
    %c0_66 = arith.constant 0 : index
    %c0_67 = arith.constant 0 : index
    %c0_68 = arith.constant 0 : index
    %165 = vector.load %arg15[%c0_66, %c0_67, %c0_68] : memref<1x64x128xf32, #tpu.memory_space<vmem>>, vector<1x64x128xf32>
    %166 = vector.shape_cast %165 : vector<1x64x128xf32> to vector<64x128xf32>
    %167 = vector.shape_cast %164 : vector<64x128xf32> to vector<1x64x128xf32>
    tpu.vector_store %arg15[%c0_66, %c0_67, %c0_68], %167 {strides = array<i32>} : memref<1x64x128xf32, #tpu.memory_space<vmem>>, vector<1x64x128xf32>,
    return
  }
  func.func @transform_0(%arg0: i32) -> (i32, i32, i32) {
    %c0_i32 = arith.constant 0 : i32
    %c0_i32_0 = arith.constant 0 : i32
    %c0_i32_1 = arith.constant 0 : i32
    return %arg0, %c0_i32, %c0_i32_0 : i32, i32, i32
  }
  func.func @transform_1(%arg0: i32) -> (i32, i32) {
    %c0_i32 = arith.constant 0 : i32
    %c0_i32_0 = arith.constant 0 : i32
    %c0_i32_1 = arith.constant 0 : i32
    return %c0_i32, %c0_i32_0 : i32, i32
  }
  func.func @transform_2(%arg0: i32) -> (i32, i32) {
    %c0_i32 = arith.constant 0 : i32
    %c0_i32_0 = arith.constant 0 : i32
    %c0_i32_1 = arith.constant 0 : i32
    return %c0_i32, %c0_i32_0 : i32, i32
  }
  func.func @transform_3(%arg0: i32) -> (i32, i32) {
    %c0_i32 = arith.constant 0 : i32
    %c0_i32_0 = arith.constant 0 : i32
    %c0_i32_1 = arith.constant 0 : i32
    return %c0_i32, %c0_i32_0 : i32, i32
  }
  func.func @transform_4(%arg0: i32) -> (i32, i32) {
    %c0_i32 = arith.constant 0 : i32
    %c0_i32_0 = arith.constant 0 : i32
    %c0_i32_1 = arith.constant 0 : i32
    return %c0_i32, %c0_i32_0 : i32, i32
  }
  func.func @transform_5(%arg0: i32) -> (i32, i32) {
    %c0_i32 = arith.constant 0 : i32
    %c0_i32_0 = arith.constant 0 : i32
    %c0_i32_1 = arith.constant 0 : i32
    return %c0_i32, %c0_i32_0 : i32, i32
  }
  func.func @transform_6(%arg0: i32) -> (i32, i32) {
    %c0_i32 = arith.constant 0 : i32
    %c0_i32_0 = arith.constant 0 : i32
    %c0_i32_1 = arith.constant 0 : i32
    return %c0_i32, %c0_i32_0 : i32, i32
  }
  func.func @transform_7(%arg0: i32) -> (i32, i32) {
    %c0_i32 = arith.constant 0 : i32
    %c0_i32_0 = arith.constant 0 : i32
    %c0_i32_1 = arith.constant 0 : i32
    return %c0_i32, %c0_i32_0 : i32, i32
  }
  func.func @transform_8(%arg0: i32) -> (i32, i32) {
    %c0_i32 = arith.constant 0 : i32
    %c0_i32_0 = arith.constant 0 : i32
    %c0_i32_1 = arith.constant 0 : i32
    return %c0_i32, %c0_i32_0 : i32, i32
  }
  func.func @transform_9(%arg0: i32) -> (i32, i32) {
    %c0_i32 = arith.constant 0 : i32
    %c0_i32_0 = arith.constant 0 : i32
    %c0_i32_1 = arith.constant 0 : i32
    return %c0_i32, %c0_i32_0 : i32, i32
  }
  func.func @transform_10(%arg0: i32) -> (i32, i32) {
    %c0_i32 = arith.constant 0 : i32
    %c0_i32_0 = arith.constant 0 : i32
    %c0_i32_1 = arith.constant 0 : i32
    return %c0_i32, %c0_i32_0 : i32, i32
  }
  func.func @transform_11(%arg0: i32) -> (i32, i32) {
    %c0_i32 = arith.constant 0 : i32
    %c0_i32_0 = arith.constant 0 : i32
    %c0_i32_1 = arith.constant 0 : i32
    return %c0_i32, %c0_i32_0 : i32, i32
  }
  func.func @transform_12(%arg0: i32) -> (i32, i32) {
    %c0_i32 = arith.constant 0 : i32
    %c0_i32_0 = arith.constant 0 : i32
    %c0_i32_1 = arith.constant 0 : i32
    return %c0_i32, %c0_i32_0 : i32, i32
  }
  func.func @transform_13(%arg0: i32) -> (i32, i32) {
    %c0_i32 = arith.constant 0 : i32
    %c0_i32_0 = arith.constant 0 : i32
    %c0_i32_1 = arith.constant 0 : i32
    return %c0_i32, %c0_i32_0 : i32, i32
  }
  func.func @transform_14(%arg0: i32) -> (i32, i32, i32) {
    %c0_i32 = arith.constant 0 : i32
    %c0_i32_0 = arith.constant 0 : i32
    %c0_i32_1 = arith.constant 0 : i32
    return %arg0, %c0_i32, %c0_i32_0 : i32, i32, i32
  }
}

module attributes {stable_mosaic.version = 11 : i64} {
  func.func @kernel(%arg0: i32, %arg1: memref<1x64x128xbf16, #tpu.memory_space<vmem>>, %arg2: memref<128x128xbf16, #tpu.memory_space<vmem>>, %arg3: memref<1x128xf32, #tpu.memory_space<vmem>>, %arg4: memref<128x256xbf16, #tpu.memory_space<vmem>>, %arg5: memref<1x256xf32, #tpu.memory_space<vmem>>, %arg6: memref<1x128xf32, #tpu.memory_space<vmem>>, %arg7: memref<1x128xf32, #tpu.memory_space<vmem>>, %arg8: memref<128x128xbf16, #tpu.memory_space<vmem>>, %arg9: memref<1x128xf32, #tpu.memory_space<vmem>>, %arg10: memref<1x128xf32, #tpu.memory_space<vmem>>, %arg11: memref<128x128xbf16, #tpu.memory_space<vmem>>, %arg12: memref<1x128xf32, #tpu.memory_space<vmem>>, %arg13: memref<128x128xbf16, #tpu.memory_space<vmem>>, %arg14: memref<1x128xf32, #tpu.memory_space<vmem>>, %arg15: memref<1x64x128xf32, #tpu.memory_space<vmem>>) attributes {dimension_semantics = [#tpu.dimension_semantics<parallel>], iteration_bounds = array<i64: 2>, scalar_prefetch = 0 : i64, scratch_operands = 0 : i64, tpu.core_type = #tpu.core_type<tc>, window_params = [{transform_indices = @transform_0, window_bounds = array<i64: 1, 64, 128>}, {pipeline_mode = #tpu.pipeline_mode<synchronous>, transform_indices = @transform_1, window_bounds = array<i64: 128, 128>}, {pipeline_mode = #tpu.pipeline_mode<synchronous>, transform_indices = @transform_2, window_bounds = array<i64: 1, 128>}, {pipeline_mode = #tpu.pipeline_mode<synchronous>, transform_indices = @transform_3, window_bounds = array<i64: 128, 256>}, {pipeline_mode = #tpu.pipeline_mode<synchronous>, transform_indices = @transform_4, window_bounds = array<i64: 1, 256>}, {pipeline_mode = #tpu.pipeline_mode<synchronous>, transform_indices = @transform_5, window_bounds = array<i64: 1, 128>}, {pipeline_mode = #tpu.pipeline_mode<synchronous>, transform_indices = @transform_6, window_bounds = array<i64: 1, 128>}, {pipeline_mode = #tpu.pipeline_mode<synchronous>, transform_indices = @transform_7, window_bounds = array<i64: 128, 128>}, {pipeline_mode = #tpu.pipeline_mode<synchronous>, transform_indices = @transform_8, window_bounds = array<i64: 1, 128>}, {pipeline_mode = #tpu.pipeline_mode<synchronous>, transform_indices = @transform_9, window_bounds = array<i64: 1, 128>}, {pipeline_mode = #tpu.pipeline_mode<synchronous>, transform_indices = @transform_10, window_bounds = array<i64: 128, 128>}, {pipeline_mode = #tpu.pipeline_mode<synchronous>, transform_indices = @transform_11, window_bounds = array<i64: 1, 128>}, {pipeline_mode = #tpu.pipeline_mode<synchronous>, transform_indices = @transform_12, window_bounds = array<i64: 128, 128>}, {pipeline_mode = #tpu.pipeline_mode<synchronous>, transform_indices = @transform_13, window_bounds = array<i64: 1, 128>}, {transform_indices = @transform_14, window_bounds = array<i64: 1, 64, 128>}]} {
    %0 = tpu.iota {dimensions = array<i32: 1>} : vector<1x128xi32>
    %c32_i32 = arith.constant 32 : i32
    %1 = vector.broadcast %c32_i32 : i32 to vector<1x128xi32>
    %2 = arith.cmpi slt, %0, %1 : vector<1x128xi32>
    %3 = arith.extui %2 : vector<1x128xi1> to vector<1x128xi32>
    %4 = arith.sitofp %3 : vector<1x128xi32> to vector<1x128xf32>
    %5 = tpu.iota {dimensions = array<i32: 1>} : vector<1x128xi32>
    %c32_i32_0 = arith.constant 32 : i32
    %6 = vector.broadcast %c32_i32_0 : i32 to vector<1x128xi32>
    %7 = arith.cmpi slt, %5, %6 : vector<1x128xi32>
    %8 = arith.extui %7 : vector<1x128xi1> to vector<1x128xi32>
    %9 = arith.sitofp %8 : vector<1x128xi32> to vector<1x128xf32>
    %c0 = arith.constant 0 : index
    %c0_1 = arith.constant 0 : index
    %c0_2 = arith.constant 0 : index
    %10 = vector.load %arg1[%c0, %c0_1, %c0_2] : memref<1x64x128xbf16, #tpu.memory_space<vmem>>, vector<1x64x128xbf16>
    %11 = vector.shape_cast %10 : vector<1x64x128xbf16> to vector<64x128xbf16>
    %12 = arith.extf %11 : vector<64x128xbf16> to vector<64x128xf32>
    %c0_3 = arith.constant 0 : index
    %c0_4 = arith.constant 0 : index
    %13 = vector.load %arg6[%c0_3, %c0_4] : memref<1x128xf32, #tpu.memory_space<vmem>>, vector<1x128xf32>
    %c0_5 = arith.constant 0 : index
    %c0_6 = arith.constant 0 : index
    %14 = vector.load %arg7[%c0_5, %c0_6] : memref<1x128xf32, #tpu.memory_space<vmem>>, vector<1x128xf32>
    %cst = arith.constant dense<0.000000e+00> : vector<64xf32>
    %15 = vector.multi_reduction <add>, %12, %cst [1] : vector<64x128xf32> to vector<64xf32>
    %16 = vector.shape_cast %15 : vector<64xf32> to vector<64x1xf32>
    %cst_7 = arith.constant 3.125000e-02 : f32
    %17 = vector.broadcast %cst_7 : f32 to vector<64x1xf32>
    %18 = arith.mulf %16, %17 : vector<64x1xf32>
    %19 = vector.broadcast %18 : vector<64x1xf32> to vector<64x128xf32>
    %20 = arith.subf %12, %19 : vector<64x128xf32>
    %21 = vector.broadcast %4 : vector<1x128xf32> to vector<64x128xf32>
    %22 = arith.mulf %20, %21 : vector<64x128xf32>
    %23 = arith.mulf %22, %22 : vector<64x128xf32>
    %cst_8 = arith.constant dense<0.000000e+00> : vector<64xf32>
    %24 = vector.multi_reduction <add>, %23, %cst_8 [1] : vector<64x128xf32> to vector<64xf32>
    %25 = vector.shape_cast %24 : vector<64xf32> to vector<64x1xf32>
    %cst_9 = arith.constant 3.125000e-02 : f32
    %26 = vector.broadcast %cst_9 : f32 to vector<64x1xf32>
    %27 = arith.mulf %25, %26 : vector<64x1xf32>
    %cst_10 = arith.constant 9.99999974E-6 : f32
    %28 = vector.broadcast %cst_10 : f32 to vector<64x1xf32>
    %29 = arith.addf %27, %28 : vector<64x1xf32>
    %30 = math.rsqrt %29 : vector<64x1xf32>
    %31 = vector.broadcast %30 : vector<64x1xf32> to vector<64x128xf32>
    %32 = arith.mulf %22, %31 : vector<64x128xf32>
    %33 = vector.broadcast %13 : vector<1x128xf32> to vector<64x128xf32>
    %34 = arith.mulf %32, %33 : vector<64x128xf32>
    %35 = vector.broadcast %14 : vector<1x128xf32> to vector<64x128xf32>
    %36 = arith.addf %34, %35 : vector<64x128xf32>
    %c0_11 = arith.constant 0 : index
    %c0_12 = arith.constant 0 : index
    %37 = vector.load %arg4[%c0_11, %c0_12] : memref<128x256xbf16, #tpu.memory_space<vmem>>, vector<128x256xbf16>
    %c0_13 = arith.constant 0 : index
    %c0_14 = arith.constant 0 : index
    %38 = vector.load %arg5[%c0_13, %c0_14] : memref<1x256xf32, #tpu.memory_space<vmem>>, vector<1x256xf32>
    %c0_15 = arith.constant 0 : index
    %c0_16 = arith.constant 0 : index
    %39 = vector.load %arg8[%c0_15, %c0_16] : memref<128x128xbf16, #tpu.memory_space<vmem>>, vector<128x128xbf16>
    %40 = arith.truncf %36 : vector<64x128xf32> to vector<64x128xbf16>
    %cst_17 = arith.constant dense<0.000000e+00> : vector<64x256xf32>
    %41 = tpu.matmul %40, %37, %cst_17 {dimension_numbers = #tpu.dot_dimension_numbers<[1], [0], [0], [1], [0, 0, 1, 1], [], []>} : vector<64x128xbf16>, vector<128x256xbf16>, vector<64x256xf32> -> vector<64x256xf32>
    %42 = vector.broadcast %38 : vector<1x256xf32> to vector<64x256xf32>
    %43 = arith.addf %41, %42 : vector<64x256xf32>
    %44 = vector.extract_strided_slice %43 {offsets = [0, 0], sizes = [64, 128], strides = [1, 1]} : vector<64x256xf32> to vector<64x128xf32>
    %45 = arith.mulf %44, %44 : vector<64x128xf32>
    %cst_18 = arith.constant dense<0.000000e+00> : vector<64xf32>
    %46 = vector.multi_reduction <add>, %45, %cst_18 [1] : vector<64x128xf32> to vector<64xf32>
    %47 = vector.shape_cast %46 : vector<64xf32> to vector<64x1xf32>
    %cst_19 = arith.constant 2.500000e-09 : f32
    %48 = vector.broadcast %cst_19 : f32 to vector<64x1xf32>
    %49 = arith.maximumf %47, %48 : vector<64x1xf32>
    %50 = math.rsqrt %49 : vector<64x1xf32>
    %51 = vector.broadcast %50 : vector<64x1xf32> to vector<64x128xf32>
    %52 = arith.mulf %44, %51 : vector<64x128xf32>
    %53 = vector.extract_strided_slice %43 {offsets = [0, 128], sizes = [64, 128], strides = [1, 1]} : vector<64x256xf32> to vector<64x128xf32>
    %54 = arith.truncf %52 : vector<64x128xf32> to vector<64x128xbf16>
    %cst_20 = arith.constant dense<0.000000e+00> : vector<64x128xf32>
    %55 = tpu.matmul %54, %39, %cst_20 {dimension_numbers = #tpu.dot_dimension_numbers<[1], [0], [0], [1], [0, 0, 1, 1], [], []>} : vector<64x128xbf16>, vector<128x128xbf16>, vector<64x128xf32> -> vector<64x128xf32>
    %56 = arith.mulf %52, %52 : vector<64x128xf32>
    %cst_21 = arith.constant dense<0.000000e+00> : vector<64xf32>
    %57 = vector.multi_reduction <add>, %56, %cst_21 [1] : vector<64x128xf32> to vector<64xf32>
    %58 = vector.shape_cast %57 : vector<64xf32> to vector<64x1xf32>
    %cst_22 = arith.constant 5.000000e-01 : f32
    %59 = vector.broadcast %cst_22 : f32 to vector<64x1xf32>
    %60 = arith.mulf %59, %58 : vector<64x1xf32>
    %61 = vector.broadcast %60 : vector<64x1xf32> to vector<64x128xf32>
    %62 = arith.subf %55, %61 : vector<64x128xf32>
    %63 = math.exp %62 : vector<64x128xf32>
    %cst_23 = arith.constant 9.99999974E-5 : f32
    %64 = vector.broadcast %cst_23 : f32 to vector<64x128xf32>
    %65 = arith.addf %63, %64 : vector<64x128xf32>
    %cst_24 = arith.constant 0.176776692 : f32
    %66 = vector.broadcast %cst_24 : f32 to vector<64x128xf32>
    %67 = arith.mulf %66, %65 : vector<64x128xf32>
    %68 = vector.broadcast %9 : vector<1x128xf32> to vector<64x128xf32>
    %69 = arith.mulf %67, %68 : vector<64x128xf32>
    %cst_25 = arith.constant dense<0.000000e+00> : vector<128xf32>
    %70 = vector.multi_reduction <add>, %69, %cst_25 [0] : vector<64x128xf32> to vector<128xf32>
    %71 = vector.shape_cast %70 : vector<128xf32> to vector<1x128xf32>
    %72 = arith.truncf %69 : vector<64x128xf32> to vector<64x128xbf16>
    %73 = arith.truncf %53 : vector<64x128xf32> to vector<64x128xbf16>
    %cst_26 = arith.constant dense<0.000000e+00> : vector<128x128xf32>
    %74 = tpu.matmul %72, %73, %cst_26 {dimension_numbers = #tpu.dot_dimension_numbers<[0], [0], [1], [1], [0, 1, 1, 1], [], []>} : vector<64x128xbf16>, vector<64x128xbf16>, vector<128x128xf32> -> vector<128x128xf32>
    %c0_27 = arith.constant 0 : index
    %c0_28 = arith.constant 0 : index
    %75 = vector.load %arg2[%c0_27, %c0_28] : memref<128x128xbf16, #tpu.memory_space<vmem>>, vector<128x128xbf16>
    %c0_29 = arith.constant 0 : index
    %c0_30 = arith.constant 0 : index
    %76 = vector.load %arg3[%c0_29, %c0_30] : memref<1x128xf32, #tpu.memory_space<vmem>>, vector<1x128xf32>
    %c0_31 = arith.constant 0 : index
    %c0_32 = arith.constant 0 : index
    %77 = vector.load %arg8[%c0_31, %c0_32] : memref<128x128xbf16, #tpu.memory_space<vmem>>, vector<128x128xbf16>
    %c0_33 = arith.constant 0 : index
    %c0_34 = arith.constant 0 : index
    %78 = vector.load %arg9[%c0_33, %c0_34] : memref<1x128xf32, #tpu.memory_space<vmem>>, vector<1x128xf32>
    %c0_35 = arith.constant 0 : index
    %c0_36 = arith.constant 0 : index
    %79 = vector.load %arg10[%c0_35, %c0_36] : memref<1x128xf32, #tpu.memory_space<vmem>>, vector<1x128xf32>
    %c0_37 = arith.constant 0 : index
    %c0_38 = arith.constant 0 : index
    %80 = vector.load %arg11[%c0_37, %c0_38] : memref<128x128xbf16, #tpu.memory_space<vmem>>, vector<128x128xbf16>
    %c0_39 = arith.constant 0 : index
    %c0_40 = arith.constant 0 : index
    %81 = vector.load %arg12[%c0_39, %c0_40] : memref<1x128xf32, #tpu.memory_space<vmem>>, vector<1x128xf32>
    %c0_41 = arith.constant 0 : index
    %c0_42 = arith.constant 0 : index
    %82 = vector.load %arg13[%c0_41, %c0_42] : memref<128x128xbf16, #tpu.memory_space<vmem>>, vector<128x128xbf16>
    %c0_43 = arith.constant 0 : index
    %c0_44 = arith.constant 0 : index
    %83 = vector.load %arg14[%c0_43, %c0_44] : memref<1x128xf32, #tpu.memory_space<vmem>>, vector<1x128xf32>
    %84 = arith.truncf %36 : vector<64x128xf32> to vector<64x128xbf16>
    %cst_45 = arith.constant dense<0.000000e+00> : vector<64x128xf32>
    %85 = tpu.matmul %84, %75, %cst_45 {dimension_numbers = #tpu.dot_dimension_numbers<[1], [0], [0], [1], [0, 0, 1, 1], [], []>} : vector<64x128xbf16>, vector<128x128xbf16>, vector<64x128xf32> -> vector<64x128xf32>
    %86 = vector.broadcast %76 : vector<1x128xf32> to vector<64x128xf32>
    %87 = arith.addf %85, %86 : vector<64x128xf32>
    %88 = arith.mulf %87, %87 : vector<64x128xf32>
    %cst_46 = arith.constant dense<0.000000e+00> : vector<64xf32>
    %89 = vector.multi_reduction <add>, %88, %cst_46 [1] : vector<64x128xf32> to vector<64xf32>
    %90 = vector.shape_cast %89 : vector<64xf32> to vector<64x1xf32>
    %cst_47 = arith.constant 2.500000e-09 : f32
    %91 = vector.broadcast %cst_47 : f32 to vector<64x1xf32>
    %92 = arith.maximumf %90, %91 : vector<64x1xf32>
    %93 = math.rsqrt %92 : vector<64x1xf32>
    %94 = vector.broadcast %93 : vector<64x1xf32> to vector<64x128xf32>
    %95 = arith.mulf %87, %94 : vector<64x128xf32>
    %96 = arith.truncf %95 : vector<64x128xf32> to vector<64x128xbf16>
    %cst_48 = arith.constant dense<0.000000e+00> : vector<64x128xf32>
    %97 = tpu.matmul %96, %77, %cst_48 {dimension_numbers = #tpu.dot_dimension_numbers<[1], [0], [0], [1], [0, 0, 1, 1], [], []>} : vector<64x128xbf16>, vector<128x128xbf16>, vector<64x128xf32> -> vector<64x128xf32>
    %98 = arith.mulf %95, %95 : vector<64x128xf32>
    %cst_49 = arith.constant dense<0.000000e+00> : vector<64xf32>
    %99 = vector.multi_reduction <add>, %98, %cst_49 [1] : vector<64x128xf32> to vector<64xf32>
    %100 = vector.shape_cast %99 : vector<64xf32> to vector<64x1xf32>
    %cst_50 = arith.constant 5.000000e-01 : f32
    %101 = vector.broadcast %cst_50 : f32 to vector<64x1xf32>
    %102 = arith.mulf %101, %100 : vector<64x1xf32>
    %103 = vector.broadcast %102 : vector<64x1xf32> to vector<64x128xf32>
    %104 = arith.subf %97, %103 : vector<64x128xf32>
    %105 = math.exp %104 : vector<64x128xf32>
    %cst_51 = arith.constant 9.99999974E-5 : f32
    %106 = vector.broadcast %cst_51 : f32 to vector<64x128xf32>
    %107 = arith.addf %105, %106 : vector<64x128xf32>
    %cst_52 = arith.constant 0.176776692 : f32
    %108 = vector.broadcast %cst_52 : f32 to vector<64x128xf32>
    %109 = arith.mulf %108, %107 : vector<64x128xf32>
    %110 = vector.broadcast %71 : vector<1x128xf32> to vector<64x128xf32>
    %111 = arith.mulf %109, %110 : vector<64x128xf32>
    %cst_53 = arith.constant dense<0.000000e+00> : vector<64xf32>
    %112 = vector.multi_reduction <add>, %111, %cst_53 [1] : vector<64x128xf32> to vector<64xf32>
    %113 = vector.shape_cast %112 : vector<64xf32> to vector<64x1xf32>
    %114 = tpu.reciprocal %113 {approx = true} : vector<64x1xf32> -> vector<64x1xf32>
    %115 = arith.truncf %109 : vector<64x128xf32> to vector<64x128xbf16>
    %116 = arith.truncf %74 : vector<128x128xf32> to vector<128x128xbf16>
    %cst_54 = arith.constant dense<0.000000e+00> : vector<64x128xf32>
    %117 = tpu.matmul %115, %116, %cst_54 {dimension_numbers = #tpu.dot_dimension_numbers<[1], [0], [0], [1], [0, 0, 1, 1], [], []>} : vector<64x128xbf16>, vector<128x128xbf16>, vector<64x128xf32> -> vector<64x128xf32>
    %118 = vector.broadcast %114 : vector<64x1xf32> to vector<64x128xf32>
    %119 = arith.mulf %117, %118 : vector<64x128xf32>
    %120 = arith.addf %12, %119 : vector<64x128xf32>
    %cst_55 = arith.constant dense<0.000000e+00> : vector<64xf32>
    %121 = vector.multi_reduction <add>, %120, %cst_55 [1] : vector<64x128xf32> to vector<64xf32>
    %122 = vector.shape_cast %121 : vector<64xf32> to vector<64x1xf32>
    %cst_56 = arith.constant 3.125000e-02 : f32
    %123 = vector.broadcast %cst_56 : f32 to vector<64x1xf32>
    %124 = arith.mulf %122, %123 : vector<64x1xf32>
    %125 = vector.broadcast %124 : vector<64x1xf32> to vector<64x128xf32>
    %126 = arith.subf %120, %125 : vector<64x128xf32>
    %127 = vector.broadcast %4 : vector<1x128xf32> to vector<64x128xf32>
    %128 = arith.mulf %126, %127 : vector<64x128xf32>
    %129 = arith.mulf %128, %128 : vector<64x128xf32>
    %cst_57 = arith.constant dense<0.000000e+00> : vector<64xf32>
    %130 = vector.multi_reduction <add>, %129, %cst_57 [1] : vector<64x128xf32> to vector<64xf32>
    %131 = vector.shape_cast %130 : vector<64xf32> to vector<64x1xf32>
    %cst_58 = arith.constant 3.125000e-02 : f32
    %132 = vector.broadcast %cst_58 : f32 to vector<64x1xf32>
    %133 = arith.mulf %131, %132 : vector<64x1xf32>
    %cst_59 = arith.constant 9.99999974E-6 : f32
    %134 = vector.broadcast %cst_59 : f32 to vector<64x1xf32>
    %135 = arith.addf %133, %134 : vector<64x1xf32>
    %136 = math.rsqrt %135 : vector<64x1xf32>
    %137 = vector.broadcast %136 : vector<64x1xf32> to vector<64x128xf32>
    %138 = arith.mulf %128, %137 : vector<64x128xf32>
    %139 = vector.broadcast %78 : vector<1x128xf32> to vector<64x128xf32>
    %140 = arith.mulf %138, %139 : vector<64x128xf32>
    %141 = vector.broadcast %79 : vector<1x128xf32> to vector<64x128xf32>
    %142 = arith.addf %140, %141 : vector<64x128xf32>
    %143 = arith.truncf %142 : vector<64x128xf32> to vector<64x128xbf16>
    %cst_60 = arith.constant dense<0.000000e+00> : vector<64x128xf32>
    %144 = tpu.matmul %143, %80, %cst_60 {dimension_numbers = #tpu.dot_dimension_numbers<[1], [0], [0], [1], [0, 0, 1, 1], [], []>} : vector<64x128xbf16>, vector<128x128xbf16>, vector<64x128xf32> -> vector<64x128xf32>
    %145 = vector.broadcast %81 : vector<1x128xf32> to vector<64x128xf32>
    %146 = arith.addf %144, %145 : vector<64x128xf32>
    %147 = arith.mulf %146, %146 : vector<64x128xf32>
    %148 = arith.mulf %146, %147 : vector<64x128xf32>
    %cst_61 = arith.constant 4.471500e-02 : f32
    %149 = vector.broadcast %cst_61 : f32 to vector<64x128xf32>
    %150 = arith.mulf %149, %148 : vector<64x128xf32>
    %151 = arith.addf %146, %150 : vector<64x128xf32>
    %cst_62 = arith.constant 0.797884583 : f32
    %152 = vector.broadcast %cst_62 : f32 to vector<64x128xf32>
    %153 = arith.mulf %152, %151 : vector<64x128xf32>
    %154 = math.tanh %153 : vector<64x128xf32>
    %cst_63 = arith.constant 1.000000e+00 : f32
    %155 = vector.broadcast %cst_63 : f32 to vector<64x128xf32>
    %156 = arith.addf %155, %154 : vector<64x128xf32>
    %cst_64 = arith.constant 5.000000e-01 : f32
    %157 = vector.broadcast %cst_64 : f32 to vector<64x128xf32>
    %158 = arith.mulf %157, %156 : vector<64x128xf32>
    %159 = arith.mulf %146, %158 : vector<64x128xf32>
    %160 = arith.truncf %159 : vector<64x128xf32> to vector<64x128xbf16>
    %cst_65 = arith.constant dense<0.000000e+00> : vector<64x128xf32>
    %161 = tpu.matmul %160, %82, %cst_65 {dimension_numbers = #tpu.dot_dimension_numbers<[1], [0], [0], [1], [0, 0, 1, 1], [], []>} : vector<64x128xbf16>, vector<128x128xbf16>, vector<64x128xf32> -> vector<64x128xf32>
    %162 = vector.broadcast %83 : vector<1x128xf32> to vector<64x128xf32>
    %163 = arith.addf %161, %162 : vector<64x128xf32>
    %164 = arith.addf %120, %163 : vector<64x128xf32>
    %c0_66 = arith.constant 0 : index
    %c0_67 = arith.constant 0 : index
    %c0_68 = arith.constant 0 : index
    %165 = vector.load %arg15[%c0_66, %c0_67, %c0_68] : memref<1x64x128xf32, #tpu.memory_space<vmem>>, vector<1x64x128xf32>
    %166 = vector.shape_cast %165 : vector<1x64x128xf32> to vector<64x128xf32>
    %167 = vector.shape_cast %164 : vector<64x128xf32> to vector<1x64x128xf32>
    tpu.vector_store %arg15[%c0_66, %c0_67, %c0_68], %167 {strides = array<i32>} : memref<1x64x128xf32, #tpu.memory_space<vmem>>, vector<1x64x128xf32>,
    return
  }
  func.func @transform_0(%arg0: i32) -> (i32, i32, i32) {
    %c0_i32 = arith.constant 0 : i32
    %c0_i32_0 = arith.constant 0 : i32
    %c0_i32_1 = arith.constant 0 : i32
    return %arg0, %c0_i32, %c0_i32_0 : i32, i32, i32
  }
  func.func @transform_1(%arg0: i32) -> (i32, i32) {
    %c0_i32 = arith.constant 0 : i32
    %c0_i32_0 = arith.constant 0 : i32
    %c0_i32_1 = arith.constant 0 : i32
    return %c0_i32, %c0_i32_0 : i32, i32
  }
  func.func @transform_2(%arg0: i32) -> (i32, i32) {
    %c0_i32 = arith.constant 0 : i32
    %c0_i32_0 = arith.constant 0 : i32
    %c0_i32_1 = arith.constant 0 : i32
    return %c0_i32, %c0_i32_0 : i32, i32
  }
  func.func @transform_3(%arg0: i32) -> (i32, i32) {
    %c0_i32 = arith.constant 0 : i32
    %c0_i32_0 = arith.constant 0 : i32
    %c0_i32_1 = arith.constant 0 : i32
    return %c0_i32, %c0_i32_0 : i32, i32
  }
  func.func @transform_4(%arg0: i32) -> (i32, i32) {
    %c0_i32 = arith.constant 0 : i32
    %c0_i32_0 = arith.constant 0 : i32
    %c0_i32_1 = arith.constant 0 : i32
    return %c0_i32, %c0_i32_0 : i32, i32
  }
  func.func @transform_5(%arg0: i32) -> (i32, i32) {
    %c0_i32 = arith.constant 0 : i32
    %c0_i32_0 = arith.constant 0 : i32
    %c0_i32_1 = arith.constant 0 : i32
    return %c0_i32, %c0_i32_0 : i32, i32
  }
  func.func @transform_6(%arg0: i32) -> (i32, i32) {
    %c0_i32 = arith.constant 0 : i32
    %c0_i32_0 = arith.constant 0 : i32
    %c0_i32_1 = arith.constant 0 : i32
    return %c0_i32, %c0_i32_0 : i32, i32
  }
  func.func @transform_7(%arg0: i32) -> (i32, i32) {
    %c0_i32 = arith.constant 0 : i32
    %c0_i32_0 = arith.constant 0 : i32
    %c0_i32_1 = arith.constant 0 : i32
    return %c0_i32, %c0_i32_0 : i32, i32
  }
  func.func @transform_8(%arg0: i32) -> (i32, i32) {
    %c0_i32 = arith.constant 0 : i32
    %c0_i32_0 = arith.constant 0 : i32
    %c0_i32_1 = arith.constant 0 : i32
    return %c0_i32, %c0_i32_0 : i32, i32
  }
  func.func @transform_9(%arg0: i32) -> (i32, i32) {
    %c0_i32 = arith.constant 0 : i32
    %c0_i32_0 = arith.constant 0 : i32
    %c0_i32_1 = arith.constant 0 : i32
    return %c0_i32, %c0_i32_0 : i32, i32
  }
  func.func @transform_10(%arg0: i32) -> (i32, i32) {
    %c0_i32 = arith.constant 0 : i32
    %c0_i32_0 = arith.constant 0 : i32
    %c0_i32_1 = arith.constant 0 : i32
    return %c0_i32, %c0_i32_0 : i32, i32
  }
  func.func @transform_11(%arg0: i32) -> (i32, i32) {
    %c0_i32 = arith.constant 0 : i32
    %c0_i32_0 = arith.constant 0 : i32
    %c0_i32_1 = arith.constant 0 : i32
    return %c0_i32, %c0_i32_0 : i32, i32
  }
  func.func @transform_12(%arg0: i32) -> (i32, i32) {
    %c0_i32 = arith.constant 0 : i32
    %c0_i32_0 = arith.constant 0 : i32
    %c0_i32_1 = arith.constant 0 : i32
    return %c0_i32, %c0_i32_0 : i32, i32
  }
  func.func @transform_13(%arg0: i32) -> (i32, i32) {
    %c0_i32 = arith.constant 0 : i32
    %c0_i32_0 = arith.constant 0 : i32
    %c0_i32_1 = arith.constant 0 : i32
    return %c0_i32, %c0_i32_0 : i32, i32
  }
  func.func @transform_14(%arg0: i32) -> (i32, i32, i32) {
    %c0_i32 = arith.constant 0 : i32
    %c0_i32_0 = arith.constant 0 : i32
    %c0_i32_1 = arith.constant 0 : i32
    return %arg0, %c0_i32, %c0_i32_0 : i32, i32, i32
  }
}

</mosaic_0001>

<bundles_post_ra>
// kernel: enltb_forward.1
= control target key start
LH: loop header
LB: loop body
LE: loop exit
PB: predicated region body
PF: predicated region fallthrough
CT: control target
= control target key end

     0   :  { %19 = vsyncpa [#allocation3], 0  ;;  %s3731_s0 = inlined_call_operand.vmem [shape: bf16[2,64,128], index: 0, kind: input, shape index: {}]   ;;  %s3732_s1 = inlined_call_operand.vmem [shape: bf16[128,128], index: 1, kind: input, shape index: {}]   ;;  %s3733_s2 = inlined_call_operand.vmem [shape: f32[1,128], index: 2, kind: input, shape index: {}]   ;;  %s3734_s3 = inlined_call_operand.vmem [shape: bf16[128,256], index: 3, kind: input, shape index: {}]   ;;  %s3735_s4 = inlined_call_operand.vmem [shape: f32[1,256], index: 4, kind: input, shape index: {}]   ;;  %s3736_s5 = inlined_call_operand.vmem [shape: f32[1,128], index: 5, kind: input, shape index: {}]   ;;  %s3737_s6 = inlined_call_operand.hbm [shape: f32[1,128], index: 6, kind: input, shape index: {}]   ;;  %s3738_s7 = inlined_call_operand.vmem [shape: bf16[128,128], index: 7, kind: input, shape index: {}]   ;;  %s3739_s8 = inlined_call_operand.vmem [shape: f32[1,128], index: 8, kind: input, shape index: {}]   ;;  %s3740_s9 = inlined_call_operand.vmem [shape: f32[1,128], index: 9, kind: input, shape index: {}]   ;;  %s3741_s10 = inlined_call_operand.vmem [shape: bf16[128,128], index: 10, kind: input, shape index: {}]   ;;  %s3742_s11 = inlined_call_operand.vmem [shape: f32[1,128], index: 11, kind: input, shape index: {}]   ;;  %s3743_s12 = inlined_call_operand.hbm [shape: bf16[128,128], index: 12, kind: input, shape index: {}]   ;;  %s3744_s13 = inlined_call_operand.vmem [shape: f32[1,128], index: 13, kind: input, shape index: {}]   ;;  %s3745_s14 = inlined_call_operand.vmem [shape: f32[2,64,128], index: 14, kind: output, shape index: {}]  }
   0x1   :  { %20 = vsyncpa [#allocation5], 0  ;;  %s2992_s29 = smov 0  }
   0x2 LB: > { %s2998_s30 = sadd.s32 4294967295, %s2909_s29   ;;  %p2272_p0 = scmp.ge.s32.totalorder %s2909_s29, 1  ;;  %s2909_s29 = sphi %s2992_s29, %s26_s29  }
   0x3   : > { %p356_p1 = scmp.lt.s32.totalorder %s2909_s29, 3  ;;  %p3746_p2 = scmp.eq.s32.totalorder %s2998_s30, 0 }
   0x4   : > { %s2911_s15 = smov [#allocation2]   ;;  %s2912_s18 = smov [#allocation4]  }
   0x5   : > { %s384_s16 = sshll.u32 %s2911_s15, 4  ;;  %p3003_p3 = pnand %p2272_p0, %p356_p1  ;;  %s385_s16 = int_to_ptr.vmem [resolvable:$true] %s384_s16 }
   0x6   : > { %s409_s19 = sshll.u32 %s2912_s18, 4  ;;  %s2839_s23 = scalar_lea.hbm %s3737_s6, 16  ;;  %s3015_s19 = int_to_ptr.vmem [resolvable:$true] %s409_s19 }
   0x7   : > { %s3748_s17 = scalar_select %p3003_p3, 1, 0 }
   0x8   : > { %p2630_p4 = pneg %p3003_p3  ;;  %p2840_p6 = scmp.ne.s32.totalorder %s3737_s6, %s2839_s23 }
   0x9   : > { %p2846_p10 = scmp.lt.u32.totalorder %s2839_s23, %s3737_s6 }
   0xa   : > { %p3011_p5 = pnand %p3746_p2, %p2630_p4 }
   0xc   : > { %p2841_p7 = pneg %p3011_p5 }
   0xe   : > { %p2842_p8 = pnand %p2841_p7, %p2840_p6 }
  0x10   : > { %p2843_p9 = pneg %p2842_p8 }
  0x12   : > { %p2848_p11 = pnand %p2846_p10, %p2843_p9 }
  0x14   : > { %2851 = shalt.err (!%p2848_p11)
}
  0x15   : > { %s2852_s28 = scalar_lea.vmem %s385_s16, 16  ;;  %s2859_s15 = scalar_lea.vmem %s385_s16, 32 }
  0x16   : > { %p2853_p12 = scmp.ne.s32.totalorder %s385_s16, %s2852_s28  ;;  %p2860_p1 = scmp.lt.s32.totalorder %s385_s16, %s385_s16 }
  0x17   : > { %p2861_p4 = scmp.lt.s32.totalorder %s2859_s15, %s2852_s28 }
  0x18   : > { %p2855_p13 = pnand %p2853_p12, %p2841_p7 }
  0x19   : > { %p2862_p2 = por %p2861_p4, %p2860_p1 }
  0x1a   : > { %p2856_p0 = pneg %p2855_p13 }
  0x1c   : > { %p2863_p3 = pnand %p2862_p2, %p2856_p0 }
  0x1e   : > { %2866 = shalt.err (!%p2863_p3)
}
  0x1f   : > { %2633 = dma.hbm_to_vmem [thread:$0]  (!%p3011_p5), %s3737_s6, 16, %s385_s16, [#allocation3]  }
  0x20   : > { %s2867_s24 = scalar_lea.hbm %s3743_s12, 1024 }
  0x21   : > { %p2868_p6 = scmp.ne.s32.totalorder %s3743_s12, %s2867_s24  ;;  %p2874_p3 = scmp.lt.u32.totalorder %s2867_s24, %s3743_s12 }
  0x23   : > { %p2870_p8 = pnand %p2868_p6, %p2841_p7 }
  0x25   : > { %p2871_p2 = pneg %p2870_p8 }
  0x27   : > { %p2876_p9 = pnand %p2874_p3, %p2871_p2 }
  0x29   : > { %2879 = shalt.err (!%p2876_p9)
}
  0x2a   : > { %s2880_s16 = scalar_lea.vmem %s3015_s19, 1024  ;;  %p2888_p13 = scmp.lt.s32.totalorder %s3015_s19, %s3015_s19 }
  0x2b   : > { %p2881_p10 = scmp.ne.s32.totalorder %s3015_s19, %s2880_s16  ;;  %p2889_p0 = scmp.lt.s32.totalorder %s2880_s16, %s2880_s16 }
  0x2d   : > { %p2883_p11 = pnand %p2881_p10, %p2841_p7  ;;  %p2890_p1 = por %p2889_p0, %p2888_p13 }
  0x2f   : > { %p2884_p12 = pneg %p2883_p11 }
  0x31   : > { %p2891_p4 = pnand %p2890_p1, %p2884_p12 }
  0x33   : > { %2894 = shalt.err (!%p2891_p4)
}
  0x34   : > { %s2913_s15 = smov 64   ;;  %s2914_s18 = smov 4  }
  0x35   : > { %2636 = dma.hbm_to_vmem [thread:$0]  (!%p3011_p5), %s3743_s12, 1024, %s3015_s19, [#allocation5], %s2913_s15, %s2913_s15, %s2914_s18  }
  0x36   : > { %p3750_p6 = scmp.ne.s32.totalorder %s3748_s17, 0 }
  0x37   : > { %p3751_p7 = scmp.eq.s32.totalorder (!%p3750_p6), %s2998_s30, 0 }
  0x38   : > { %436 = sbr.rel (%p3750_p6) target bundleno = 2425 (0x979), region = 76 }
  0x3f   : > { %2900 = dma.done.wait (%p3751_p7), [#allocation3], 16   ;;  %p3752_p8 = pmov %p3751_p7 }
  0x40   : > { %p3753_p2 = pmov %p3751_p7 }
  0x41   : > { %2902 = vsyncadd (%p3752_p8), [#allocation3], 4294967280 }
  0x42   : > { %2904 = dma.done.wait (%p3753_p2), [#allocation5], 1024   ;;  %p3754_p3 = pmov %p3753_p2 }
  0x43   : > { %p486_p9 = scmp.lt.s32.totalorder %s2998_s30, 1  ;;  %v2655_v12 = vld [vmem:[%s3734_s3 + $0x4] ss:$8 sps:$4 sm:$0xff]   ;;  %v2657_v13 = vld [vmem:[%s3734_s3] ss:$8 sps:$4 sm:$0xff]   ;;  %v497_v15 = vlaneseq  ;;  %v2915_v21 = vmov 0.0  }
  0x44   : > { %2906 = vsyncadd (%p3754_p3), [#allocation5], 4294966272  ;;  %v2658_v14 = vld [vmem:[%s3734_s3 + $0x14] ss:$8 sps:$4 sm:$0xff]   ;;  %772 = vmatprep.subr.bf16.mxu0 %v2655_v12  ;;  %v2660_v59 = vld [vmem:[%s3734_s3 + $0x10] ss:$8 sps:$4 sm:$0xff]  }
  0x45   : > { %s3756_s30 = smov (!%p486_p9, %s2998_s30), 1  ;;  %773 = vmatpush1.bf16.msra.mxu0 %v2657_v13  ;;  %v498_v16 = vand.u32 127, %v497_v15  ;;  %v2661_v60 = vld [vmem:[%s3734_s3 + $0x24] ss:$8 sps:$4 sm:$0xff]   ;;  %v2663_v61 = vld [vmem:[%s3734_s3 + $0x20] ss:$8 sps:$4 sm:$0xff]  }
  0x46   : > { %s2349_s17 = sshll.u32 %s3756_s30, 5  ;;  %774 = vmatprep.subr.bf16.mxu0 %v2658_v14  ;;  %v2664_v62 = vld [vmem:[%s3734_s3 + $0x34] ss:$8 sps:$4 sm:$0xff]   ;;  %v2666_v63 = vld [vmem:[%s3734_s3 + $0x30] ss:$8 sps:$4 sm:$0xff]   ;;  %vm1127_vm1 = vcmask 523264  }
  0x47   : > { %s490_s23 = scalar_lea.vmem %s3731_s0, %s2349_s17  ;;  %vm499_vm0 = vcmp.lt.s32.totalorder %v498_v16, 32  ;;  %v2673_v12 = vld [vmem:[%s3734_s3 + $0x64] ss:$8 sps:$4 sm:$0xff]   ;;  %v2675_v13 = vld [vmem:[%s3734_s3 + $0x60] ss:$8 sps:$4 sm:$0xff]   ;;  %s2350_s17 = sshll.u32 %s3756_s30, 6 }
  0x48   : > { %v2352_v0 = vld [vmem:[%s490_s23] sm:$0xff]   ;;  %v2367_v1 = vld [vmem:[%s490_s23 + $0x8] sm:$0xff]   ;;  %v2368_v4 = vld [vmem:[%s490_s23 + $0x10] sm:$0xff]   ;;  %v3116_v22 = vsel %vm499_vm0, 1.0, %v2915_v21 }
  0x49   : > { %v3082_v2 = vunpack.c.l.bf16 %v2352_v0  ;;  %v3084_v3 = vunpack.c.l.bf16 %v2367_v1  ;;  %v3088_v5 = vunpack.c.h.bf16 %v2352_v0  ;;  %v3090_v6 = vunpack.c.h.bf16 %v2367_v1  ;;  %v2369_v7 = vld [vmem:[%s490_s23 + $0x18] sm:$0xff]   ;;  %775 = vmatpush1.bf16.msra.mxu0 %v2660_v59  ;;  %v2667_v0 = vld [vmem:[%s3734_s3 + $0x44] ss:$8 sps:$4 sm:$0xff]   ;;  %v2669_v1 = vld [vmem:[%s3734_s3 + $0x40] ss:$8 sps:$4 sm:$0xff]   ;;  %s495_s23 = scalar_lea.vmem %s3745_s14, %s2350_s17 }
  0x4a   : > { %v3094_v8 = vunpack.c.l.bf16 %v2368_v4  ;;  %v3096_v9 = vunpack.c.h.bf16 %v2368_v4  ;;  %v3100_v10 = vunpack.c.l.bf16 %v2369_v7  ;;  %v3102_v11 = vunpack.c.h.bf16 %v2369_v7  ;;  %776 = vmatprep.subr.bf16.mxu0 %v2661_v60  ;;  %v2670_v4 = vld [vmem:[%s3734_s3 + $0x54] ss:$8 sps:$4 sm:$0xff]   ;;  %v2672_v7 = vld [vmem:[%s3734_s3 + $0x50] ss:$8 sps:$4 sm:$0xff]  }
  0x4b   : > { %520 = vadd.xlane.f32.xlu0 %v3082_v2  ;;  %524 = vadd.xlane.f32.xlu1 %v3084_v3  ;;  %v2676_v14 = vld [vmem:[%s3734_s3 + $0x74] ss:$8 sps:$4 sm:$0xff]   ;;  %v2678_v16 = vld [vmem:[%s3734_s3 + $0x70] ss:$8 sps:$4 sm:$0xff]  }
  0x4c   : > { %v3228_v21 = vld [vmem:[%s3738_s7 + $0x10] sm:$0xff]  }
  0x4d   : > { %777 = vmatpush1.bf16.msra.mxu0 %v2663_v61 }
  0x4e   : > { %778 = vmatprep.subr.bf16.mxu0 %v2664_v62 }
  0x4f   : > { %522 = vadd.xlane.f32.xlu0 %v3088_v5  ;;  %526 = vadd.xlane.f32.xlu1 %v3090_v6 }
  0x51   : > { %779 = vmatpush1.bf16.msra.mxu0 %v2666_v63 }
  0x52   : > { %780 = vmatprep.subr.bf16.mxu0 %v2667_v0  ;;  %v2285_v0 = vld [vmem:[#allocation2] ss:$0 sm:$0xff] }
  0x53   : > { %528 = vadd.xlane.f32.xlu0 %v3094_v8  ;;  %530 = vadd.xlane.f32.xlu1 %v3096_v9 }
  0x55   : > { %781 = vmatpush1.bf16.msra.mxu0 %v2669_v1 }
  0x56   : > { %782 = vmatprep.subr.bf16.mxu0 %v2670_v4 }
  0x57   : > { %532 = vadd.xlane.f32.xlu0 %v3100_v10  ;;  %534 = vadd.xlane.f32.xlu1 %v3102_v11 }
  0x59   : > { %783 = vmatpush1.bf16.msra.mxu0 %v2672_v7 }
  0x5a   : > { %784 = vmatprep.subr.bf16.mxu0 %v2673_v12 }
  0x5d   : > { %785 = vmatpush1.bf16.msra.mxu0 %v2675_v13 }
  0x5e   : > { %786 = vmatprep.subr.bf16.mxu0 %v2676_v14 }
  0x61   : > { %787 = vmatpush1.bf16.msra.mxu0 %v2678_v16 }
  0xd8   : > { %v521_v17 = vpop.xlane.xlu0 %520  ;;  %v525_v18 = vpop.xlane.xlu1 %524 }
  0xd9   : > { %v536_v19 = vmul.f32 0.03125, %v521_v17  ;;  %v538_v20 = vmul.f32 0.03125, %v525_v18  ;;  %v2916_v17 = vmov 0   ;;  %v3209_v18 = vld [vmem:[%s3732_s1] sm:$0xff]  }
  0xda   : > { %804 = vmatprep.mubr.bf16.mxu0 %v2916_v17  ;;  %2502 = vmatprep.subr.bf16.mxu0 %v3209_v18 }
  0xdb   : > { %v544_v23 = vsub.f32 %v3082_v2, %v536_v19  ;;  %v546_v24 = vsub.f32 %v3084_v3, %v538_v20  ;;  %v3215_v19 = vld [vmem:[%s3738_s7] sm:$0xff]   ;;  %v3220_v20 = vld [vmem:[%s3738_s7 + $0x8] sm:$0xff]  }
  0xdc   : > { %v523_v25 = vpop.xlane.xlu0 %522  ;;  %v527_v26 = vpop.xlane.xlu1 %526  ;;  %2454 = vmatprep.subr.bf16.mxu1 %v3215_v19 }
  0xdd   : > { %v537_v27 = vmul.f32 0.03125, %v523_v25  ;;  %v539_v28 = vmul.f32 0.03125, %v527_v26  ;;  %v3121_v29 = vmul.f32 %v3116_v22, %v544_v23  ;;  %v3124_v30 = vmul.f32 %v3116_v22, %v546_v24  ;;  %2455 = vmatpush3.bf16.msra.mxu1 %v3215_v19  ;;  %v3235_v23 = vld [vmem:[%s3738_s7 + $0x18] sm:$0xff]   ;;  %v3242_v24 = vld [vmem:[%s3738_s7 + $0x20] sm:$0xff]   ;;  %v3249_v25 = vld [vmem:[%s3738_s7 + $0x28] sm:$0xff]  }
  0xde   : > { %2456 = vmatprep.subr.bf16.mxu1 %v3220_v20 }
  0xdf   : > { %v545_v31 = vsub.f32 %v3088_v5, %v537_v27  ;;  %v547_v32 = vsub.f32 %v3090_v6, %v539_v28  ;;  %v560_v33 = vmul.f32 %v3121_v29, %v3121_v29  ;;  %v562_v36 = vmul.f32 %v3124_v30, %v3124_v30 }
  0xe0   : > { %v529_v34 = vpop.xlane.xlu0 %528  ;;  %v531_v35 = vpop.xlane.xlu1 %530 }
  0xe1   : > { %v540_v37 = vmul.f32 0.03125, %v529_v34  ;;  %568 = vadd.xlane.f32.xlu0 %v560_v33  ;;  %v541_v38 = vmul.f32 0.03125, %v531_v35  ;;  %v3133_v39 = vmul.f32 %v3116_v22, %v545_v31  ;;  %v3136_v40 = vmul.f32 %v3116_v22, %v547_v32  ;;  %2457 = vmatpush3.bf16.msra.mxu1 %v3220_v20 }
  0xe2   : > { %2458 = vmatprep.subr.bf16.mxu1 %v3228_v21 }
  0xe3   : > { %v548_v41 = vsub.f32 %v3094_v8, %v540_v37  ;;  %v549_v42 = vsub.f32 %v3096_v9, %v541_v38  ;;  %v561_v43 = vmul.f32 %v3133_v39, %v3133_v39  ;;  %v563_v46 = vmul.f32 %v3136_v40, %v3136_v40 }
  0xe4   : > { %v533_v44 = vpop.xlane.xlu0 %532  ;;  %v535_v45 = vpop.xlane.xlu1 %534 }
  0xe5   : > { %v542_v47 = vmul.f32 0.03125, %v533_v44  ;;  %572 = vadd.xlane.f32.xlu0 %v562_v36  ;;  %570 = vadd.xlane.f32.xlu1 %v561_v43  ;;  %v543_v48 = vmul.f32 0.03125, %v535_v45  ;;  %v3145_v49 = vmul.f32 %v3116_v22, %v548_v41  ;;  %v3148_v50 = vmul.f32 %v3116_v22, %v549_v42 }
  0xe6   : > { %2459 = vmatpush3.bf16.msra.mxu1 %v3228_v21 }
  0xe7   : > { %v550_v51 = vsub.f32 %v3100_v10, %v542_v47  ;;  %v551_v52 = vsub.f32 %v3102_v11, %v543_v48  ;;  %v564_v53 = vmul.f32 %v3145_v49, %v3145_v49  ;;  %v565_v54 = vmul.f32 %v3148_v50, %v3148_v50  ;;  %2460 = vmatprep.subr.bf16.mxu1 %v3235_v23 }
  0xe9   : > { %574 = vadd.xlane.f32.xlu1 %v563_v46  ;;  %576 = vadd.xlane.f32.xlu0 %v564_v53  ;;  %v3157_v55 = vmul.f32 %v3116_v22, %v550_v51  ;;  %v3160_v56 = vmul.f32 %v3116_v22, %v551_v52 }
  0xea   : > { %2461 = vmatpush3.bf16.msra.mxu1 %v3235_v23 }
  0xeb   : > { %v566_v57 = vmul.f32 %v3157_v55, %v3157_v55  ;;  %v567_v58 = vmul.f32 %v3160_v56, %v3160_v56  ;;  %2462 = vmatprep.subr.bf16.mxu1 %v3242_v24 }
  0xed   : > { %578 = vadd.xlane.f32.xlu1 %v565_v54  ;;  %580 = vadd.xlane.f32.xlu0 %v566_v57  ;;  %v2284_v57 = vld [vmem:[%s3736_s5] ss:$0 sm:$0xff] }
  0xee   : > { %2463 = vmatpush3.bf16.msra.mxu1 %v3242_v24 }
  0xef   : > { %2464 = vmatprep.subr.bf16.mxu1 %v3249_v25 }
  0xf1   : > { %582 = vadd.xlane.f32.xlu1 %v567_v58 }
  0xf2   : > { %2465 = vmatpush3.bf16.msra.mxu1 %v3249_v25 }
 0x16e   : > { %v569_v26 = vpop.xlane.xlu0 %568 }
 0x16f   : > { %v584_v27 = vmul.f32 0.03125, %v569_v26  ;;  %v2680_v26 = vld [vmem:[%s3732_s1 + $0x8] sm:$0xff]  }
 0x171   : > { %v592_v28 = vadd.f32 1e-05, %v584_v27 }
 0x172   : > { %v571_v31 = vpop.xlane.xlu1 %570  ;;  %v573_v32 = vpop.xlane.xlu0 %572 }
 0x173   : > { %2711 = vrsqrt.f32 %v592_v28  ;;  %v585_v33 = vmul.f32 0.03125, %v571_v31  ;;  %v586_v34 = vmul.f32 0.03125, %v573_v32 }
 0x175   : > { %v593_v35 = vadd.f32 1e-05, %v585_v33  ;;  %v594_v36 = vadd.f32 1e-05, %v586_v34 }
 0x176   : > { %v575_v37 = vpop.xlane.xlu1 %574  ;;  %v577_v38 = vpop.xlane.xlu0 %576 }
 0x177   : > { %2713 = vrsqrt.f32 %v593_v35  ;;  %v587_v41 = vmul.f32 0.03125, %v575_v37  ;;  %v588_v43 = vmul.f32 0.03125, %v577_v38 }
 0x178   : > { %2715 = vrsqrt.f32 %v594_v36 }
 0x179   : > { %v595_v42 = vadd.f32 1e-05, %v587_v41  ;;  %v596_v47 = vadd.f32 1e-05, %v588_v43 }
 0x17a   : > { %v579_v44 = vpop.xlane.xlu1 %578  ;;  %v581_v51 = vpop.xlane.xlu0 %580 }
 0x17b   : > { %2717 = vrsqrt.f32 %v595_v42  ;;  %v589_v45 = vmul.f32 0.03125, %v579_v44  ;;  %v590_v59 = vmul.f32 0.03125, %v581_v51 }
 0x17d   : > { %v2712_v46 = vpop.eup %2711  ;;  %v597_v48 = vadd.f32 1e-05, %v589_v45  ;;  %v598_v7 = vadd.f32 1e-05, %v590_v59  ;;  %v660_v59 = vld [vmem:[%s3735_s4] sm:$0x3] }
 0x17e   : > { %v583_v52 = vpop.xlane.xlu1 %582  ;;  %v608_v53 = vmul.f32 %v2712_v46, %v3121_v29  ;;  %v2684_v46 = vld [vmem:[%s3732_s1 + $0x28] sm:$0xff]  }
 0x17f   : > { %2719 = vrsqrt.f32 %v597_v48  ;;  %v591_v54 = vmul.f32 0.03125, %v583_v52 }
 0x180   : > { %2721 = vrsqrt.f32 %v596_v47  ;;  %v622_v61 = vmul.f32 %v2284_v57, %v608_v53  ;;  %v2686_v53 = vld [vmem:[%s3732_s1 + $0x38] sm:$0xff]  }
 0x181   : > { %v2714_v58 = vpop.eup %2713  ;;  %v599_v63 = vadd.f32 1e-05, %v591_v54  ;;  %v3300_v54 = vld [vmem:[%s3738_s7 + $0x38] sm:$0xff]  }
 0x182   : > { %v609_v60 = vmul.f32 %v2714_v58, %v3133_v39  ;;  %v2716_v62 = vpop.eup %2715  ;;  %v636_v12 = vadd.f32 %v2285_v0, %v622_v61 }
 0x183   : > { %v610_v13 = vmul.f32 %v2716_v62, %v3124_v30  ;;  %2723 = vrsqrt.f32 %v599_v63 }
 0x184   : > { %v623_v1 = vmul.f32 %v2284_v57, %v609_v60  ;;  %2725 = vrsqrt.f32 %v598_v7 }
 0x185   : > { %v2718_v4 = vpop.eup %2717  ;;  %v624_v28 = vmul.f32 %v2284_v57, %v610_v13 }
 0x186   : > { %v637_v29 = vadd.f32 %v2285_v0, %v623_v1  ;;  %v611_v14 = vmul.f32 %v2718_v4, %v3136_v40  ;;  %v2681_v40 = vld [vmem:[%s3732_s1 + $0x10] sm:$0xff]  }
 0x187   : > { %v638_v33 = vadd.f32 %v2285_v0, %v624_v28 }
 0x188   : > { %v677_v16 = vpack.c.bf16 %v637_v29, %v636_v12  ;;  %v625_v39 = vmul.f32 %v2284_v57, %v611_v14 }
 0x189   : > { %v2720_v27 = vpop.eup %2719 }
 0x18a   : > { %805 = vmatmul.mubr.bf16.vlgmr.msra.gmra.mrb[0].mxu0 %v677_v16  ;;  %v2722_v31 = vpop.eup %2721  ;;  %v639_v30 = vadd.f32 %v2285_v0, %v625_v39  ;;  %v613_v32 = vmul.f32 %v2720_v27, %v3148_v50 }
 0x18b   : > { %2503 = vmatpush3.bf16.msra.mxu0 %v3209_v18  ;;  %814 = vmatprep.mubr.bf16.mxu0 %v2916_v17  ;;  %v612_v34 = vmul.f32 %v2722_v31, %v3145_v49  ;;  %v2682_v18 = vld [vmem:[%s3732_s1 + $0x18] sm:$0xff]   ;;  %v2683_v49 = vld [vmem:[%s3732_s1 + $0x20] sm:$0xff]  }
 0x18c   : > { %2504 = vmatprep.subr.bf16.mxu0 %v2680_v26  ;;  %v678_v35 = vpack.c.bf16 %v639_v30, %v638_v33  ;;  %v627_v36 = vmul.f32 %v2284_v57, %v613_v32 }
 0x18d   : > { %v2724_v37 = vpop.eup %2723  ;;  %v626_v38 = vmul.f32 %v2284_v57, %v612_v34 }
 0x18e   : > { %v2726_v41 = vpop.eup %2725  ;;  %v641_v50 = vadd.f32 %v2285_v0, %v627_v36  ;;  %v615_v42 = vmul.f32 %v2724_v37, %v3160_v56  ;;  %v2685_v56 = vld [vmem:[%s3732_s1 + $0x30] sm:$0xff]  }
 0x18f   : > { %2505 = vmatpush3.bf16.msra.mxu0 %v2680_v26  ;;  %v640_v43 = vadd.f32 %v2285_v0, %v626_v38  ;;  %v614_v44 = vmul.f32 %v2726_v41, %v3157_v55 }
 0x190   : > { %2506 = vmatprep.subr.bf16.mxu0 %v2681_v40  ;;  %v629_v47 = vmul.f32 %v2284_v57, %v615_v42 }
 0x191   : > { %v679_v45 = vpack.c.bf16 %v641_v50, %v640_v43  ;;  %v628_v48 = vmul.f32 %v2284_v57, %v614_v44  ;;  %v683_v57 = vshrl.u32 %v497_v15, 7 }
 0x192   : > { %815 = vmatmul.mubr.bf16.gmra.mrb[4].mxu0 %v678_v35  ;;  %v643_v51 = vadd.f32 %v2285_v0, %v629_v47 }
 0x193   : > { %2507 = vmatpush3.bf16.msra.mxu0 %v2681_v40  ;;  %824 = vmatprep.mubr.bf16.mxu0 %v2916_v17  ;;  %v642_v55 = vadd.f32 %v2285_v0, %v628_v48  ;;  %v684_v58 = vsub.s32 0, %v683_v57  ;;  %v688_v60 = vsub.s32 1, %v683_v57 }
 0x194   : > { %2508 = vmatprep.subr.bf16.mxu0 %v2682_v18 }
 0x195   : > { %v680_v52 = vpack.c.bf16 %v643_v51, %v642_v55  ;;  %v685_v61 = vrot.slane %v660_v59, %v684_v58  ;;  %v689_v63 = vrot.slane %v660_v59, %v688_v60 }
 0x197   : > { %2509 = vmatpush3.bf16.msra.mxu0 %v2682_v18 }
 0x198   : > { %2510 = vmatprep.subr.bf16.mxu0 %v2683_v49 }
 0x19a   : > { %825 = vmatmul.mubr.bf16.gmra.mrb[8].mxu0 %v679_v45 }
 0x19b   : > { %2511 = vmatpush3.bf16.msra.mxu0 %v2683_v49  ;;  %834 = vmatprep.mubr.bf16.mxu0 %v2916_v17  ;;  %v3293_v17 = vld [vmem:[%s3738_s7 + $0x30] sm:$0xff]  }
 0x19c   : > { %2512 = vmatprep.subr.bf16.mxu0 %v2684_v46  ;;  %2466 = vmatprep.subr.bf16.mxu1 %v3293_v17 }
 0x19d   : > { %2467 = vmatpush3.bf16.msra.mxu1 %v3293_v17 }
 0x19e   : > { %2468 = vmatprep.subr.bf16.mxu1 %v3300_v54 }
 0x19f   : > { %2513 = vmatpush3.bf16.msra.mxu0 %v2684_v46 }
 0x1a0   : > { %2514 = vmatprep.subr.bf16.mxu0 %v2685_v56 }
 0x1a1   : > { %2469 = vmatpush3.bf16.msra.mxu1 %v3300_v54 }
 0x1a2   : > { %835 = vmatmul.mubr.bf16.gmra.mrb[12].mxu0 %v680_v52 }
 0x1a3   : > { %2515 = vmatpush3.bf16.msra.mxu0 %v2685_v56  ;;  %2518 = vmatprep.mubr.bf16.mxu0 %v677_v16 }
 0x1a4   : > { %2516 = vmatprep.subr.bf16.mxu0 %v2686_v53 }
 0x1a7   : > { %2517 = vmatpush3.bf16.msra.mxu0 %v2686_v53 }
 0x1aa   : > { %2519 = vmatmul.mubr.bf16.vlgmr.msra.gmra.mrb[16].mxu0 %v678_v35 }
 0x1ab   : > { %2522 = vmatprep.mubr.bf16.mxu0 %v679_v45 }
 0x1b2   : > { %2523 = vmatmul.mubr.bf16.gmra.mrb[20].mxu0 %v680_v52 }
 0x25d   : > { %v806_v62 = vpop.f32.mrb[0].mxu0 }
 0x25e   : > { %v3308_v0 = vadd.f32 %v806_v62, %v685_v61  ;;  %v808_v1 = vpop.f32.mrb[1].mxu0 }
 0x25f   : > { %v810_v4 = vpop.f32.mrb[2].mxu0  ;;  %v809_v15 = vadd.f32 %v808_v1, %v689_v63 }
 0x260   : > { %v3310_v7 = vadd.f32 %v810_v4, %v685_v61  ;;  %v812_v12 = vpop.f32.mrb[3].mxu0  ;;  %v845_v29 = vmul.f32 %v3308_v0, %v3308_v0 }
 0x261   : > { %v813_v13 = vadd.f32 %v812_v12, %v689_v63 }
 0x262   : > { %853 = vadd.xlane.f32.xlu0 %v845_v29  ;;  %v846_v14 = vmul.f32 %v3310_v7, %v3310_v7 }
 0x263   : > { %v3316_v16 = vpack.c.bf16 %v813_v13, %v809_v15 }
 0x264   : > { %855 = vadd.xlane.f32.xlu1 %v846_v14 }
 0x265   : > { %v816_v26 = vpop.f32.mrb[4].mxu0  ;;  %2478 = vmatprep.subr.bf16.mxu1 %v3316_v16 }
 0x266   : > { %v3319_v39 = vadd.f32 %v816_v26, %v685_v61  ;;  %v818_v27 = vpop.f32.mrb[5].mxu0 }
 0x267   : > { %v819_v28 = vadd.f32 %v818_v27, %v689_v63  ;;  %v820_v31 = vpop.f32.mrb[6].mxu0 }
 0x268   : > { %v3321_v30 = vadd.f32 %v820_v31, %v685_v61  ;;  %v822_v40 = vpop.f32.mrb[7].mxu0  ;;  %v847_v32 = vmul.f32 %v3319_v39, %v3319_v39 }
 0x269   : > { %v823_v33 = vadd.f32 %v822_v40, %v689_v63 }
 0x26a   : > { %857 = vadd.xlane.f32.xlu0 %v847_v32  ;;  %v848_v34 = vmul.f32 %v3321_v30, %v3321_v30 }
 0x26b   : > { %v3327_v35 = vpack.c.bf16 %v823_v33, %v819_v28 }
 0x26c   : > { %859 = vadd.xlane.f32.xlu1 %v848_v34 }
 0x26d   : > { %v826_v18 = vpop.f32.mrb[8].mxu0 }
 0x26e   : > { %v3329_v36 = vadd.f32 %v826_v18, %v685_v61  ;;  %v828_v37 = vpop.f32.mrb[9].mxu0 }
 0x26f   : > { %v829_v38 = vadd.f32 %v828_v37, %v689_v63  ;;  %v830_v41 = vpop.f32.mrb[10].mxu0 }
 0x270   : > { %v3331_v50 = vadd.f32 %v830_v41, %v685_v61  ;;  %v832_v49 = vpop.f32.mrb[11].mxu0  ;;  %v849_v42 = vmul.f32 %v3329_v36, %v3329_v36 }
 0x271   : > { %v833_v43 = vadd.f32 %v832_v49, %v689_v63 }
 0x272   : > { %861 = vadd.xlane.f32.xlu0 %v849_v42  ;;  %v850_v44 = vmul.f32 %v3331_v50, %v3331_v50 }
 0x273   : > { %v3337_v45 = vpack.c.bf16 %v833_v43, %v829_v38 }
 0x274   : > { %863 = vadd.xlane.f32.xlu1 %v850_v44 }
 0x275   : > { %v836_v46 = vpop.f32.mrb[12].mxu0 }
 0x276   : > { %v3339_v47 = vadd.f32 %v836_v46, %v685_v61  ;;  %v838_v48 = vpop.f32.mrb[13].mxu0 }
 0x277   : > { %v839_v51 = vadd.f32 %v838_v48, %v689_v63  ;;  %v840_v56 = vpop.f32.mrb[14].mxu0 }
 0x278   : > { %v3341_v55 = vadd.f32 %v840_v56, %v685_v61  ;;  %v842_v52 = vpop.f32.mrb[15].mxu0  ;;  %v851_v53 = vmul.f32 %v3339_v47, %v3339_v47 }
 0x279   : > { %v843_v57 = vadd.f32 %v842_v52, %v689_v63 }
 0x27a   : > { %865 = vadd.xlane.f32.xlu0 %v851_v53  ;;  %v852_v58 = vmul.f32 %v3341_v55, %v3341_v55 }
 0x27b   : > { %v3347_v59 = vpack.c.bf16 %v843_v57, %v839_v51 }
 0x27c   : > { %867 = vadd.xlane.f32.xlu1 %v852_v58 }
 0x27d   : > { %v3349_v60 = vpop.f32.mrb[16].mxu0 }
 0x27e   : > { %v3351_v62 = vpop.f32.mrb[17].mxu0 }
 0x27f   : > { %v3353_v1 = vpop.f32.mrb[18].mxu0 }
 0x280   : > { %v3355_v61 = vpop.f32.mrb[19].mxu0 }
 0x285   : > { %v3357_v4 = vpop.f32.mrb[20].mxu0 }
 0x286   : > { %v3359_v12 = vpop.f32.mrb[21].mxu0 }
 0x287   : > { %v3361_v63 = vpop.f32.mrb[22].mxu0 }
 0x288   : > { %v3363_v29 = vpop.f32.mrb[23].mxu0 }
 0x2ef   : > { %v854_v15 = vpop.xlane.xlu0 %853 }
 0x2f0   : > { %v869_v13 = vmax.f32 %v854_v15, 2.5e-09 }
 0x2f1   : > { %v856_v14 = vpop.xlane.xlu1 %855 }
 0x2f2   : > { %2727 = vrsqrt.f32 %v869_v13  ;;  %v870_v26 = vmax.f32 %v856_v14, 2.5e-09 }
 0x2f4   : > { %2729 = vrsqrt.f32 %v870_v26 }
 0x2f7   : > { %v858_v27 = vpop.xlane.xlu0 %857 }
 0x2f8   : > { %v871_v28 = vmax.f32 %v858_v27, 2.5e-09 }
 0x2f9   : > { %v860_v31 = vpop.xlane.xlu1 %859 }
 0x2fa   : > { %2731 = vrsqrt.f32 %v871_v28  ;;  %v872_v40 = vmax.f32 %v860_v31, 2.5e-09 }
 0x2fc   : > { %v2728_v32 = vpop.eup %2727  ;;  %2733 = vrsqrt.f32 %v872_v40 }
 0x2fd   : > { %v885_v33 = vmul.f32 %v2728_v32, %v3308_v0 }
 0x2fe   : > { %v2730_v34 = vpop.eup %2729 }
 0x2ff   : > { %v862_v18 = vpop.xlane.xlu0 %861  ;;  %v1010_v37 = vmul.f32 %v885_v33, %v885_v33  ;;  %v886_v38 = vmul.f32 %v2730_v34, %v3310_v7 }
 0x300   : > { %v873_v41 = vmax.f32 %v862_v18, 2.5e-09 }
 0x301   : > { %v864_v49 = vpop.xlane.xlu1 %863  ;;  %1018 = vadd.xlane.f32.xlu0 %v1010_v37  ;;  %v1011_v42 = vmul.f32 %v886_v38, %v886_v38  ;;  %v893_v43 = vpack.c.bf16 %v886_v38, %v885_v33 }
 0x302   : > { %2735 = vrsqrt.f32 %v873_v41  ;;  %v874_v44 = vmax.f32 %v864_v49, 2.5e-09 }
 0x303   : > { %1020 = vadd.xlane.f32.xlu1 %v1011_v42  ;;  %2470 = vmatprep.mubr.bf16.mxu1 %v893_v43 }
 0x304   : > { %v2732_v46 = vpop.eup %2731  ;;  %2737 = vrsqrt.f32 %v874_v44 }
 0x305   : > { %v887_v48 = vmul.f32 %v2732_v46, %v3319_v39 }
 0x306   : > { %v2734_v51 = vpop.eup %2733 }
 0x307   : > { %v866_v0 = vpop.xlane.xlu0 %865  ;;  %v1012_v56 = vmul.f32 %v887_v48, %v887_v48  ;;  %v888_v52 = vmul.f32 %v2734_v51, %v3321_v30 }
 0x308   : > { %v875_v53 = vmax.f32 %v866_v0, 2.5e-09 }
 0x309   : > { %v868_v7 = vpop.xlane.xlu1 %867  ;;  %1022 = vadd.xlane.f32.xlu0 %v1012_v56  ;;  %v1013_v57 = vmul.f32 %v888_v52, %v888_v52  ;;  %v894_v58 = vpack.c.bf16 %v888_v52, %v887_v48 }
 0x30a   : > { %2739 = vrsqrt.f32 %v875_v53  ;;  %v876_v15 = vmax.f32 %v868_v7, 2.5e-09 }
 0x30b   : > { %1024 = vadd.xlane.f32.xlu1 %v1013_v57  ;;  %2471 = vmatmul.mubr.bf16.vlgmr.msra.gmra.mrb[0].mxu1 %v894_v58 }
 0x30c   : > { %v2736_v13 = vpop.eup %2735  ;;  %2741 = vrsqrt.f32 %v876_v15  ;;  %2479 = vmatpush3.bf16.msra.mxu1 %v3316_v16  ;;  %v2318_v16 = vld [vmem:[%s3733_s2] ss:$0 sm:$0xff] }
 0x30d   : > { %2480 = vmatprep.subr.bf16.mxu1 %v3327_v35  ;;  %v889_v39 = vmul.f32 %v2736_v13, %v3329_v36  ;;  %v3387_v33 = vadd.f32 %v2318_v16, %v3355_v61  ;;  %v3406_v61 = vadd.f32 %v2318_v16, %v3363_v29 }
 0x30e   : > { %v2738_v14 = vpop.eup %2737 }
 0x30f   : > { %v1014_v26 = vmul.f32 %v889_v39, %v889_v39  ;;  %v890_v30 = vmul.f32 %v2738_v14, %v3331_v50  ;;  %v1426_v41 = vmul.f32 %v3406_v61, %v3406_v61 }
 0x310   : > { %2481 = vmatpush3.bf16.msra.mxu1 %v3327_v35  ;;  %v3382_v35 = vadd.f32 %v2318_v16, %v3351_v62  ;;  %v3401_v62 = vadd.f32 %v2318_v16, %v3359_v12  ;;  %v3416_v12 = vadd.f32 %v3361_v63, %v2318_v16 }
 0x311   : > { %2482 = vmatprep.subr.bf16.mxu1 %v3337_v45  ;;  %1026 = vadd.xlane.f32.xlu0 %v1014_v26  ;;  %v1015_v27 = vmul.f32 %v890_v30, %v890_v30  ;;  %v895_v28 = vpack.c.bf16 %v890_v30, %v889_v39 }
 0x312   : > { %v1425_v38 = vmul.f32 %v3401_v62, %v3401_v62 }
 0x313   : > { %1028 = vadd.xlane.f32.xlu1 %v1015_v27  ;;  %2474 = vmatprep.mubr.bf16.mxu1 %v895_v28 }
 0x314   : > { %v2740_v31 = vpop.eup %2739  ;;  %2483 = vmatpush3.bf16.msra.mxu1 %v3337_v45  ;;  %v3391_v45 = vadd.f32 %v3349_v60, %v2318_v16 }
 0x315   : > { %2484 = vmatprep.subr.bf16.mxu1 %v3347_v59  ;;  %v891_v36 = vmul.f32 %v2740_v31, %v3339_v47  ;;  %v1421_v47 = vmul.f32 %v3382_v35, %v3382_v35 }
 0x316   : > { %v2742_v50 = vpop.eup %2741  ;;  %v1423_v60 = vmul.f32 %v3391_v45, %v3391_v45 }
 0x317   : > { %v1016_v40 = vmul.f32 %v891_v36, %v891_v36  ;;  %v892_v32 = vmul.f32 %v2742_v50, %v3341_v55  ;;  %v3396_v55 = vadd.f32 %v3353_v1, %v2318_v16  ;;  %v3411_v1 = vadd.f32 %v3357_v4, %v2318_v16 }
 0x318   : > { %2485 = vmatpush3.bf16.msra.mxu1 %v3347_v59  ;;  %v1422_v59 = vmul.f32 %v3387_v33, %v3387_v33  ;;  %v1428_v4 = vmul.f32 %v3416_v12, %v3416_v12 }
 0x319   : > { %1030 = vadd.xlane.f32.xlu0 %v1016_v40  ;;  %v1017_v34 = vmul.f32 %v892_v32, %v892_v32  ;;  %v896_v18 = vpack.c.bf16 %v892_v32, %v891_v36  ;;  %2526 = vmatprep.subr.bf16.mxu1 %v3215_v19  ;;  %v1424_v37 = vmul.f32 %v3396_v55, %v3396_v55 }
 0x31a   : > { %v1427_v29 = vmul.f32 %v3411_v1, %v3411_v1 }
 0x31b   : > { %1032 = vadd.xlane.f32.xlu1 %v1017_v34  ;;  %2475 = vmatmul.mubr.bf16.gmra.mrb[4].mxu1 %v896_v18 }
 0x31d   : > { %1429 = vadd.xlane.f32.xlu0 %v1421_v47 }
 0x31f   : > { %1431 = vadd.xlane.f32.xlu1 %v1422_v59 }
 0x321   : > { %1433 = vadd.xlane.f32.xlu0 %v1423_v60 }
 0x323   : > { %1435 = vadd.xlane.f32.xlu1 %v1424_v37 }
 0x325   : > { %1437 = vadd.xlane.f32.xlu0 %v1425_v38 }
 0x327   : > { %1439 = vadd.xlane.f32.xlu1 %v1426_v41 }
 0x329   : > { %1441 = vadd.xlane.f32.xlu0 %v1427_v29 }
 0x32b   : > { %1443 = vadd.xlane.f32.xlu1 %v1428_v4 }
 0x38e   : > { %v3424_v49 = vpop.xlane.xlu0 %1018 }
 0x390   : > { %v3426_v42 = vpop.xlane.xlu1 %1020 }
 0x396   : > { %v3428_v43 = vpop.xlane.xlu0 %1022 }
 0x398   : > { %v3430_v63 = vpop.xlane.xlu1 %1024 }
 0x39e   : > { %v3432_v44 = vpop.xlane.xlu0 %1026 }
 0x3a0   : > { %v3434_v46 = vpop.xlane.xlu1 %1028 }
 0x3a6   : > { %v3436_v48 = vpop.xlane.xlu0 %1030 }
 0x3a8   : > { %v3438_v51 = vpop.xlane.xlu1 %1032 }
 0x3aa   : > { %v1430_v0 = vpop.xlane.xlu0 %1429 }
 0x3ab   : > { %v1445_v56 = vmax.f32 %v1430_v0, 2.5e-09 }
 0x3ac   : > { %v1432_v52 = vpop.xlane.xlu1 %1431 }
 0x3ad   : > { %2743 = vrsqrt.f32 %v1445_v56  ;;  %v1446_v53 = vmax.f32 %v1432_v52, 2.5e-09 }
 0x3ae   : > { %v1434_v7 = vpop.xlane.xlu0 %1433 }
 0x3af   : > { %2745 = vrsqrt.f32 %v1446_v53  ;;  %v1447_v57 = vmax.f32 %v1434_v7, 2.5e-09 }
 0x3b0   : > { %v1436_v58 = vpop.xlane.xlu1 %1435 }
 0x3b1   : > { %2747 = vrsqrt.f32 %v1447_v57  ;;  %v1448_v15 = vmax.f32 %v1436_v58, 2.5e-09  ;;  %v1034_v58 = vmul.f32 0.5, %v3424_v49 }
 0x3b2   : > { %v1438_v13 = vpop.xlane.xlu0 %1437 }
 0x3b3   : > { %2749 = vrsqrt.f32 %v1448_v15  ;;  %v1449_v39 = vmax.f32 %v1438_v13, 2.5e-09  ;;  %v1037_v13 = vmul.f32 0.5, %v3430_v63  ;;  %v1040_v63 = vmul.f32 0.5, %v3436_v48 }
 0x3b4   : > { %v1440_v14 = vpop.xlane.xlu1 %1439 }
 0x3b5   : > { %2751 = vrsqrt.f32 %v1449_v39  ;;  %v1450_v26 = vmax.f32 %v1440_v14, 2.5e-09 }
 0x3b6   : > { %v1442_v30 = vpop.xlane.xlu0 %1441 }
 0x3b7   : > { %v2744_v27 = vpop.eup %2743  ;;  %2753 = vrsqrt.f32 %v1450_v26  ;;  %v1451_v28 = vmax.f32 %v1442_v30, 2.5e-09  ;;  %v1035_v26 = vmul.f32 0.5, %v3426_v42 }
 0x3b8   : > { %v1444_v31 = vpop.xlane.xlu1 %1443  ;;  %v3441_v16 = vmul.f32 %v2744_v27, %v3382_v35 }
 0x3b9   : > { %v2746_v36 = vpop.eup %2745  ;;  %2755 = vrsqrt.f32 %v1451_v28  ;;  %v1452_v50 = vmax.f32 %v1444_v31, 2.5e-09 }
 0x3ba   : > { %v1538_v40 = vmul.f32 %v3441_v16, %v3441_v16  ;;  %v3446_v32 = vmul.f32 %v2746_v36, %v3387_v33 }
 0x3bb   : > { %v2748_v34 = vpop.eup %2747  ;;  %2757 = vrsqrt.f32 %v1452_v50 }
 0x3bc   : > { %1546 = vadd.xlane.f32.xlu1 %v1538_v40  ;;  %v1469_v18 = vpack.c.bf16 %v3446_v32, %v3441_v16  ;;  %v1539_v35 = vmul.f32 %v3446_v32, %v3446_v32  ;;  %v3453_v59 = vmul.f32 %v2748_v34, %v3391_v45 }
 0x3bd   : > { %v2750_v47 = vpop.eup %2749 }
 0x3be   : > { %v3456_v60 = vmul.f32 %v2750_v47, %v3396_v55  ;;  %v1540_v41 = vmul.f32 %v3453_v59, %v3453_v59 }
 0x3bf   : > { %v2752_v37 = vpop.eup %2751 }
 0x3c0   : > { %1548 = vadd.xlane.f32.xlu1 %v1539_v35  ;;  %v1470_v33 = vpack.c.bf16 %v3456_v60, %v3453_v59  ;;  %v3463_v29 = vmul.f32 %v2752_v37, %v3401_v62  ;;  %v1541_v56 = vmul.f32 %v3456_v60, %v3456_v60  ;;  %v1038_v35 = vmul.f32 0.5, %v3432_v44 }
 0x3c1   : > { %v2754_v38 = vpop.eup %2753 }
 0x3c2   : > { %v3466_v4 = vmul.f32 %v2754_v38, %v3406_v61  ;;  %v1542_v61 = vmul.f32 %v3463_v29, %v3463_v29 }
 0x3c3   : > { %v2756_v45 = vpop.eup %2755 }
 0x3c4   : > { %1550 = vadd.xlane.f32.xlu1 %v1540_v41  ;;  %v1471_v55 = vpack.c.bf16 %v3466_v4, %v3463_v29  ;;  %v3473_v52 = vmul.f32 %v2756_v45, %v3411_v1  ;;  %v1543_v7 = vmul.f32 %v3466_v4, %v3466_v4  ;;  %v1041_v41 = vmul.f32 0.5, %v3438_v51 }
 0x3c5   : > { %v2758_v0 = vpop.eup %2757 }
 0x3c6   : > { %v3476_v53 = vmul.f32 %v2758_v0, %v3416_v12  ;;  %v1544_v57 = vmul.f32 %v3473_v52, %v3473_v52  ;;  %v1036_v12 = vmul.f32 0.5, %v3428_v43 }
 0x3c8   : > { %1552 = vadd.xlane.f32.xlu1 %v1541_v56  ;;  %v1472_v62 = vpack.c.bf16 %v3476_v53, %v3473_v52  ;;  %v1545_v1 = vmul.f32 %v3476_v53, %v3476_v53 }
 0x3cc   : > { %1554 = vadd.xlane.f32.xlu1 %v1542_v61 }
 0x3d0   : > { %1556 = vadd.xlane.f32.xlu1 %v1543_v7  ;;  %v1039_v7 = vmul.f32 0.5, %v3434_v46 }
 0x3d4   : > { %1558 = vadd.xlane.f32.xlu1 %v1544_v57 }
 0x3d8   : > { %1560 = vadd.xlane.f32.xlu1 %v1545_v1 }
 0x3de   : > { %v2472_v15 = vpop.f32.mrb[0].mxu1 }
 0x3df   : > { %v1044_v39 = vsub.f32 %v2472_v15, %v1036_v12  ;;  %v979_v14 = vpop.f32.mrb[1].mxu1 }
 0x3e0   : > { %v1042_v30 = vsub.f32 %v979_v14, %v1034_v58  ;;  %v2473_v27 = vpop.f32.mrb[2].mxu1 }
 0x3e1   : > { %v1054_v28 = vmul.f32 1.442695, %v1044_v39  ;;  %v1045_v31 = vsub.f32 %v2473_v27, %v1037_v13  ;;  %v982_v36 = vpop.f32.mrb[3].mxu1 }
 0x3e2   : > { %v1050_v50 = vmul.f32 1.442695, %v1042_v30  ;;  %v1043_v40 = vsub.f32 %v982_v36, %v1035_v26 }
 0x3e3   : > { %2759 = vpow2.f32 %v1054_v28  ;;  %v1056_v34 = vmul.f32 1.442695, %v1045_v31 }
 0x3e4   : > { %2761 = vpow2.f32 %v1050_v50  ;;  %v1052_v43 = vmul.f32 1.442695, %v1043_v40 }
 0x3e5   : > { %2763 = vpow2.f32 %v1056_v34 }
 0x3e6   : > { %2765 = vpow2.f32 %v1052_v43 }
 0x3ed   : > { %v2760_v49 = vpop.eup %2759 }
 0x3ee   : > { %v2762_v47 = vpop.eup %2761  ;;  %v1068_v42 = vadd.f32 0.0001, %v2760_v49  ;;  %v2476_v37 = vpop.f32.mrb[4].mxu1 }
 0x3ef   : > { %v2764_v38 = vpop.eup %2763  ;;  %v1066_v45 = vadd.f32 0.0001, %v2762_v47  ;;  %v1048_v0 = vsub.f32 %v2476_v37, %v1040_v63  ;;  %v995_v56 = vpop.f32.mrb[5].mxu1 }
 0x3f0   : > { %v2766_v61 = vpop.eup %2765  ;;  %v1076_v57 = vmul.f32 0.17677669, %v1068_v42  ;;  %v1069_v1 = vadd.f32 0.0001, %v2764_v38  ;;  %v1046_v12 = vsub.f32 %v995_v56, %v1038_v35  ;;  %v2477_v58 = vpop.f32.mrb[6].mxu1 }
 0x3f1   : > { %v1074_v15 = vmul.f32 0.17677669, %v1066_v45  ;;  %v1067_v48 = vadd.f32 0.0001, %v2766_v61  ;;  %v1062_v13 = vmul.f32 1.442695, %v1048_v0  ;;  %v1049_v39 = vsub.f32 %v2477_v58, %v1041_v41 }
 0x3f2   : > { %v1077_v44 = vmul.f32 0.17677669, %v1069_v1  ;;  %v1058_v14 = vmul.f32 1.442695, %v1046_v12  ;;  %v998_v26 = vpop.f32.mrb[7].mxu1  ;;  %v1084_v28 = vmul.f32 %v3116_v22, %v1076_v57 }
 0x3f3   : > { %v1075_v30 = vmul.f32 0.17677669, %v1067_v48  ;;  %2767 = vpow2.f32 %v1062_v13  ;;  %v1064_v51 = vmul.f32 1.442695, %v1049_v39  ;;  %v1047_v27 = vsub.f32 %v998_v26, %v1039_v7 }
 0x3f4   : > { %2769 = vpow2.f32 %v1058_v14  ;;  %v1085_v46 = vmul.f32 %v3116_v22, %v1077_v44  ;;  %v1082_v36 = vmul.f32 %v3116_v22, %v1074_v15 }
 0x3f5   : > { %2771 = vpow2.f32 %v1064_v51  ;;  %v1060_v31 = vmul.f32 1.442695, %v1047_v27  ;;  %v1083_v50 = vmul.f32 %v3116_v22, %v1075_v30 }
 0x3f6   : > { %v1104_v40 = vpack.c.bf16 %v1085_v46, %v1084_v28 }
 0x3f7   : > { %2773 = vpow2.f32 %v1060_v31  ;;  %v1103_v34 = vpack.c.bf16 %v1083_v50, %v1082_v36  ;;  %v1090_v43 = vadd.f32 %v1083_v50, %v1082_v36 }
 0x3f9   : > { %1111 = vxpose.xlu0.c.b16.start [1/4] (short) %v1103_v34, 128  ;;  %v1091_v49 = vadd.f32 %v1090_v43, %v1084_v28 }
 0x3fb   : > { %v1092_v63 = vadd.f32 %v1091_v49, %v1085_v46 }
 0x3fd   : > { %v2768_v47 = vpop.eup %2767  ;;  %1112 = vxpose.xlu0.c.b16.cont [2/4] (short) %v1104_v40, 128 }
 0x3fe   : > { %v2770_v35 = vpop.eup %2769  ;;  %v1072_v42 = vadd.f32 0.0001, %v2768_v47 }
 0x3ff   : > { %v2772_v37 = vpop.eup %2771  ;;  %v1070_v38 = vadd.f32 0.0001, %v2770_v35 }
 0x400   : > { %v1080_v41 = vmul.f32 0.17677669, %v1072_v42  ;;  %v1073_v45 = vadd.f32 0.0001, %v2772_v37 }
 0x401   : > { %v2774_v0 = vpop.eup %2773  ;;  %v1078_v56 = vmul.f32 0.17677669, %v1070_v38 }
 0x402   : > { %v1081_v61 = vmul.f32 0.17677669, %v1073_v45  ;;  %v1071_v7 = vadd.f32 0.0001, %v2774_v0  ;;  %v1088_v12 = vmul.f32 %v3116_v22, %v1080_v41 }
 0x403   : > { %v1086_v57 = vmul.f32 %v3116_v22, %v1078_v56 }
 0x404   : > { %v1079_v1 = vmul.f32 0.17677669, %v1071_v7  ;;  %v1089_v58 = vmul.f32 %v3116_v22, %v1081_v61 }
 0x405   : > { %v1093_v15 = vadd.f32 %v1092_v63, %v1086_v57 }
 0x406   : > { %v1087_v48 = vmul.f32 %v3116_v22, %v1079_v1  ;;  %v1106_v13 = vpack.c.bf16 %v1089_v58, %v1088_v12 }
 0x408   : > { %v1105_v39 = vpack.c.bf16 %v1087_v48, %v1086_v57  ;;  %v1094_v44 = vadd.f32 %v1093_v15, %v1087_v48 }
 0x40a   : > { %1113 = vxpose.xlu0.c.b16.cont [3/4] (short) %v1105_v39, 128  ;;  %v1095_v14 = vadd.f32 %v1094_v44, %v1088_v12 }
 0x40c   : > { %v3504_v26 = vadd.f32 %v1095_v14, %v1089_v58 }
 0x40e   : > { %1114 = vxpose.xlu0.c.b16.end [4/4] (short) %v1106_v13, 128  ;;  %v1097_v41 = vrot.slane %v3504_v26, 4 }
 0x410   : > { %v1098_v12 = vadd.f32 %v1097_v41, %v3504_v26 }
 0x468   : > { %v1119_v30 = vpop.trf.xlu0 }
 0x469   : > { %2486 = vmatprep.mubr.msk.bf16.mxu1 %vm1127_vm1, %v1119_v30 }
 0x46c   : > { %v1120_v51 = vpop.trf.xlu0 }
 0x46d   : > { %2487 = vmatmul.mubr.msk.bf16.vlgmr.msra.gmra.mrb[8].mxu1 %vm1127_vm1, %v1120_v51 }
 0x46e   : > { %2527 = vmatpush3.bf16.msra.mxu1 %v3215_v19 }
 0x46f   : > { %2528 = vmatprep.subr.bf16.mxu1 %v3220_v20 }
 0x470   : > { %v1121_v27 = vpop.trf.xlu0 }
 0x471   : > { %2490 = vmatprep.mubr.msk.bf16.mxu1 %vm1127_vm1, %v1121_v27  ;;  %v1099_v27 = vrot.slane %v1098_v12, 2 }
 0x472   : > { %2529 = vmatpush3.bf16.msra.mxu1 %v3220_v20 }
 0x473   : > { %2530 = vmatprep.subr.bf16.mxu1 %v3228_v21 }
 0x474   : > { %v1122_v28 = vpop.trf.xlu0 }
 0x475   : > { %2491 = vmatmul.mubr.msk.bf16.gmra.mrb[12].mxu1 %vm1127_vm1, %v1122_v28 }
 0x476   : > { %2531 = vmatpush3.bf16.msra.mxu1 %v3228_v21 }
 0x477   : > { %2532 = vmatprep.subr.bf16.mxu1 %v3235_v23 }
 0x478   : > { %v1123_v46 = vpop.trf.xlu0 }
 0x479   : > { %2494 = vmatprep.mubr.msk.bf16.mxu1 %vm1127_vm1, %v1123_v46 }
 0x47a   : > { %2533 = vmatpush3.bf16.msra.mxu1 %v3235_v23  ;;  %v1547_v23 = vpop.xlane.xlu1 %1546 }
 0x47b   : > { %2534 = vmatprep.subr.bf16.mxu1 %v3242_v24  ;;  %v1562_v0 = vmul.f32 0.5, %v1547_v23 }
 0x47c   : > { %v1124_v19 = vpop.trf.xlu0 }
 0x47d   : > { %2495 = vmatmul.mubr.msk.bf16.gmra.mrb[16].mxu1 %vm1127_vm1, %v1124_v19 }
 0x47e   : > { %2535 = vmatpush3.bf16.msra.mxu1 %v3242_v24 }
 0x47f   : > { %2536 = vmatprep.subr.bf16.mxu1 %v3249_v25 }
 0x480   : > { %v1125_v20 = vpop.trf.xlu0 }
 0x481   : > { %2498 = vmatprep.mubr.msk.bf16.mxu1 %vm1127_vm1, %v1125_v20 }
 0x482   : > { %2537 = vmatpush3.bf16.msra.mxu1 %v3249_v25 }
 0x483   : > { %2538 = vmatprep.subr.bf16.mxu1 %v3293_v17 }
 0x484   : > { %v1126_v21 = vpop.trf.xlu0 }
 0x485   : > { %2499 = vmatmul.mubr.msk.bf16.gmra.mrb[20].mxu1 %vm1127_vm1, %v1126_v21 }
 0x486   : > { %2539 = vmatpush3.bf16.msra.mxu1 %v3293_v17  ;;  %2542 = vmatprep.mubr.bf16.mxu1 %v1469_v18  ;;  %v1549_v17 = vpop.xlane.xlu1 %1548 }
 0x487   : > { %2540 = vmatprep.subr.bf16.mxu1 %v3300_v54  ;;  %v1563_v58 = vmul.f32 0.5, %v1549_v17 }
 0x48a   : > { %2541 = vmatpush3.bf16.msra.mxu1 %v3300_v54  ;;  %v1551_v59 = vpop.xlane.xlu1 %1550 }
 0x48b   : > { %v1564_v45 = vmul.f32 0.5, %v1551_v59 }
 0x48d   : > { %2543 = vmatmul.mubr.bf16.vlgmr.msra.gmra.mrb[24].mxu1 %v1470_v33 }
 0x48e   : > { %2546 = vmatprep.mubr.bf16.mxu1 %v1471_v55  ;;  %v1553_v53 = vpop.xlane.xlu1 %1552 }
 0x48f   : > { %v1565_v7 = vmul.f32 0.5, %v1553_v53 }
 0x492   : > { %v1555_v34 = vpop.xlane.xlu1 %1554 }
 0x493   : > { %v1566_v20 = vmul.f32 0.5, %v1555_v34 }
 0x495   : > { %2547 = vmatmul.mubr.bf16.gmra.mrb[28].mxu1 %v1472_v62 }
 0x496   : > { %v1557_v47 = vpop.xlane.xlu1 %1556 }
 0x497   : > { %v1567_v17 = vmul.f32 0.5, %v1557_v47 }
 0x49a   : > { %v1559_v56 = vpop.xlane.xlu1 %1558 }
 0x49b   : > { %v1568_v19 = vmul.f32 0.5, %v1559_v56 }
 0x49e   : > { %v1561_v28 = vpop.xlane.xlu1 %1560 }
 0x49f   : > { %v1569_v21 = vmul.f32 0.5, %v1561_v28 }
 0x540   : > { %v2488_v24 = vpop.f32.mrb[8].mxu1 }
 0x541   : > { %v1186_v25 = vpop.f32.mrb[9].mxu1 }
 0x542   : > { %v2489_v16 = vpop.f32.mrb[10].mxu1 }
 0x543   : > { %v1647_v32 = vpack.c.bf16 %v2489_v16, %v2488_v24  ;;  %v1189_v18 = vpop.f32.mrb[11].mxu1 }
 0x544   : > { %v1646_v54 = vpack.c.bf16 %v1189_v18, %v1186_v25  ;;  %v1100_v25 = vadd.f32 %v1099_v27, %v1098_v12 }
 0x546   : > { %2550 = vmatprep.subr.bf16.mxu0 %v1646_v54 }
 0x547   : > { %2551 = vmatpush3.bf16.msra.mxu0 %v1646_v54 }
 0x548   : > { %v2492_v60 = vpop.f32.mrb[12].mxu1  ;;  %2552 = vmatprep.subr.bf16.mxu0 %v1647_v32 }
 0x549   : > { %v1202_v33 = vpop.f32.mrb[13].mxu1 }
 0x54a   : > { %v2493_v29 = vpop.f32.mrb[14].mxu1 }
 0x54b   : > { %v1649_v4 = vpack.c.bf16 %v2493_v29, %v2492_v60  ;;  %v1205_v55 = vpop.f32.mrb[15].mxu1  ;;  %2553 = vmatpush3.bf16.msra.mxu0 %v1647_v32 }
 0x54c   : > { %v1648_v52 = vpack.c.bf16 %v1205_v55, %v1202_v33 }
 0x54e   : > { %2554 = vmatprep.subr.bf16.mxu0 %v1648_v52 }
 0x54f   : > { %2555 = vmatpush3.bf16.msra.mxu0 %v1648_v52 }
 0x550   : > { %v2496_v62 = vpop.f32.mrb[16].mxu1  ;;  %2556 = vmatprep.subr.bf16.mxu0 %v1649_v4 }
 0x551   : > { %v1218_v31 = vpop.f32.mrb[17].mxu1 }
 0x552   : > { %v2497_v36 = vpop.f32.mrb[18].mxu1 }
 0x553   : > { %v1651_v50 = vpack.c.bf16 %v2497_v36, %v2496_v62  ;;  %v1221_v40 = vpop.f32.mrb[19].mxu1  ;;  %2557 = vmatpush3.bf16.msra.mxu0 %v1649_v4  ;;  %v1101_v4 = vrot.slane %v1100_v25, 1 }
 0x554   : > { %v1650_v43 = vpack.c.bf16 %v1221_v40, %v1218_v31 }
 0x555   : > { %v1102_v40 = vadd.f32 %v1101_v4, %v1100_v25 }
 0x556   : > { %2558 = vmatprep.subr.bf16.mxu0 %v1650_v43 }
 0x557   : > { %2559 = vmatpush3.bf16.msra.mxu0 %v1650_v43 }
 0x558   : > { %v2500_v49 = vpop.f32.mrb[20].mxu1  ;;  %2560 = vmatprep.subr.bf16.mxu0 %v1651_v50 }
 0x559   : > { %v1234_v63 = vpop.f32.mrb[21].mxu1 }
 0x55a   : > { %v2501_v35 = vpop.f32.mrb[22].mxu1 }
 0x55b   : > { %v1653_v42 = vpack.c.bf16 %v2501_v35, %v2500_v49  ;;  %v1237_v37 = vpop.f32.mrb[23].mxu1  ;;  %2561 = vmatpush3.bf16.msra.mxu0 %v1651_v50 }
 0x55c   : > { %v1652_v38 = vpack.c.bf16 %v1237_v37, %v1234_v63 }
 0x55e   : > { %2562 = vmatprep.subr.bf16.mxu0 %v1652_v38 }
 0x55f   : > { %2563 = vmatpush3.bf16.msra.mxu0 %v1652_v38 }
 0x560   : > { %v2544_v61 = vpop.f32.mrb[24].mxu1  ;;  %2564 = vmatprep.subr.bf16.mxu0 %v1653_v42 }
 0x561   : > { %v1572_v57 = vsub.f32 %v2544_v61, %v1564_v45  ;;  %v1507_v1 = vpop.f32.mrb[25].mxu1 }
 0x562   : > { %v1570_v15 = vsub.f32 %v1507_v1, %v1562_v0  ;;  %v2545_v48 = vpop.f32.mrb[26].mxu1 }
 0x563   : > { %v1582_v13 = vmul.f32 1.442695, %v1572_v57  ;;  %v1573_v39 = vsub.f32 %v2545_v48, %v1565_v7  ;;  %v1510_v44 = vpop.f32.mrb[27].mxu1  ;;  %2565 = vmatpush3.bf16.msra.mxu0 %v1653_v42 }
 0x564   : > { %v1578_v14 = vmul.f32 1.442695, %v1570_v15  ;;  %v1571_v30 = vsub.f32 %v1510_v44, %v1563_v58 }
 0x565   : > { %2775 = vpow2.f32 %v1582_v13  ;;  %v1584_v51 = vmul.f32 1.442695, %v1573_v39 }
 0x566   : > { %2777 = vpow2.f32 %v1578_v14  ;;  %v1580_v46 = vmul.f32 1.442695, %v1571_v30 }
 0x567   : > { %2779 = vpow2.f32 %v1584_v51 }
 0x568   : > { %2781 = vpow2.f32 %v1580_v46  ;;  %v2548_v26 = vpop.f32.mrb[28].mxu1 }
 0x569   : > { %v1576_v23 = vsub.f32 %v2548_v26, %v1568_v19  ;;  %v1523_v24 = vpop.f32.mrb[29].mxu1 }
 0x56a   : > { %v1574_v16 = vsub.f32 %v1523_v24, %v1566_v20  ;;  %v2549_v32 = vpop.f32.mrb[30].mxu1 }
 0x56b   : > { %v1590_v18 = vmul.f32 1.442695, %v1576_v23  ;;  %v1577_v54 = vsub.f32 %v2549_v32, %v1569_v21  ;;  %v1526_v59 = vpop.f32.mrb[31].mxu1 }
 0x56c   : > { %v1586_v60 = vmul.f32 1.442695, %v1574_v16  ;;  %v1575_v33 = vsub.f32 %v1526_v59, %v1567_v17 }
 0x56d   : > { %2783 = vpow2.f32 %v1590_v18  ;;  %v1592_v29 = vmul.f32 1.442695, %v1577_v54 }
 0x56e   : > { %2785 = vpow2.f32 %v1586_v60  ;;  %v1588_v55 = vmul.f32 1.442695, %v1575_v33 }
 0x56f   : > { %v2776_v52 = vpop.eup %2775  ;;  %2787 = vpow2.f32 %v1592_v29 }
 0x570   : > { %v2778_v53 = vpop.eup %2777  ;;  %2789 = vpow2.f32 %v1588_v55  ;;  %v1596_v62 = vadd.f32 0.0001, %v2776_v52 }
 0x571   : > { %v2780_v31 = vpop.eup %2779  ;;  %v1594_v36 = vadd.f32 0.0001, %v2778_v53 }
 0x572   : > { %v2782_v50 = vpop.eup %2781  ;;  %v1597_v34 = vadd.f32 0.0001, %v2780_v31  ;;  %v1604_v43 = vmul.f32 0.17677669, %v1596_v62 }
 0x573   : > { %v1602_v49 = vmul.f32 0.17677669, %v1594_v36  ;;  %v1595_v63 = vadd.f32 0.0001, %v2782_v50 }
 0x574   : > { %v1605_v47 = vmul.f32 0.17677669, %v1597_v34  ;;  %v1612_v35 = vmul.f32 %v1604_v43, %v1102_v40 }
 0x575   : > { %v1603_v42 = vmul.f32 0.17677669, %v1595_v63  ;;  %v1610_v37 = vmul.f32 %v1602_v49, %v1102_v40 }
 0x576   : > { %1622 = vadd.xlane.f32.xlu1 %v1612_v35  ;;  %v1643_v38 = vpack.c.bf16 %v1605_v47, %v1604_v43  ;;  %v1613_v41 = vmul.f32 %v1605_v47, %v1102_v40 }
 0x577   : > { %v2784_v45 = vpop.eup %2783  ;;  %v1642_v0 = vpack.c.bf16 %v1603_v42, %v1602_v49  ;;  %v1611_v56 = vmul.f32 %v1603_v42, %v1102_v40 }
 0x578   : > { %v2786_v61 = vpop.eup %2785  ;;  %v1600_v7 = vadd.f32 0.0001, %v2784_v45 }
 0x579   : > { %v2788_v57 = vpop.eup %2787  ;;  %v1598_v1 = vadd.f32 0.0001, %v2786_v61  ;;  %2566 = vmatprep.mubr.bf16.mxu0 %v1642_v0 }
 0x57a   : > { %v2790_v12 = vpop.eup %2789  ;;  %v1608_v58 = vmul.f32 0.17677669, %v1600_v7  ;;  %1618 = vadd.xlane.f32.xlu1 %v1610_v37  ;;  %2567 = vmatmul.mubr.bf16.vlgmr.msra.gmra.mrb[24].mxu0 %v1643_v38  ;;  %v1601_v15 = vadd.f32 0.0001, %v2788_v57 }
 0x57b   : > { %v1606_v48 = vmul.f32 0.17677669, %v1598_v1  ;;  %v1599_v13 = vadd.f32 0.0001, %v2790_v12 }
 0x57c   : > { %v1609_v39 = vmul.f32 0.17677669, %v1601_v15  ;;  %v1616_v44 = vmul.f32 %v1608_v58, %v1102_v40 }
 0x57d   : > { %v1607_v14 = vmul.f32 0.17677669, %v1599_v13  ;;  %v1614_v30 = vmul.f32 %v1606_v48, %v1102_v40 }
 0x57e   : > { %1624 = vadd.xlane.f32.xlu1 %v1613_v41  ;;  %v1617_v51 = vmul.f32 %v1609_v39, %v1102_v40  ;;  %v1645_v27 = vpack.c.bf16 %v1609_v39, %v1608_v58 }
 0x57f   : > { %v1644_v28 = vpack.c.bf16 %v1607_v14, %v1606_v48  ;;  %v1615_v46 = vmul.f32 %v1607_v14, %v1102_v40 }
 0x580   : > { %1632 = vadd.xlane.f32.xlu0 %v1617_v51 }
 0x581   : > { %2570 = vmatprep.mubr.bf16.mxu0 %v1644_v28 }
 0x582   : > { %1620 = vadd.xlane.f32.xlu1 %v1611_v56  ;;  %2571 = vmatmul.mubr.bf16.gmra.mrb[28].mxu0 %v1645_v27 }
 0x586   : > { %1626 = vadd.xlane.f32.xlu1 %v1614_v30 }
 0x58a   : > { %1628 = vadd.xlane.f32.xlu1 %v1615_v46 }
 0x58e   : > { %1630 = vadd.xlane.f32.xlu1 %v1616_v44 }
 0x603   : > { %v1623_v19 = vpop.xlane.xlu1 %1622 }
 0x604   : > { %2791 = vrcp.f32 %v1623_v19 }
 0x607   : > { %v1619_v20 = vpop.xlane.xlu1 %1618 }
 0x608   : > { %2793 = vrcp.f32 %v1619_v20 }
 0x60b   : > { %v1625_v26 = vpop.xlane.xlu1 %1624 }
 0x60c   : > { %2795 = vrcp.f32 %v1625_v26 }
 0x60d   : > { %v1633_v23 = vpop.xlane.xlu0 %1632 }
 0x60e   : > { %2797 = vrcp.f32 %v1633_v23  ;;  %v2792_v25 = vpop.eup %2791 }
 0x60f   : > { %v1621_v21 = vpop.xlane.xlu1 %1620 }
 0x610   : > { %2799 = vrcp.f32 %v1621_v21 }
 0x612   : > { %v2794_v18 = vpop.eup %2793 }
 0x613   : > { %v1627_v24 = vpop.xlane.xlu1 %1626 }
 0x614   : > { %2801 = vrcp.f32 %v1627_v24 }
 0x616   : > { %v2796_v4 = vpop.eup %2795 }
 0x617   : > { %v1629_v59 = vpop.xlane.xlu1 %1628 }
 0x618   : > { %2803 = vrcp.f32 %v1629_v59  ;;  %v2798_v62 = vpop.eup %2797 }
 0x61a   : > { %v2800_v50 = vpop.eup %2799 }
 0x61b   : > { %v1631_v31 = vpop.xlane.xlu1 %1630 }
 0x61c   : > { %2805 = vrcp.f32 %v1631_v31  ;;  %v2698_v31 = vld [vmem:[%s3741_s10 + $0x18] sm:$0xff]  }
 0x61e   : > { %v2802_v63 = vpop.eup %2801 }
 0x64d   : > { %v2568_v17 = vpop.f32.mrb[24].mxu0 }
 0x64e   : > { %v1721_v16 = vmul.f32 %v2792_v25, %v2568_v17  ;;  %v1688_v32 = vpop.f32.mrb[25].mxu0 }
 0x64f   : > { %v2569_v54 = vpop.f32.mrb[26].mxu0  ;;  %v1719_v33 = vmul.f32 %v2794_v18, %v1688_v32 }
 0x650   : > { %v3544_v60 = vadd.f32 %v3084_v3, %v1721_v16  ;;  %v1691_v29 = vpop.f32.mrb[27].mxu0  ;;  %v1722_v52 = vmul.f32 %v2796_v4, %v2569_v54 }
 0x651   : > { %v3548_v55 = vadd.f32 %v3082_v2, %v1719_v33  ;;  %v1720_v34 = vmul.f32 %v2800_v50, %v1691_v29  ;;  %v2695_v29 = vld [vmem:[%s3741_s10] sm:$0xff]   ;;  %v2700_v50 = vld [vmem:[%s3741_s10 + $0x28] sm:$0xff]  }
 0x652   : > { %1739 = vadd.xlane.f32.xlu1 %v3544_v60  ;;  %v3552_v40 = vadd.f32 %v3090_v6, %v1722_v52  ;;  %v2804_v6 = vpop.eup %2803  ;;  %2574 = vmatprep.subr.bf16.mxu1 %v2695_v29 }
 0x653   : > { %v3559_v47 = vadd.f32 %v3088_v5, %v1720_v34  ;;  %2575 = vmatpush3.bf16.msra.mxu1 %v2695_v29  ;;  %v2702_v34 = vld [vmem:[%s3741_s10 + $0x38] sm:$0xff]  }
 0x655   : > { %v2572_v53 = vpop.f32.mrb[28].mxu0 }
 0x656   : > { %v1704_v36 = vpop.f32.mrb[29].mxu0  ;;  %1735 = vadd.xlane.f32.xlu1 %v3548_v55 }
 0x657   : > { %v2573_v3 = vpop.f32.mrb[30].mxu0  ;;  %v1723_v35 = vmul.f32 %v2802_v63, %v1704_v36  ;;  %v2699_v36 = vld [vmem:[%s3741_s10 + $0x20] sm:$0xff]  }
 0x658   : > { %v1726_v43 = vmul.f32 %v2798_v62, %v2573_v3  ;;  %v1707_v49 = vpop.f32.mrb[31].mxu0  ;;  %v2696_v62 = vld [vmem:[%s3741_s10 + $0x8] sm:$0xff]   ;;  %v2701_v3 = vld [vmem:[%s3741_s10 + $0x30] sm:$0xff]  }
 0x659   : > { %v3564_v42 = vadd.f32 %v3094_v8, %v1723_v35  ;;  %v1724_v37 = vmul.f32 %v2804_v6, %v1707_v49  ;;  %2576 = vmatprep.subr.bf16.mxu1 %v2696_v62 }
 0x65a   : > { %v3555_v2 = vadd.f32 %v3102_v11, %v1726_v43  ;;  %1741 = vadd.xlane.f32.xlu1 %v3552_v40  ;;  %v2806_v11 = vpop.eup %2805  ;;  %2577 = vmatpush3.bf16.msra.mxu1 %v2696_v62 }
 0x65b   : > { %v1725_v38 = vmul.f32 %v2806_v11, %v2572_v53  ;;  %v3568_v41 = vadd.f32 %v3096_v9, %v1724_v37 }
 0x65c   : > { %1749 = vadd.xlane.f32.xlu0 %v3555_v2 }
 0x65d   : > { %v3572_v5 = vadd.f32 %v3100_v10, %v1725_v38 }
 0x65e   : > { %1737 = vadd.xlane.f32.xlu1 %v3559_v47 }
 0x662   : > { %1743 = vadd.xlane.f32.xlu1 %v3564_v42 }
 0x666   : > { %1745 = vadd.xlane.f32.xlu1 %v3568_v41 }
 0x66a   : > { %1747 = vadd.xlane.f32.xlu1 %v3572_v5 }
 0x6df   : > { %v1740_v45 = vpop.xlane.xlu1 %1739 }
 0x6e0   : > { %v1753_v0 = vmul.f32 0.03125, %v1740_v45 }
 0x6e2   : > { %v1761_v61 = vsub.f32 %v3544_v60, %v1753_v0 }
 0x6e3   : > { %v1736_v56 = vpop.xlane.xlu1 %1735 }
 0x6e4   : > { %v1751_v8 = vmul.f32 0.03125, %v1736_v56  ;;  %v3583_v10 = vmul.f32 %v3116_v22, %v1761_v61 }
 0x6e6   : > { %v1759_v7 = vsub.f32 %v3548_v55, %v1751_v8  ;;  %v1777_v39 = vmul.f32 %v3583_v10, %v3583_v10 }
 0x6e7   : > { %v1742_v57 = vpop.xlane.xlu1 %1741 }
 0x6e8   : > { %v3578_v1 = vmul.f32 %v3116_v22, %v1759_v7  ;;  %v1754_v9 = vmul.f32 0.03125, %v1742_v57 }
 0x6e9   : > { %v1750_v44 = vpop.xlane.xlu0 %1749 }
 0x6ea   : > { %v1775_v12 = vmul.f32 %v3578_v1, %v3578_v1  ;;  %v1762_v48 = vsub.f32 %v3552_v40, %v1754_v9  ;;  %v1758_v27 = vmul.f32 0.03125, %v1750_v44 }
 0x6eb   : > { %v1738_v58 = vpop.xlane.xlu1 %1737 }
 0x6ec   : > { %v1752_v15 = vmul.f32 0.03125, %v1738_v58  ;;  %1783 = vadd.xlane.f32.xlu1 %v1775_v12  ;;  %v3596_v19 = vmul.f32 %v3116_v22, %v1762_v48  ;;  %v1766_v23 = vsub.f32 %v3555_v2, %v1758_v27 }
 0x6ee   : > { %v1760_v13 = vsub.f32 %v3559_v47, %v1752_v15  ;;  %v1778_v25 = vmul.f32 %v3596_v19, %v3596_v19  ;;  %v3614_v33 = vmul.f32 %v3116_v22, %v1766_v23 }
 0x6ef   : > { %v1744_v14 = vpop.xlane.xlu1 %1743 }
 0x6f0   : > { %v1755_v30 = vmul.f32 0.03125, %v1744_v14  ;;  %1787 = vadd.xlane.f32.xlu1 %v1777_v39  ;;  %v3590_v51 = vmul.f32 %v3116_v22, %v1760_v13  ;;  %v1782_v52 = vmul.f32 %v3614_v33, %v3614_v33  ;;  %v2327_v14 = vld [vmem:[%s3739_s8] ss:$0 sm:$0xff] }
 0x6f2   : > { %v1763_v28 = vsub.f32 %v3564_v42, %v1755_v30  ;;  %v1776_v46 = vmul.f32 %v3590_v51, %v3590_v51 }
 0x6f3   : > { %v1746_v20 = vpop.xlane.xlu1 %1745 }
 0x6f4   : > { %v1756_v26 = vmul.f32 0.03125, %v1746_v20  ;;  %1785 = vadd.xlane.f32.xlu0 %v1776_v46  ;;  %v3599_v21 = vmul.f32 %v3116_v22, %v1763_v28 }
 0x6f6   : > { %v1764_v24 = vsub.f32 %v3568_v41, %v1756_v26  ;;  %v1779_v17 = vmul.f32 %v3599_v21, %v3599_v21 }
 0x6f7   : > { %v1748_v16 = vpop.xlane.xlu1 %1747 }
 0x6f8   : > { %v1757_v32 = vmul.f32 0.03125, %v1748_v16  ;;  %1789 = vadd.xlane.f32.xlu0 %v1778_v25  ;;  %1791 = vadd.xlane.f32.xlu1 %v1779_v17  ;;  %v3608_v18 = vmul.f32 %v3116_v22, %v1764_v24 }
 0x6fa   : > { %v1765_v54 = vsub.f32 %v3572_v5, %v1757_v32  ;;  %v1780_v59 = vmul.f32 %v3608_v18, %v3608_v18 }
 0x6fc   : > { %1793 = vadd.xlane.f32.xlu0 %v1780_v59  ;;  %v3620_v4 = vmul.f32 %v3116_v22, %v1765_v54  ;;  %v2697_v22 = vld [vmem:[%s3741_s10 + $0x10] sm:$0xff]  }
 0x6fd   : > { %2578 = vmatprep.subr.bf16.mxu1 %v2697_v22 }
 0x6fe   : > { %v1781_v53 = vmul.f32 %v3620_v4, %v3620_v4  ;;  %2579 = vmatpush3.bf16.msra.mxu1 %v2697_v22 }
 0x6ff   : > { %2580 = vmatprep.subr.bf16.mxu1 %v2698_v31 }
 0x700   : > { %1797 = vadd.xlane.f32.xlu0 %v1782_v52  ;;  %1795 = vadd.xlane.f32.xlu1 %v1781_v53 }
 0x702   : > { %2581 = vmatpush3.bf16.msra.mxu1 %v2698_v31 }
 0x703   : > { %2582 = vmatprep.subr.bf16.mxu1 %v2699_v36 }
 0x706   : > { %2583 = vmatpush3.bf16.msra.mxu1 %v2699_v36 }
 0x707   : > { %2584 = vmatprep.subr.bf16.mxu1 %v2700_v50 }
 0x70a   : > { %2585 = vmatpush3.bf16.msra.mxu1 %v2700_v50 }
 0x70b   : > { %2586 = vmatprep.subr.bf16.mxu1 %v2701_v3 }
 0x70e   : > { %2587 = vmatpush3.bf16.msra.mxu1 %v2701_v3 }
 0x70f   : > { %2588 = vmatprep.subr.bf16.mxu1 %v2702_v34 }
 0x712   : > { %2589 = vmatpush3.bf16.msra.mxu1 %v2702_v34 }
 0x779   : > { %v1784_v43 = vpop.xlane.xlu1 %1783 }
 0x77a   : > { %v1799_v49 = vmul.f32 0.03125, %v1784_v43 }
 0x77c   : > { %v1807_v63 = vadd.f32 1e-05, %v1799_v49 }
 0x77d   : > { %v1788_v35 = vpop.xlane.xlu1 %1787 }
 0x77e   : > { %v1801_v6 = vmul.f32 0.03125, %v1788_v35  ;;  %2807 = vrsqrt.f32 %v1807_v63 }
 0x780   : > { %v1809_v37 = vadd.f32 1e-05, %v1801_v6 }
 0x781   : > { %v1786_v11 = vpop.xlane.xlu0 %1785 }
 0x782   : > { %v1800_v38 = vmul.f32 0.03125, %v1786_v11  ;;  %2809 = vrsqrt.f32 %v1809_v37 }
 0x784   : > { %v1808_v45 = vadd.f32 1e-05, %v1800_v38 }
 0x785   : > { %v1790_v0 = vpop.xlane.xlu0 %1789  ;;  %v1792_v56 = vpop.xlane.xlu1 %1791 }
 0x786   : > { %2811 = vrsqrt.f32 %v1808_v45  ;;  %v1802_v8 = vmul.f32 0.03125, %v1790_v0  ;;  %v1803_v61 = vmul.f32 0.03125, %v1792_v56  ;;  %v2704_v0 = vld [vmem:[#allocation4 + $0x8] sm:$0xff]   ;;  %v2705_v56 = vld [vmem:[#allocation4 + $0x10] sm:$0xff]  }
 0x788   : > { %v1810_v7 = vadd.f32 1e-05, %v1802_v8  ;;  %v1811_v57 = vadd.f32 1e-05, %v1803_v61  ;;  %v2808_v12 = vpop.eup %2807  ;;  %v2708_v8 = vld [vmem:[#allocation4 + $0x28] sm:$0xff]   ;;  %v2709_v61 = vld [vmem:[#allocation4 + $0x30] sm:$0xff]  }
 0x789   : > { %v1794_v9 = vpop.xlane.xlu0 %1793  ;;  %v1823_v39 = vmul.f32 %v2808_v12, %v3578_v1  ;;  %v2328_v1 = vld [vmem:[%s3740_s9] ss:$0 sm:$0xff] }
 0x78a   : > { %2813 = vrsqrt.f32 %v1810_v7  ;;  %v1804_v58 = vmul.f32 0.03125, %v1794_v9  ;;  %v2710_v7 = vld [vmem:[#allocation4 + $0x38] sm:$0xff]  }
 0x78b   : > { %2815 = vrsqrt.f32 %v1811_v57  ;;  %v1837_v24 = vmul.f32 %v2327_v14, %v1823_v39  ;;  %v2329_v57 = vld [vmem:[%s3742_s11] ss:$0 sm:$0xff] }
 0x78c   : > { %v1812_v15 = vadd.f32 1e-05, %v1804_v58  ;;  %v2810_v44 = vpop.eup %2809 }
 0x78d   : > { %v1798_v48 = vpop.xlane.xlu0 %1797  ;;  %v1796_v13 = vpop.xlane.xlu1 %1795  ;;  %v1825_v26 = vmul.f32 %v2810_v44, %v3583_v10  ;;  %v1851_v59 = vadd.f32 %v2328_v1, %v1837_v24 }
 0x78e   : > { %2817 = vrsqrt.f32 %v1812_v15  ;;  %v1806_v30 = vmul.f32 0.03125, %v1798_v48  ;;  %v1805_v27 = vmul.f32 0.03125, %v1796_v13 }
 0x78f   : > { %v1839_v32 = vmul.f32 %v2327_v14, %v1825_v26 }
 0x790   : > { %v2812_v28 = vpop.eup %2811  ;;  %v1814_v46 = vadd.f32 1e-05, %v1806_v30  ;;  %v1813_v20 = vadd.f32 1e-05, %v1805_v27 }
 0x791   : > { %v1824_v23 = vmul.f32 %v2812_v28, %v3590_v51  ;;  %v1853_v62 = vadd.f32 %v2328_v1, %v1839_v32 }
 0x792   : > { %2819 = vrsqrt.f32 %v1814_v46 }
 0x793   : > { %2821 = vrsqrt.f32 %v1813_v20  ;;  %v1838_v25 = vmul.f32 %v2327_v14, %v1824_v23 }
 0x794   : > { %v2814_v17 = vpop.eup %2813 }
 0x795   : > { %v2816_v16 = vpop.eup %2815  ;;  %v1826_v54 = vmul.f32 %v2814_v17, %v3596_v19  ;;  %v1852_v29 = vadd.f32 %v2328_v1, %v1838_v25 }
 0x796   : > { %v1827_v52 = vmul.f32 %v2816_v16, %v3599_v21 }
 0x797   : > { %v1840_v10 = vmul.f32 %v2327_v14, %v1826_v54  ;;  %v1859_v53 = vpack.c.bf16 %v1852_v29, %v1851_v59 }
 0x798   : > { %v2818_v51 = vpop.eup %2817  ;;  %v1841_v36 = vmul.f32 %v2327_v14, %v1827_v52 }
 0x799   : > { %2590 = vmatprep.mubr.bf16.mxu1 %v1859_v53  ;;  %v1854_v22 = vadd.f32 %v2328_v1, %v1840_v10  ;;  %v1828_v31 = vmul.f32 %v2818_v51, %v3608_v18  ;;  %v2703_v18 = vld [vmem:[#allocation4] sm:$0xff]  }
 0x79a   : > { %v1855_v49 = vadd.f32 %v2328_v1, %v1841_v36  ;;  %2598 = vmatprep.subr.bf16.mxu0 %v2703_v18 }
 0x79b   : > { %v1860_v50 = vpack.c.bf16 %v1854_v22, %v1853_v62  ;;  %v1842_v3 = vmul.f32 %v2327_v14, %v1828_v31  ;;  %2599 = vmatpush3.bf16.msra.mxu0 %v2703_v18 }
 0x79c   : > { %v2820_v34 = vpop.eup %2819  ;;  %2600 = vmatprep.subr.bf16.mxu0 %v2704_v0 }
 0x79d   : > { %v2822_v43 = vpop.eup %2821  ;;  %2591 = vmatmul.mubr.bf16.vlgmr.msra.gmra.mrb[32].mxu1 %v1860_v50  ;;  %v1856_v19 = vadd.f32 %v2328_v1, %v1842_v3  ;;  %v1830_v63 = vmul.f32 %v2820_v34, %v3614_v33  ;;  %v2706_v33 = vld [vmem:[#allocation4 + $0x18] sm:$0xff]  }
 0x79e   : > { %v1829_v21 = vmul.f32 %v2822_v43, %v3620_v4  ;;  %v2707_v4 = vld [vmem:[#allocation4 + $0x20] sm:$0xff]  }
 0x79f   : > { %v1861_v35 = vpack.c.bf16 %v1856_v19, %v1855_v49  ;;  %v1844_v6 = vmul.f32 %v2327_v14, %v1830_v63  ;;  %2601 = vmatpush3.bf16.msra.mxu0 %v2704_v0 }
 0x7a0   : > { %v1843_v37 = vmul.f32 %v2327_v14, %v1829_v21  ;;  %2602 = vmatprep.subr.bf16.mxu0 %v2705_v56 }
 0x7a1   : > { %2594 = vmatprep.mubr.bf16.mxu1 %v1861_v35  ;;  %v1858_v11 = vadd.f32 %v2328_v1, %v1844_v6 }
 0x7a2   : > { %v1857_v38 = vadd.f32 %v2328_v1, %v1843_v37 }
 0x7a3   : > { %2603 = vmatpush3.bf16.msra.mxu0 %v2705_v56 }
 0x7a4   : > { %v1862_v45 = vpack.c.bf16 %v1858_v11, %v1857_v38  ;;  %2604 = vmatprep.subr.bf16.mxu0 %v2706_v33 }
 0x7a6   : > { %2595 = vmatmul.mubr.bf16.gmra.mrb[36].mxu1 %v1862_v45 }
 0x7a7   : > { %2605 = vmatpush3.bf16.msra.mxu0 %v2706_v33 }
 0x7a8   : > { %2606 = vmatprep.subr.bf16.mxu0 %v2707_v4 }
 0x7ab   : > { %2607 = vmatpush3.bf16.msra.mxu0 %v2707_v4 }
 0x7ac   : > { %2608 = vmatprep.subr.bf16.mxu0 %v2708_v8 }
 0x7af   : > { %2609 = vmatpush3.bf16.msra.mxu0 %v2708_v8 }
 0x7b0   : > { %2610 = vmatprep.subr.bf16.mxu0 %v2709_v61 }
 0x7b3   : > { %2611 = vmatpush3.bf16.msra.mxu0 %v2709_v61 }
 0x7b4   : > { %2612 = vmatprep.subr.bf16.mxu0 %v2710_v7 }
 0x7b7   : > { %2613 = vmatpush3.bf16.msra.mxu0 %v2710_v7 }
 0x870   : > { %v2592_v9 = vpop.f32.mrb[32].mxu1 }
 0x871   : > { %v3664_v12 = vadd.f32 %v2592_v9, %v2329_v57  ;;  %v1951_v58 = vpop.f32.mrb[33].mxu1 }
 0x872   : > { %v3666_v15 = vadd.f32 %v2329_v57, %v1951_v58  ;;  %v2593_v48 = vpop.f32.mrb[34].mxu1 }
 0x873   : > { %v1984_v13 = vmul.f32 %v3664_v12, %v3664_v12  ;;  %v3670_v39 = vadd.f32 %v2593_v48, %v2329_v57  ;;  %v1954_v44 = vpop.f32.mrb[35].mxu1 }
 0x874   : > { %v1982_v14 = vmul.f32 %v3666_v15, %v3666_v15  ;;  %v3674_v30 = vadd.f32 %v2329_v57, %v1954_v44 }
 0x875   : > { %v1992_v27 = vmul.f32 %v1984_v13, %v3664_v12  ;;  %v1985_v28 = vmul.f32 %v3670_v39, %v3670_v39 }
 0x876   : > { %v1990_v46 = vmul.f32 %v1982_v14, %v3666_v15  ;;  %v1983_v20 = vmul.f32 %v3674_v30, %v3674_v30 }
 0x877   : > { %v2000_v26 = vmul.f32 0.044715, %v1992_v27  ;;  %v1993_v23 = vmul.f32 %v1985_v28, %v3670_v39 }
 0x878   : > { %v1998_v24 = vmul.f32 0.044715, %v1990_v46  ;;  %v1991_v1 = vmul.f32 %v1983_v20, %v3674_v30 }
 0x879   : > { %v2008_v25 = vadd.f32 %v2000_v26, %v3664_v12  ;;  %v2001_v17 = vmul.f32 0.044715, %v1993_v23  ;;  %v2596_v16 = vpop.f32.mrb[36].mxu1 }
 0x87a   : > { %v2006_v32 = vadd.f32 %v1998_v24, %v3666_v15  ;;  %v1999_v54 = vmul.f32 0.044715, %v1991_v1  ;;  %v3686_v59 = vadd.f32 %v2596_v16, %v2329_v57  ;;  %v1967_v29 = vpop.f32.mrb[37].mxu1 }
 0x87b   : > { %v2016_v52 = vmul.f32 0.7978846, %v2008_v25  ;;  %v2009_v10 = vadd.f32 %v2001_v17, %v3670_v39  ;;  %v3689_v53 = vadd.f32 %v2329_v57, %v1967_v29  ;;  %v2597_v51 = vpop.f32.mrb[38].mxu1 }
 0x87c   : > { %v2014_v62 = vmul.f32 0.7978846, %v2006_v32  ;;  %v2007_v22 = vadd.f32 %v1999_v54, %v3674_v30  ;;  %v1988_v31 = vmul.f32 %v3686_v59, %v3686_v59  ;;  %v3694_v36 = vadd.f32 %v2597_v51, %v2329_v57  ;;  %v1970_v50 = vpop.f32.mrb[39].mxu1 }
 0x87d   : > { %2823 = vtanh.f32 %v2016_v52  ;;  %v2017_v3 = vmul.f32 0.7978846, %v2009_v10  ;;  %v1986_v34 = vmul.f32 %v3689_v53, %v3689_v53  ;;  %v1971_v43 = vadd.f32 %v2329_v57, %v1970_v50 }
 0x87e   : > { %2825 = vtanh.f32 %v2014_v62  ;;  %v2015_v49 = vmul.f32 0.7978846, %v2007_v22  ;;  %v1996_v19 = vmul.f32 %v1988_v31, %v3686_v59  ;;  %v1989_v63 = vmul.f32 %v3694_v36, %v3694_v36 }
 0x87f   : > { %2827 = vtanh.f32 %v2017_v3  ;;  %v1994_v21 = vmul.f32 %v1986_v34, %v3689_v53  ;;  %v1987_v35 = vmul.f32 %v1971_v43, %v1971_v43 }
 0x880   : > { %2829 = vtanh.f32 %v2015_v49  ;;  %v2004_v6 = vmul.f32 0.044715, %v1996_v19  ;;  %v1997_v37 = vmul.f32 %v1989_v63, %v3694_v36 }
 0x881   : > { %v2002_v11 = vmul.f32 0.044715, %v1994_v21  ;;  %v1995_v38 = vmul.f32 %v1987_v35, %v1971_v43  ;;  %v2338_v21 = vld [vmem:[%s3744_s13] ss:$0 sm:$0xff] }
 0x882   : > { %v2012_v45 = vadd.f32 %v2004_v6, %v3686_v59  ;;  %v2005_v18 = vmul.f32 0.044715, %v1997_v37 }
 0x883   : > { %v2010_v0 = vadd.f32 %v2002_v11, %v3689_v53  ;;  %v2003_v56 = vmul.f32 0.044715, %v1995_v38 }
 0x884   : > { %v2020_v33 = vmul.f32 0.7978846, %v2012_v45  ;;  %v2013_v4 = vadd.f32 %v2005_v18, %v3694_v36 }
 0x885   : > { %v2018_v8 = vmul.f32 0.7978846, %v2010_v0  ;;  %v2011_v61 = vadd.f32 %v2003_v56, %v1971_v43 }
 0x886   : > { %2831 = vtanh.f32 %v2020_v33  ;;  %v2021_v7 = vmul.f32 0.7978846, %v2013_v4 }
 0x887   : > { %v2824_v57 = vpop.eup %2823  ;;  %2833 = vtanh.f32 %v2018_v8  ;;  %v2019_v9 = vmul.f32 0.7978846, %v2011_v61 }
 0x888   : > { %v2826_v58 = vpop.eup %2825  ;;  %v2032_v48 = vadd.f32 1.0, %v2824_v57  ;;  %2835 = vtanh.f32 %v2021_v7 }
 0x889   : > { %v2828_v13 = vpop.eup %2827  ;;  %2837 = vtanh.f32 %v2019_v9  ;;  %v2030_v44 = vadd.f32 1.0, %v2826_v58 }
 0x88a   : > { %v2830_v14 = vpop.eup %2829  ;;  %v2040_v27 = vmul.f32 0.5, %v2032_v48  ;;  %v2033_v28 = vadd.f32 1.0, %v2828_v13 }
 0x88b   : > { %v2031_v46 = vadd.f32 1.0, %v2830_v14  ;;  %v2038_v20 = vmul.f32 0.5, %v2030_v44 }
 0x88c   : > { %v2041_v26 = vmul.f32 0.5, %v2033_v28  ;;  %v2048_v24 = vmul.f32 %v2040_v27, %v3664_v12 }
 0x88d   : > { %v2039_v23 = vmul.f32 0.5, %v2031_v46  ;;  %v2046_v25 = vmul.f32 %v2038_v20, %v3666_v15 }
 0x88e   : > { %v2049_v1 = vmul.f32 %v2041_v26, %v3670_v39 }
 0x88f   : > { %v2047_v17 = vmul.f32 %v2039_v23, %v3674_v30 }
 0x890   : > { %v2832_v16 = vpop.eup %2831  ;;  %v2055_v32 = vpack.c.bf16 %v2049_v1, %v2048_v24 }
 0x891   : > { %v2834_v54 = vpop.eup %2833  ;;  %v2054_v29 = vpack.c.bf16 %v2047_v17, %v2046_v25  ;;  %v2036_v52 = vadd.f32 1.0, %v2832_v16 }
 0x892   : > { %v2836_v10 = vpop.eup %2835  ;;  %v2034_v51 = vadd.f32 1.0, %v2834_v54 }
 0x893   : > { %v2838_v62 = vpop.eup %2837  ;;  %2614 = vmatprep.mubr.bf16.mxu0 %v2054_v29  ;;  %v2037_v22 = vadd.f32 1.0, %v2836_v10  ;;  %v2044_v31 = vmul.f32 0.5, %v2036_v52 }
 0x894   : > { %2615 = vmatmul.mubr.bf16.vlgmr.msra.gmra.mrb[32].mxu0 %v2055_v32  ;;  %v2035_v12 = vadd.f32 1.0, %v2838_v62  ;;  %v2042_v50 = vmul.f32 0.5, %v2034_v51 }
 0x895   : > { %v2045_v39 = vmul.f32 0.5, %v2037_v22  ;;  %v2052_v15 = vmul.f32 %v2044_v31, %v3686_v59 }
 0x896   : > { %v2043_v3 = vmul.f32 0.5, %v2035_v12  ;;  %v2050_v34 = vmul.f32 %v2042_v50, %v3689_v53 }
 0x897   : > { %v2053_v30 = vmul.f32 %v2045_v39, %v3694_v36 }
 0x898   : > { %v2051_v49 = vmul.f32 %v2043_v3, %v1971_v43 }
 0x899   : > { %v2057_v19 = vpack.c.bf16 %v2053_v30, %v2052_v15 }
 0x89a   : > { %v2056_v63 = vpack.c.bf16 %v2051_v49, %v2050_v34 }
 0x89c   : > { %2618 = vmatprep.mubr.bf16.mxu0 %v2056_v63 }
 0x89d   : > { %2619 = vmatmul.mubr.bf16.gmra.mrb[36].mxu0 %v2057_v19 }
 0x967   : > { %v2616_v35 = vpop.f32.mrb[32].mxu0 }
 0x968   : > { %v2155_v6 = vadd.f32 %v2616_v35, %v2338_v21  ;;  %v2146_v37 = vpop.f32.mrb[33].mxu0 }
 0x969   : > { %v2147_v59 = vadd.f32 %v2338_v21, %v2146_v37  ;;  %v2617_v36 = vpop.f32.mrb[34].mxu0 }
 0x96a   : > { %v2179_v53 = vadd.f32 %v2155_v6, %v3544_v60  ;;  %v2158_v43 = vadd.f32 %v2617_v36, %v2338_v21  ;;  %v2149_v11 = vpop.f32.mrb[35].mxu0 }
 0x96b   : > { %v2177_v38 = vadd.f32 %v2147_v59, %v3548_v55  ;;  %v2150_v45 = vadd.f32 %v2338_v21, %v2149_v11 }
 0x96c   : > { %2187 = vst [vmem:[%s495_s23 + $0x10] sm:$0xff] %v2179_v53  ;;  %v2180_v18 = vadd.f32 %v2158_v43, %v3552_v40 }
 0x96d   : > { %2185 = vst [vmem:[%s495_s23] sm:$0xff] %v2177_v38  ;;  %v2178_v0 = vadd.f32 %v2150_v45, %v3559_v47 }
 0x96e   : > { %2188 = vst [vmem:[%s495_s23 + $0x18] sm:$0xff] %v2180_v18 }
 0x96f   : > { %2186 = vst [vmem:[%s495_s23 + $0x8] sm:$0xff] %v2178_v0 }
 0x970   : > { %v2620_v56 = vpop.f32.mrb[36].mxu0 }
 0x971   : > { %v2171_v33 = vadd.f32 %v2620_v56, %v2338_v21  ;;  %v2162_v4 = vpop.f32.mrb[37].mxu0 }
 0x972   : > { %v2163_v8 = vadd.f32 %v2338_v21, %v2162_v4  ;;  %v2621_v61 = vpop.f32.mrb[38].mxu0 }
 0x973   : > { %v2183_v60 = vadd.f32 %v2171_v33, %v3572_v5  ;;  %v2174_v7 = vadd.f32 %v2621_v61, %v2338_v21  ;;  %v2165_v57 = vpop.f32.mrb[39].mxu0 }
 0x974   : > { %v2181_v55 = vadd.f32 %v2163_v8, %v3564_v42  ;;  %v2166_v9 = vadd.f32 %v2338_v21, %v2165_v57 }
 0x975   : > { %2191 = vst [vmem:[%s495_s23 + $0x30] sm:$0xff] %v2183_v60  ;;  %v2184_v40 = vadd.f32 %v2174_v7, %v3555_v2 }
 0x976   : > { %2189 = vst [vmem:[%s495_s23 + $0x20] sm:$0xff] %v2181_v55  ;;  %v2182_v47 = vadd.f32 %v2166_v9, %v3568_v41 }
 0x977   : > { %2192 = vst [vmem:[%s495_s23 + $0x38] sm:$0xff] %v2184_v40 }
 0x978   : > { %2190 = vst [vmem:[%s495_s23 + $0x28] sm:$0xff] %v2182_v47 }
 0x979 PF: > { %s26_s29 = sadd.s32 1, %s2909_s29  }
 0x97a   : > { %p23_p5 = scmp.ge.s32.totalorder %s26_s29, 4  }
 0x97c   :  { %25 = sbr.rel (!%p23_p5) target bundleno = 2 (0x2), region = 115 }
 0x983   :  { %2214 = vsyncpa [#allocation3], 1 }
 0x984   :  { %2216 = vsyncpa [#allocation3 + $0x1], 1 }
 0x985   :  { %2217 = vsyncpa [#allocation5], 1 }

// kernel: enltb_forward.1
= control target key start
LH: loop header
LB: loop body
LE: loop exit
PB: predicated region body
PF: predicated region fallthrough
CT: control target
= control target key end

     0   :  { %19 = vsyncpa [#allocation3], 0  ;;  %s3731_s0 = inlined_call_operand.vmem [shape: bf16[2,64,128], index: 0, kind: input, shape index: {}]   ;;  %s3732_s1 = inlined_call_operand.vmem [shape: bf16[128,128], index: 1, kind: input, shape index: {}]   ;;  %s3733_s2 = inlined_call_operand.vmem [shape: f32[1,128], index: 2, kind: input, shape index: {}]   ;;  %s3734_s3 = inlined_call_operand.vmem [shape: bf16[128,256], index: 3, kind: input, shape index: {}]   ;;  %s3735_s4 = inlined_call_operand.vmem [shape: f32[1,256], index: 4, kind: input, shape index: {}]   ;;  %s3736_s5 = inlined_call_operand.vmem [shape: f32[1,128], index: 5, kind: input, shape index: {}]   ;;  %s3737_s6 = inlined_call_operand.hbm [shape: f32[1,128], index: 6, kind: input, shape index: {}]   ;;  %s3738_s7 = inlined_call_operand.vmem [shape: bf16[128,128], index: 7, kind: input, shape index: {}]   ;;  %s3739_s8 = inlined_call_operand.vmem [shape: f32[1,128], index: 8, kind: input, shape index: {}]   ;;  %s3740_s9 = inlined_call_operand.vmem [shape: f32[1,128], index: 9, kind: input, shape index: {}]   ;;  %s3741_s10 = inlined_call_operand.vmem [shape: bf16[128,128], index: 10, kind: input, shape index: {}]   ;;  %s3742_s11 = inlined_call_operand.vmem [shape: f32[1,128], index: 11, kind: input, shape index: {}]   ;;  %s3743_s12 = inlined_call_operand.hbm [shape: bf16[128,128], index: 12, kind: input, shape index: {}]   ;;  %s3744_s13 = inlined_call_operand.vmem [shape: f32[1,128], index: 13, kind: input, shape index: {}]   ;;  %s3745_s14 = inlined_call_operand.vmem [shape: f32[2,64,128], index: 14, kind: output, shape index: {}]  }
   0x1   :  { %20 = vsyncpa [#allocation5], 0  ;;  %s2992_s29 = smov 0  }
   0x2 LB: > { %s2998_s30 = sadd.s32 4294967295, %s2909_s29   ;;  %p2272_p0 = scmp.ge.s32.totalorder %s2909_s29, 1  ;;  %s2909_s29 = sphi %s2992_s29, %s26_s29  }
   0x3   : > { %p356_p1 = scmp.lt.s32.totalorder %s2909_s29, 3  ;;  %p3746_p2 = scmp.eq.s32.totalorder %s2998_s30, 0 }
   0x4   : > { %s2911_s15 = smov [#allocation2]   ;;  %s2912_s18 = smov [#allocation4]  }
   0x5   : > { %s384_s16 = sshll.u32 %s2911_s15, 4  ;;  %p3003_p3 = pnand %p2272_p0, %p356_p1  ;;  %s385_s16 = int_to_ptr.vmem [resolvable:$true] %s384_s16 }
   0x6   : > { %s409_s19 = sshll.u32 %s2912_s18, 4  ;;  %s2839_s23 = scalar_lea.hbm %s3737_s6, 16  ;;  %s3015_s19 = int_to_ptr.vmem [resolvable:$true] %s409_s19 }
   0x7   : > { %s3748_s17 = scalar_select %p3003_p3, 1, 0 }
   0x8   : > { %p2630_p4 = pneg %p3003_p3  ;;  %p2840_p6 = scmp.ne.s32.totalorder %s3737_s6, %s2839_s23 }
   0x9   : > { %p2846_p10 = scmp.lt.u32.totalorder %s2839_s23, %s3737_s6 }
   0xa   : > { %p3011_p5 = pnand %p3746_p2, %p2630_p4 }
   0xc   : > { %p2841_p7 = pneg %p3011_p5 }
   0xe   : > { %p2842_p8 = pnand %p2841_p7, %p2840_p6 }
  0x10   : > { %p2843_p9 = pneg %p2842_p8 }
  0x12   : > { %p2848_p11 = pnand %p2846_p10, %p2843_p9 }
  0x14   : > { %2851 = shalt.err (!%p2848_p11)
}
  0x15   : > { %s2852_s28 = scalar_lea.vmem %s385_s16, 16  ;;  %s2859_s15 = scalar_lea.vmem %s385_s16, 32 }
  0x16   : > { %p2853_p12 = scmp.ne.s32.totalorder %s385_s16, %s2852_s28  ;;  %p2860_p1 = scmp.lt.s32.totalorder %s385_s16, %s385_s16 }
  0x17   : > { %p2861_p4 = scmp.lt.s32.totalorder %s2859_s15, %s2852_s28 }
  0x18   : > { %p2855_p13 = pnand %p2853_p12, %p2841_p7 }
  0x19   : > { %p2862_p2 = por %p2861_p4, %p2860_p1 }
  0x1a   : > { %p2856_p0 = pneg %p2855_p13 }
  0x1c   : > { %p2863_p3 = pnand %p2862_p2, %p2856_p0 }
  0x1e   : > { %2866 = shalt.err (!%p2863_p3)
}
  0x1f   : > { %2633 = dma.hbm_to_vmem [thread:$0]  (!%p3011_p5), %s3737_s6, 16, %s385_s16, [#allocation3]  }
  0x20   : > { %s2867_s24 = scalar_lea.hbm %s3743_s12, 1024 }
  0x21   : > { %p2868_p6 = scmp.ne.s32.totalorder %s3743_s12, %s2867_s24  ;;  %p2874_p3 = scmp.lt.u32.totalorder %s2867_s24, %s3743_s12 }
  0x23   : > { %p2870_p8 = pnand %p2868_p6, %p2841_p7 }
  0x25   : > { %p2871_p2 = pneg %p2870_p8 }
  0x27   : > { %p2876_p9 = pnand %p2874_p3, %p2871_p2 }
  0x29   : > { %2879 = shalt.err (!%p2876_p9)
}
  0x2a   : > { %s2880_s16 = scalar_lea.vmem %s3015_s19, 1024  ;;  %p2888_p13 = scmp.lt.s32.totalorder %s3015_s19, %s3015_s19 }
  0x2b   : > { %p2881_p10 = scmp.ne.s32.totalorder %s3015_s19, %s2880_s16  ;;  %p2889_p0 = scmp.lt.s32.totalorder %s2880_s16, %s2880_s16 }
  0x2d   : > { %p2883_p11 = pnand %p2881_p10, %p2841_p7  ;;  %p2890_p1 = por %p2889_p0, %p2888_p13 }
  0x2f   : > { %p2884_p12 = pneg %p2883_p11 }
  0x31   : > { %p2891_p4 = pnand %p2890_p1, %p2884_p12 }
  0x33   : > { %2894 = shalt.err (!%p2891_p4)
}
  0x34   : > { %s2913_s15 = smov 64   ;;  %s2914_s18 = smov 4  }
  0x35   : > { %2636 = dma.hbm_to_vmem [thread:$0]  (!%p3011_p5), %s3743_s12, 1024, %s3015_s19, [#allocation5], %s2913_s15, %s2913_s15, %s2914_s18  }
  0x36   : > { %p3750_p6 = scmp.ne.s32.totalorder %s3748_s17, 0 }
  0x37   : > { %p3751_p7 = scmp.eq.s32.totalorder (!%p3750_p6), %s2998_s30, 0 }
  0x38   : > { %436 = sbr.rel (%p3750_p6) target bundleno = 2425 (0x979), region = 76 }
  0x3f   : > { %2900 = dma.done.wait (%p3751_p7), [#allocation3], 16   ;;  %p3752_p8 = pmov %p3751_p7 }
  0x40   : > { %p3753_p2 = pmov %p3751_p7 }
  0x41   : > { %2902 = vsyncadd (%p3752_p8), [#allocation3], 4294967280 }
  0x42   : > { %2904 = dma.done.wait (%p3753_p2), [#allocation5], 1024   ;;  %p3754_p3 = pmov %p3753_p2 }
  0x43   : > { %p486_p9 = scmp.lt.s32.totalorder %s2998_s30, 1  ;;  %v2655_v12 = vld [vmem:[%s3734_s3 + $0x4] ss:$8 sps:$4 sm:$0xff]   ;;  %v2657_v13 = vld [vmem:[%s3734_s3] ss:$8 sps:$4 sm:$0xff]   ;;  %v497_v15 = vlaneseq  ;;  %v2915_v21 = vmov 0.0  }
  0x44   : > { %2906 = vsyncadd (%p3754_p3), [#allocation5], 4294966272  ;;  %v2658_v14 = vld [vmem:[%s3734_s3 + $0x14] ss:$8 sps:$4 sm:$0xff]   ;;  %772 = vmatprep.subr.bf16.mxu0 %v2655_v12  ;;  %v2660_v59 = vld [vmem:[%s3734_s3 + $0x10] ss:$8 sps:$4 sm:$0xff]  }
  0x45   : > { %s3756_s30 = smov (!%p486_p9, %s2998_s30), 1  ;;  %773 = vmatpush1.bf16.msra.mxu0 %v2657_v13  ;;  %v498_v16 = vand.u32 127, %v497_v15  ;;  %v2661_v60 = vld [vmem:[%s3734_s3 + $0x24] ss:$8 sps:$4 sm:$0xff]   ;;  %v2663_v61 = vld [vmem:[%s3734_s3 + $0x20] ss:$8 sps:$4 sm:$0xff]  }
  0x46   : > { %s2349_s17 = sshll.u32 %s3756_s30, 5  ;;  %774 = vmatprep.subr.bf16.mxu0 %v2658_v14  ;;  %v2664_v62 = vld [vmem:[%s3734_s3 + $0x34] ss:$8 sps:$4 sm:$0xff]   ;;  %v2666_v63 = vld [vmem:[%s3734_s3 + $0x30] ss:$8 sps:$4 sm:$0xff]   ;;  %vm1127_vm1 = vcmask 523264  }
  0x47   : > { %s490_s23 = scalar_lea.vmem %s3731_s0, %s2349_s17  ;;  %vm499_vm0 = vcmp.lt.s32.totalorder %v498_v16, 32  ;;  %v2673_v12 = vld [vmem:[%s3734_s3 + $0x64] ss:$8 sps:$4 sm:$0xff]   ;;  %v2675_v13 = vld [vmem:[%s3734_s3 + $0x60] ss:$8 sps:$4 sm:$0xff]   ;;  %s2350_s17 = sshll.u32 %s3756_s30, 6 }
  0x48   : > { %v2352_v0 = vld [vmem:[%s490_s23] sm:$0xff]   ;;  %v2367_v1 = vld [vmem:[%s490_s23 + $0x8] sm:$0xff]   ;;  %v2368_v4 = vld [vmem:[%s490_s23 + $0x10] sm:$0xff]   ;;  %v3116_v22 = vsel %vm499_vm0, 1.0, %v2915_v21 }
  0x49   : > { %v3082_v2 = vunpack.c.l.bf16 %v2352_v0  ;;  %v3084_v3 = vunpack.c.l.bf16 %v2367_v1  ;;  %v3088_v5 = vunpack.c.h.bf16 %v2352_v0  ;;  %v3090_v6 = vunpack.c.h.bf16 %v2367_v1  ;;  %v2369_v7 = vld [vmem:[%s490_s23 + $0x18] sm:$0xff]   ;;  %775 = vmatpush1.bf16.msra.mxu0 %v2660_v59  ;;  %v2667_v0 = vld [vmem:[%s3734_s3 + $0x44] ss:$8 sps:$4 sm:$0xff]   ;;  %v2669_v1 = vld [vmem:[%s3734_s3 + $0x40] ss:$8 sps:$4 sm:$0xff]   ;;  %s495_s23 = scalar_lea.vmem %s3745_s14, %s2350_s17 }
  0x4a   : > { %v3094_v8 = vunpack.c.l.bf16 %v2368_v4  ;;  %v3096_v9 = vunpack.c.h.bf16 %v2368_v4  ;;  %v3100_v10 = vunpack.c.l.bf16 %v2369_v7  ;;  %v3102_v11 = vunpack.c.h.bf16 %v2369_v7  ;;  %776 = vmatprep.subr.bf16.mxu0 %v2661_v60  ;;  %v2670_v4 = vld [vmem:[%s3734_s3 + $0x54] ss:$8 sps:$4 sm:$0xff]   ;;  %v2672_v7 = vld [vmem:[%s3734_s3 + $0x50] ss:$8 sps:$4 sm:$0xff]  }
  0x4b   : > { %520 = vadd.xlane.f32.xlu0 %v3082_v2  ;;  %524 = vadd.xlane.f32.xlu1 %v3084_v3  ;;  %v2676_v14 = vld [vmem:[%s3734_s3 + $0x74] ss:$8 sps:$4 sm:$0xff]   ;;  %v2678_v16 = vld [vmem:[%s3734_s3 + $0x70] ss:$8 sps:$4 sm:$0xff]  }
  0x4c   : > { %v3228_v21 = vld [vmem:[%s3738_s7 + $0x10] sm:$0xff]  }
  0x4d   : > { %777 = vmatpush1.bf16.msra.mxu0 %v2663_v61 }
  0x4e   : > { %778 = vmatprep.subr.bf16.mxu0 %v2664_v62 }
  0x4f   : > { %522 = vadd.xlane.f32.xlu0 %v3088_v5  ;;  %526 = vadd.xlane.f32.xlu1 %v3090_v6 }
  0x51   : > { %779 = vmatpush1.bf16.msra.mxu0 %v2666_v63 }
  0x52   : > { %780 = vmatprep.subr.bf16.mxu0 %v2667_v0  ;;  %v2285_v0 = vld [vmem:[#allocation2] ss:$0 sm:$0xff] }
  0x53   : > { %528 = vadd.xlane.f32.xlu0 %v3094_v8  ;;  %530 = vadd.xlane.f32.xlu1 %v3096_v9 }
  0x55   : > { %781 = vmatpush1.bf16.msra.mxu0 %v2669_v1 }
  0x56   : > { %782 = vmatprep.subr.bf16.mxu0 %v2670_v4 }
  0x57   : > { %532 = vadd.xlane.f32.xlu0 %v3100_v10  ;;  %534 = vadd.xlane.f32.xlu1 %v3102_v11 }
  0x59   : > { %783 = vmatpush1.bf16.msra.mxu0 %v2672_v7 }
  0x5a   : > { %784 = vmatprep.subr.bf16.mxu0 %v2673_v12 }
  0x5d   : > { %785 = vmatpush1.bf16.msra.mxu0 %v2675_v13 }
  0x5e   : > { %786 = vmatprep.subr.bf16.mxu0 %v2676_v14 }
  0x61   : > { %787 = vmatpush1.bf16.msra.mxu0 %v2678_v16 }
  0xd8   : > { %v521_v17 = vpop.xlane.xlu0 %520  ;;  %v525_v18 = vpop.xlane.xlu1 %524 }
  0xd9   : > { %v536_v19 = vmul.f32 0.03125, %v521_v17  ;;  %v538_v20 = vmul.f32 0.03125, %v525_v18  ;;  %v2916_v17 = vmov 0   ;;  %v3209_v18 = vld [vmem:[%s3732_s1] sm:$0xff]  }
  0xda   : > { %804 = vmatprep.mubr.bf16.mxu0 %v2916_v17  ;;  %2502 = vmatprep.subr.bf16.mxu0 %v3209_v18 }
  0xdb   : > { %v544_v23 = vsub.f32 %v3082_v2, %v536_v19  ;;  %v546_v24 = vsub.f32 %v3084_v3, %v538_v20  ;;  %v3215_v19 = vld [vmem:[%s3738_s7] sm:$0xff]   ;;  %v3220_v20 = vld [vmem:[%s3738_s7 + $0x8] sm:$0xff]  }
  0xdc   : > { %v523_v25 = vpop.xlane.xlu0 %522  ;;  %v527_v26 = vpop.xlane.xlu1 %526  ;;  %2454 = vmatprep.subr.bf16.mxu1 %v3215_v19 }
  0xdd   : > { %v537_v27 = vmul.f32 0.03125, %v523_v25  ;;  %v539_v28 = vmul.f32 0.03125, %v527_v26  ;;  %v3121_v29 = vmul.f32 %v3116_v22, %v544_v23  ;;  %v3124_v30 = vmul.f32 %v3116_v22, %v546_v24  ;;  %2455 = vmatpush3.bf16.msra.mxu1 %v3215_v19  ;;  %v3235_v23 = vld [vmem:[%s3738_s7 + $0x18] sm:$0xff]   ;;  %v3242_v24 = vld [vmem:[%s3738_s7 + $0x20] sm:$0xff]   ;;  %v3249_v25 = vld [vmem:[%s3738_s7 + $0x28] sm:$0xff]  }
  0xde   : > { %2456 = vmatprep.subr.bf16.mxu1 %v3220_v20 }
  0xdf   : > { %v545_v31 = vsub.f32 %v3088_v5, %v537_v27  ;;  %v547_v32 = vsub.f32 %v3090_v6, %v539_v28  ;;  %v560_v33 = vmul.f32 %v3121_v29, %v3121_v29  ;;  %v562_v36 = vmul.f32 %v3124_v30, %v3124_v30 }
  0xe0   : > { %v529_v34 = vpop.xlane.xlu0 %528  ;;  %v531_v35 = vpop.xlane.xlu1 %530 }
  0xe1   : > { %v540_v37 = vmul.f32 0.03125, %v529_v34  ;;  %568 = vadd.xlane.f32.xlu0 %v560_v33  ;;  %v541_v38 = vmul.f32 0.03125, %v531_v35  ;;  %v3133_v39 = vmul.f32 %v3116_v22, %v545_v31  ;;  %v3136_v40 = vmul.f32 %v3116_v22, %v547_v32  ;;  %2457 = vmatpush3.bf16.msra.mxu1 %v3220_v20 }
  0xe2   : > { %2458 = vmatprep.subr.bf16.mxu1 %v3228_v21 }
  0xe3   : > { %v548_v41 = vsub.f32 %v3094_v8, %v540_v37  ;;  %v549_v42 = vsub.f32 %v3096_v9, %v541_v38  ;;  %v561_v43 = vmul.f32 %v3133_v39, %v3133_v39  ;;  %v563_v46 = vmul.f32 %v3136_v40, %v3136_v40 }
  0xe4   : > { %v533_v44 = vpop.xlane.xlu0 %532  ;;  %v535_v45 = vpop.xlane.xlu1 %534 }
  0xe5   : > { %v542_v47 = vmul.f32 0.03125, %v533_v44  ;;  %572 = vadd.xlane.f32.xlu0 %v562_v36  ;;  %570 = vadd.xlane.f32.xlu1 %v561_v43  ;;  %v543_v48 = vmul.f32 0.03125, %v535_v45  ;;  %v3145_v49 = vmul.f32 %v3116_v22, %v548_v41  ;;  %v3148_v50 = vmul.f32 %v3116_v22, %v549_v42 }
  0xe6   : > { %2459 = vmatpush3.bf16.msra.mxu1 %v3228_v21 }
  0xe7   : > { %v550_v51 = vsub.f32 %v3100_v10, %v542_v47  ;;  %v551_v52 = vsub.f32 %v3102_v11, %v543_v48  ;;  %v564_v53 = vmul.f32 %v3145_v49, %v3145_v49  ;;  %v565_v54 = vmul.f32 %v3148_v50, %v3148_v50  ;;  %2460 = vmatprep.subr.bf16.mxu1 %v3235_v23 }
  0xe9   : > { %574 = vadd.xlane.f32.xlu1 %v563_v46  ;;  %576 = vadd.xlane.f32.xlu0 %v564_v53  ;;  %v3157_v55 = vmul.f32 %v3116_v22, %v550_v51  ;;  %v3160_v56 = vmul.f32 %v3116_v22, %v551_v52 }
  0xea   : > { %2461 = vmatpush3.bf16.msra.mxu1 %v3235_v23 }
  0xeb   : > { %v566_v57 = vmul.f32 %v3157_v55, %v3157_v55  ;;  %v567_v58 = vmul.f32 %v3160_v56, %v3160_v56  ;;  %2462 = vmatprep.subr.bf16.mxu1 %v3242_v24 }
  0xed   : > { %578 = vadd.xlane.f32.xlu1 %v565_v54  ;;  %580 = vadd.xlane.f32.xlu0 %v566_v57  ;;  %v2284_v57 = vld [vmem:[%s3736_s5] ss:$0 sm:$0xff] }
  0xee   : > { %2463 = vmatpush3.bf16.msra.mxu1 %v3242_v24 }
  0xef   : > { %2464 = vmatprep.subr.bf16.mxu1 %v3249_v25 }
  0xf1   : > { %582 = vadd.xlane.f32.xlu1 %v567_v58 }
  0xf2   : > { %2465 = vmatpush3.bf16.msra.mxu1 %v3249_v25 }
 0x16e   : > { %v569_v26 = vpop.xlane.xlu0 %568 }
 0x16f   : > { %v584_v27 = vmul.f32 0.03125, %v569_v26  ;;  %v2680_v26 = vld [vmem:[%s3732_s1 + $0x8] sm:$0xff]  }
 0x171   : > { %v592_v28 = vadd.f32 1e-05, %v584_v27 }
 0x172   : > { %v571_v31 = vpop.xlane.xlu1 %570  ;;  %v573_v32 = vpop.xlane.xlu0 %572 }
 0x173   : > { %2711 = vrsqrt.f32 %v592_v28  ;;  %v585_v33 = vmul.f32 0.03125, %v571_v31  ;;  %v586_v34 = vmul.f32 0.03125, %v573_v32 }
 0x175   : > { %v593_v35 = vadd.f32 1e-05, %v585_v33  ;;  %v594_v36 = vadd.f32 1e-05, %v586_v34 }
 0x176   : > { %v575_v37 = vpop.xlane.xlu1 %574  ;;  %v577_v38 = vpop.xlane.xlu0 %576 }
 0x177   : > { %2713 = vrsqrt.f32 %v593_v35  ;;  %v587_v41 = vmul.f32 0.03125, %v575_v37  ;;  %v588_v43 = vmul.f32 0.03125, %v577_v38 }
 0x178   : > { %2715 = vrsqrt.f32 %v594_v36 }
 0x179   : > { %v595_v42 = vadd.f32 1e-05, %v587_v41  ;;  %v596_v47 = vadd.f32 1e-05, %v588_v43 }
 0x17a   : > { %v579_v44 = vpop.xlane.xlu1 %578  ;;  %v581_v51 = vpop.xlane.xlu0 %580 }
 0x17b   : > { %2717 = vrsqrt.f32 %v595_v42  ;;  %v589_v45 = vmul.f32 0.03125, %v579_v44  ;;  %v590_v59 = vmul.f32 0.03125, %v581_v51 }
 0x17d   : > { %v2712_v46 = vpop.eup %2711  ;;  %v597_v48 = vadd.f32 1e-05, %v589_v45  ;;  %v598_v7 = vadd.f32 1e-05, %v590_v59  ;;  %v660_v59 = vld [vmem:[%s3735_s4] sm:$0x3] }
 0x17e   : > { %v583_v52 = vpop.xlane.xlu1 %582  ;;  %v608_v53 = vmul.f32 %v2712_v46, %v3121_v29  ;;  %v2684_v46 = vld [vmem:[%s3732_s1 + $0x28] sm:$0xff]  }
 0x17f   : > { %2719 = vrsqrt.f32 %v597_v48  ;;  %v591_v54 = vmul.f32 0.03125, %v583_v52 }
 0x180   : > { %2721 = vrsqrt.f32 %v596_v47  ;;  %v622_v61 = vmul.f32 %v2284_v57, %v608_v53  ;;  %v2686_v53 = vld [vmem:[%s3732_s1 + $0x38] sm:$0xff]  }
 0x181   : > { %v2714_v58 = vpop.eup %2713  ;;  %v599_v63 = vadd.f32 1e-05, %v591_v54  ;;  %v3300_v54 = vld [vmem:[%s3738_s7 + $0x38] sm:$0xff]  }
 0x182   : > { %v609_v60 = vmul.f32 %v2714_v58, %v3133_v39  ;;  %v2716_v62 = vpop.eup %2715  ;;  %v636_v12 = vadd.f32 %v2285_v0, %v622_v61 }
 0x183   : > { %v610_v13 = vmul.f32 %v2716_v62, %v3124_v30  ;;  %2723 = vrsqrt.f32 %v599_v63 }
 0x184   : > { %v623_v1 = vmul.f32 %v2284_v57, %v609_v60  ;;  %2725 = vrsqrt.f32 %v598_v7 }
 0x185   : > { %v2718_v4 = vpop.eup %2717  ;;  %v624_v28 = vmul.f32 %v2284_v57, %v610_v13 }
 0x186   : > { %v637_v29 = vadd.f32 %v2285_v0, %v623_v1  ;;  %v611_v14 = vmul.f32 %v2718_v4, %v3136_v40  ;;  %v2681_v40 = vld [vmem:[%s3732_s1 + $0x10] sm:$0xff]  }
 0x187   : > { %v638_v33 = vadd.f32 %v2285_v0, %v624_v28 }
 0x188   : > { %v677_v16 = vpack.c.bf16 %v637_v29, %v636_v12  ;;  %v625_v39 = vmul.f32 %v2284_v57, %v611_v14 }
 0x189   : > { %v2720_v27 = vpop.eup %2719 }
 0x18a   : > { %805 = vmatmul.mubr.bf16.vlgmr.msra.gmra.mrb[0].mxu0 %v677_v16  ;;  %v2722_v31 = vpop.eup %2721  ;;  %v639_v30 = vadd.f32 %v2285_v0, %v625_v39  ;;  %v613_v32 = vmul.f32 %v2720_v27, %v3148_v50 }
 0x18b   : > { %2503 = vmatpush3.bf16.msra.mxu0 %v3209_v18  ;;  %814 = vmatprep.mubr.bf16.mxu0 %v2916_v17  ;;  %v612_v34 = vmul.f32 %v2722_v31, %v3145_v49  ;;  %v2682_v18 = vld [vmem:[%s3732_s1 + $0x18] sm:$0xff]   ;;  %v2683_v49 = vld [vmem:[%s3732_s1 + $0x20] sm:$0xff]  }
 0x18c   : > { %2504 = vmatprep.subr.bf16.mxu0 %v2680_v26  ;;  %v678_v35 = vpack.c.bf16 %v639_v30, %v638_v33  ;;  %v627_v36 = vmul.f32 %v2284_v57, %v613_v32 }
 0x18d   : > { %v2724_v37 = vpop.eup %2723  ;;  %v626_v38 = vmul.f32 %v2284_v57, %v612_v34 }
 0x18e   : > { %v2726_v41 = vpop.eup %2725  ;;  %v641_v50 = vadd.f32 %v2285_v0, %v627_v36  ;;  %v615_v42 = vmul.f32 %v2724_v37, %v3160_v56  ;;  %v2685_v56 = vld [vmem:[%s3732_s1 + $0x30] sm:$0xff]  }
 0x18f   : > { %2505 = vmatpush3.bf16.msra.mxu0 %v2680_v26  ;;  %v640_v43 = vadd.f32 %v2285_v0, %v626_v38  ;;  %v614_v44 = vmul.f32 %v2726_v41, %v3157_v55 }
 0x190   : > { %2506 = vmatprep.subr.bf16.mxu0 %v2681_v40  ;;  %v629_v47 = vmul.f32 %v2284_v57, %v615_v42 }
 0x191   : > { %v679_v45 = vpack.c.bf16 %v641_v50, %v640_v43  ;;  %v628_v48 = vmul.f32 %v2284_v57, %v614_v44  ;;  %v683_v57 = vshrl.u32 %v497_v15, 7 }
 0x192   : > { %815 = vmatmul.mubr.bf16.gmra.mrb[4].mxu0 %v678_v35  ;;  %v643_v51 = vadd.f32 %v2285_v0, %v629_v47 }
 0x193   : > { %2507 = vmatpush3.bf16.msra.mxu0 %v2681_v40  ;;  %824 = vmatprep.mubr.bf16.mxu0 %v2916_v17  ;;  %v642_v55 = vadd.f32 %v2285_v0, %v628_v48  ;;  %v684_v58 = vsub.s32 0, %v683_v57  ;;  %v688_v60 = vsub.s32 1, %v683_v57 }
 0x194   : > { %2508 = vmatprep.subr.bf16.mxu0 %v2682_v18 }
 0x195   : > { %v680_v52 = vpack.c.bf16 %v643_v51, %v642_v55  ;;  %v685_v61 = vrot.slane %v660_v59, %v684_v58  ;;  %v689_v63 = vrot.slane %v660_v59, %v688_v60 }
 0x197   : > { %2509 = vmatpush3.bf16.msra.mxu0 %v2682_v18 }
 0x198   : > { %2510 = vmatprep.subr.bf16.mxu0 %v2683_v49 }
 0x19a   : > { %825 = vmatmul.mubr.bf16.gmra.mrb[8].mxu0 %v679_v45 }
 0x19b   : > { %2511 = vmatpush3.bf16.msra.mxu0 %v2683_v49  ;;  %834 = vmatprep.mubr.bf16.mxu0 %v2916_v17  ;;  %v3293_v17 = vld [vmem:[%s3738_s7 + $0x30] sm:$0xff]  }
 0x19c   : > { %2512 = vmatprep.subr.bf16.mxu0 %v2684_v46  ;;  %2466 = vmatprep.subr.bf16.mxu1 %v3293_v17 }
 0x19d   : > { %2467 = vmatpush3.bf16.msra.mxu1 %v3293_v17 }
 0x19e   : > { %2468 = vmatprep.subr.bf16.mxu1 %v3300_v54 }
 0x19f   : > { %2513 = vmatpush3.bf16.msra.mxu0 %v2684_v46 }
 0x1a0   : > { %2514 = vmatprep.subr.bf16.mxu0 %v2685_v56 }
 0x1a1   : > { %2469 = vmatpush3.bf16.msra.mxu1 %v3300_v54 }
 0x1a2   : > { %835 = vmatmul.mubr.bf16.gmra.mrb[12].mxu0 %v680_v52 }
 0x1a3   : > { %2515 = vmatpush3.bf16.msra.mxu0 %v2685_v56  ;;  %2518 = vmatprep.mubr.bf16.mxu0 %v677_v16 }
 0x1a4   : > { %2516 = vmatprep.subr.bf16.mxu0 %v2686_v53 }
 0x1a7   : > { %2517 = vmatpush3.bf16.msra.mxu0 %v2686_v53 }
 0x1aa   : > { %2519 = vmatmul.mubr.bf16.vlgmr.msra.gmra.mrb[16].mxu0 %v678_v35 }
 0x1ab   : > { %2522 = vmatprep.mubr.bf16.mxu0 %v679_v45 }
 0x1b2   : > { %2523 = vmatmul.mubr.bf16.gmra.mrb[20].mxu0 %v680_v52 }
 0x25d   : > { %v806_v62 = vpop.f32.mrb[0].mxu0 }
 0x25e   : > { %v3308_v0 = vadd.f32 %v806_v62, %v685_v61  ;;  %v808_v1 = vpop.f32.mrb[1].mxu0 }
 0x25f   : > { %v810_v4 = vpop.f32.mrb[2].mxu0  ;;  %v809_v15 = vadd.f32 %v808_v1, %v689_v63 }
 0x260   : > { %v3310_v7 = vadd.f32 %v810_v4, %v685_v61  ;;  %v812_v12 = vpop.f32.mrb[3].mxu0  ;;  %v845_v29 = vmul.f32 %v3308_v0, %v3308_v0 }
 0x261   : > { %v813_v13 = vadd.f32 %v812_v12, %v689_v63 }
 0x262   : > { %853 = vadd.xlane.f32.xlu0 %v845_v29  ;;  %v846_v14 = vmul.f32 %v3310_v7, %v3310_v7 }
 0x263   : > { %v3316_v16 = vpack.c.bf16 %v813_v13, %v809_v15 }
 0x264   : > { %855 = vadd.xlane.f32.xlu1 %v846_v14 }
 0x265   : > { %v816_v26 = vpop.f32.mrb[4].mxu0  ;;  %2478 = vmatprep.subr.bf16.mxu1 %v3316_v16 }
 0x266   : > { %v3319_v39 = vadd.f32 %v816_v26, %v685_v61  ;;  %v818_v27 = vpop.f32.mrb[5].mxu0 }
 0x267   : > { %v819_v28 = vadd.f32 %v818_v27, %v689_v63  ;;  %v820_v31 = vpop.f32.mrb[6].mxu0 }
 0x268   : > { %v3321_v30 = vadd.f32 %v820_v31, %v685_v61  ;;  %v822_v40 = vpop.f32.mrb[7].mxu0  ;;  %v847_v32 = vmul.f32 %v3319_v39, %v3319_v39 }
 0x269   : > { %v823_v33 = vadd.f32 %v822_v40, %v689_v63 }
 0x26a   : > { %857 = vadd.xlane.f32.xlu0 %v847_v32  ;;  %v848_v34 = vmul.f32 %v3321_v30, %v3321_v30 }
 0x26b   : > { %v3327_v35 = vpack.c.bf16 %v823_v33, %v819_v28 }
 0x26c   : > { %859 = vadd.xlane.f32.xlu1 %v848_v34 }
 0x26d   : > { %v826_v18 = vpop.f32.mrb[8].mxu0 }
 0x26e   : > { %v3329_v36 = vadd.f32 %v826_v18, %v685_v61  ;;  %v828_v37 = vpop.f32.mrb[9].mxu0 }
 0x26f   : > { %v829_v38 = vadd.f32 %v828_v37, %v689_v63  ;;  %v830_v41 = vpop.f32.mrb[10].mxu0 }
 0x270   : > { %v3331_v50 = vadd.f32 %v830_v41, %v685_v61  ;;  %v832_v49 = vpop.f32.mrb[11].mxu0  ;;  %v849_v42 = vmul.f32 %v3329_v36, %v3329_v36 }
 0x271   : > { %v833_v43 = vadd.f32 %v832_v49, %v689_v63 }
 0x272   : > { %861 = vadd.xlane.f32.xlu0 %v849_v42  ;;  %v850_v44 = vmul.f32 %v3331_v50, %v3331_v50 }
 0x273   : > { %v3337_v45 = vpack.c.bf16 %v833_v43, %v829_v38 }
 0x274   : > { %863 = vadd.xlane.f32.xlu1 %v850_v44 }
 0x275   : > { %v836_v46 = vpop.f32.mrb[12].mxu0 }
 0x276   : > { %v3339_v47 = vadd.f32 %v836_v46, %v685_v61  ;;  %v838_v48 = vpop.f32.mrb[13].mxu0 }
 0x277   : > { %v839_v51 = vadd.f32 %v838_v48, %v689_v63  ;;  %v840_v56 = vpop.f32.mrb[14].mxu0 }
 0x278   : > { %v3341_v55 = vadd.f32 %v840_v56, %v685_v61  ;;  %v842_v52 = vpop.f32.mrb[15].mxu0  ;;  %v851_v53 = vmul.f32 %v3339_v47, %v3339_v47 }
 0x279   : > { %v843_v57 = vadd.f32 %v842_v52, %v689_v63 }
 0x27a   : > { %865 = vadd.xlane.f32.xlu0 %v851_v53  ;;  %v852_v58 = vmul.f32 %v3341_v55, %v3341_v55 }
 0x27b   : > { %v3347_v59 = vpack.c.bf16 %v843_v57, %v839_v51 }
 0x27c   : > { %867 = vadd.xlane.f32.xlu1 %v852_v58 }
 0x27d   : > { %v3349_v60 = vpop.f32.mrb[16].mxu0 }
 0x27e   : > { %v3351_v62 = vpop.f32.mrb[17].mxu0 }
 0x27f   : > { %v3353_v1 = vpop.f32.mrb[18].mxu0 }
 0x280   : > { %v3355_v61 = vpop.f32.mrb[19].mxu0 }
 0x285   : > { %v3357_v4 = vpop.f32.mrb[20].mxu0 }
 0x286   : > { %v3359_v12 = vpop.f32.mrb[21].mxu0 }
 0x287   : > { %v3361_v63 = vpop.f32.mrb[22].mxu0 }
 0x288   : > { %v3363_v29 = vpop.f32.mrb[23].mxu0 }
 0x2ef   : > { %v854_v15 = vpop.xlane.xlu0 %853 }
 0x2f0   : > { %v869_v13 = vmax.f32 %v854_v15, 2.5e-09 }
 0x2f1   : > { %v856_v14 = vpop.xlane.xlu1 %855 }
 0x2f2   : > { %2727 = vrsqrt.f32 %v869_v13  ;;  %v870_v26 = vmax.f32 %v856_v14, 2.5e-09 }
 0x2f4   : > { %2729 = vrsqrt.f32 %v870_v26 }
 0x2f7   : > { %v858_v27 = vpop.xlane.xlu0 %857 }
 0x2f8   : > { %v871_v28 = vmax.f32 %v858_v27, 2.5e-09 }
 0x2f9   : > { %v860_v31 = vpop.xlane.xlu1 %859 }
 0x2fa   : > { %2731 = vrsqrt.f32 %v871_v28  ;;  %v872_v40 = vmax.f32 %v860_v31, 2.5e-09 }
 0x2fc   : > { %v2728_v32 = vpop.eup %2727  ;;  %2733 = vrsqrt.f32 %v872_v40 }
 0x2fd   : > { %v885_v33 = vmul.f32 %v2728_v32, %v3308_v0 }
 0x2fe   : > { %v2730_v34 = vpop.eup %2729 }
 0x2ff   : > { %v862_v18 = vpop.xlane.xlu0 %861  ;;  %v1010_v37 = vmul.f32 %v885_v33, %v885_v33  ;;  %v886_v38 = vmul.f32 %v2730_v34, %v3310_v7 }
 0x300   : > { %v873_v41 = vmax.f32 %v862_v18, 2.5e-09 }
 0x301   : > { %v864_v49 = vpop.xlane.xlu1 %863  ;;  %1018 = vadd.xlane.f32.xlu0 %v1010_v37  ;;  %v1011_v42 = vmul.f32 %v886_v38, %v886_v38  ;;  %v893_v43 = vpack.c.bf16 %v886_v38, %v885_v33 }
 0x302   : > { %2735 = vrsqrt.f32 %v873_v41  ;;  %v874_v44 = vmax.f32 %v864_v49, 2.5e-09 }
 0x303   : > { %1020 = vadd.xlane.f32.xlu1 %v1011_v42  ;;  %2470 = vmatprep.mubr.bf16.mxu1 %v893_v43 }
 0x304   : > { %v2732_v46 = vpop.eup %2731  ;;  %2737 = vrsqrt.f32 %v874_v44 }
 0x305   : > { %v887_v48 = vmul.f32 %v2732_v46, %v3319_v39 }
 0x306   : > { %v2734_v51 = vpop.eup %2733 }
 0x307   : > { %v866_v0 = vpop.xlane.xlu0 %865  ;;  %v1012_v56 = vmul.f32 %v887_v48, %v887_v48  ;;  %v888_v52 = vmul.f32 %v2734_v51, %v3321_v30 }
 0x308   : > { %v875_v53 = vmax.f32 %v866_v0, 2.5e-09 }
 0x309   : > { %v868_v7 = vpop.xlane.xlu1 %867  ;;  %1022 = vadd.xlane.f32.xlu0 %v1012_v56  ;;  %v1013_v57 = vmul.f32 %v888_v52, %v888_v52  ;;  %v894_v58 = vpack.c.bf16 %v888_v52, %v887_v48 }
 0x30a   : > { %2739 = vrsqrt.f32 %v875_v53  ;;  %v876_v15 = vmax.f32 %v868_v7, 2.5e-09 }
 0x30b   : > { %1024 = vadd.xlane.f32.xlu1 %v1013_v57  ;;  %2471 = vmatmul.mubr.bf16.vlgmr.msra.gmra.mrb[0].mxu1 %v894_v58 }
 0x30c   : > { %v2736_v13 = vpop.eup %2735  ;;  %2741 = vrsqrt.f32 %v876_v15  ;;  %2479 = vmatpush3.bf16.msra.mxu1 %v3316_v16  ;;  %v2318_v16 = vld [vmem:[%s3733_s2] ss:$0 sm:$0xff] }
 0x30d   : > { %2480 = vmatprep.subr.bf16.mxu1 %v3327_v35  ;;  %v889_v39 = vmul.f32 %v2736_v13, %v3329_v36  ;;  %v3387_v33 = vadd.f32 %v2318_v16, %v3355_v61  ;;  %v3406_v61 = vadd.f32 %v2318_v16, %v3363_v29 }
 0x30e   : > { %v2738_v14 = vpop.eup %2737 }
 0x30f   : > { %v1014_v26 = vmul.f32 %v889_v39, %v889_v39  ;;  %v890_v30 = vmul.f32 %v2738_v14, %v3331_v50  ;;  %v1426_v41 = vmul.f32 %v3406_v61, %v3406_v61 }
 0x310   : > { %2481 = vmatpush3.bf16.msra.mxu1 %v3327_v35  ;;  %v3382_v35 = vadd.f32 %v2318_v16, %v3351_v62  ;;  %v3401_v62 = vadd.f32 %v2318_v16, %v3359_v12  ;;  %v3416_v12 = vadd.f32 %v3361_v63, %v2318_v16 }
 0x311   : > { %2482 = vmatprep.subr.bf16.mxu1 %v3337_v45  ;;  %1026 = vadd.xlane.f32.xlu0 %v1014_v26  ;;  %v1015_v27 = vmul.f32 %v890_v30, %v890_v30  ;;  %v895_v28 = vpack.c.bf16 %v890_v30, %v889_v39 }
 0x312   : > { %v1425_v38 = vmul.f32 %v3401_v62, %v3401_v62 }
 0x313   : > { %1028 = vadd.xlane.f32.xlu1 %v1015_v27  ;;  %2474 = vmatprep.mubr.bf16.mxu1 %v895_v28 }
 0x314   : > { %v2740_v31 = vpop.eup %2739  ;;  %2483 = vmatpush3.bf16.msra.mxu1 %v3337_v45  ;;  %v3391_v45 = vadd.f32 %v3349_v60, %v2318_v16 }
 0x315   : > { %2484 = vmatprep.subr.bf16.mxu1 %v3347_v59  ;;  %v891_v36 = vmul.f32 %v2740_v31, %v3339_v47  ;;  %v1421_v47 = vmul.f32 %v3382_v35, %v3382_v35 }
 0x316   : > { %v2742_v50 = vpop.eup %2741  ;;  %v1423_v60 = vmul.f32 %v3391_v45, %v3391_v45 }
 0x317   : > { %v1016_v40 = vmul.f32 %v891_v36, %v891_v36  ;;  %v892_v32 = vmul.f32 %v2742_v50, %v3341_v55  ;;  %v3396_v55 = vadd.f32 %v3353_v1, %v2318_v16  ;;  %v3411_v1 = vadd.f32 %v3357_v4, %v2318_v16 }
 0x318   : > { %2485 = vmatpush3.bf16.msra.mxu1 %v3347_v59  ;;  %v1422_v59 = vmul.f32 %v3387_v33, %v3387_v33  ;;  %v1428_v4 = vmul.f32 %v3416_v12, %v3416_v12 }
 0x319   : > { %1030 = vadd.xlane.f32.xlu0 %v1016_v40  ;;  %v1017_v34 = vmul.f32 %v892_v32, %v892_v32  ;;  %v896_v18 = vpack.c.bf16 %v892_v32, %v891_v36  ;;  %2526 = vmatprep.subr.bf16.mxu1 %v3215_v19  ;;  %v1424_v37 = vmul.f32 %v3396_v55, %v3396_v55 }
 0x31a   : > { %v1427_v29 = vmul.f32 %v3411_v1, %v3411_v1 }
 0x31b   : > { %1032 = vadd.xlane.f32.xlu1 %v1017_v34  ;;  %2475 = vmatmul.mubr.bf16.gmra.mrb[4].mxu1 %v896_v18 }
 0x31d   : > { %1429 = vadd.xlane.f32.xlu0 %v1421_v47 }
 0x31f   : > { %1431 = vadd.xlane.f32.xlu1 %v1422_v59 }
 0x321   : > { %1433 = vadd.xlane.f32.xlu0 %v1423_v60 }
 0x323   : > { %1435 = vadd.xlane.f32.xlu1 %v1424_v37 }
 0x325   : > { %1437 = vadd.xlane.f32.xlu0 %v1425_v38 }
 0x327   : > { %1439 = vadd.xlane.f32.xlu1 %v1426_v41 }
 0x329   : > { %1441 = vadd.xlane.f32.xlu0 %v1427_v29 }
 0x32b   : > { %1443 = vadd.xlane.f32.xlu1 %v1428_v4 }
 0x38e   : > { %v3424_v49 = vpop.xlane.xlu0 %1018 }
 0x390   : > { %v3426_v42 = vpop.xlane.xlu1 %1020 }
 0x396   : > { %v3428_v43 = vpop.xlane.xlu0 %1022 }
 0x398   : > { %v3430_v63 = vpop.xlane.xlu1 %1024 }
 0x39e   : > { %v3432_v44 = vpop.xlane.xlu0 %1026 }
 0x3a0   : > { %v3434_v46 = vpop.xlane.xlu1 %1028 }
 0x3a6   : > { %v3436_v48 = vpop.xlane.xlu0 %1030 }
 0x3a8   : > { %v3438_v51 = vpop.xlane.xlu1 %1032 }
 0x3aa   : > { %v1430_v0 = vpop.xlane.xlu0 %1429 }
 0x3ab   : > { %v1445_v56 = vmax.f32 %v1430_v0, 2.5e-09 }
 0x3ac   : > { %v1432_v52 = vpop.xlane.xlu1 %1431 }
 0x3ad   : > { %2743 = vrsqrt.f32 %v1445_v56  ;;  %v1446_v53 = vmax.f32 %v1432_v52, 2.5e-09 }
 0x3ae   : > { %v1434_v7 = vpop.xlane.xlu0 %1433 }
 0x3af   : > { %2745 = vrsqrt.f32 %v1446_v53  ;;  %v1447_v57 = vmax.f32 %v1434_v7, 2.5e-09 }
 0x3b0   : > { %v1436_v58 = vpop.xlane.xlu1 %1435 }
 0x3b1   : > { %2747 = vrsqrt.f32 %v1447_v57  ;;  %v1448_v15 = vmax.f32 %v1436_v58, 2.5e-09  ;;  %v1034_v58 = vmul.f32 0.5, %v3424_v49 }
 0x3b2   : > { %v1438_v13 = vpop.xlane.xlu0 %1437 }
 0x3b3   : > { %2749 = vrsqrt.f32 %v1448_v15  ;;  %v1449_v39 = vmax.f32 %v1438_v13, 2.5e-09  ;;  %v1037_v13 = vmul.f32 0.5, %v3430_v63  ;;  %v1040_v63 = vmul.f32 0.5, %v3436_v48 }
 0x3b4   : > { %v1440_v14 = vpop.xlane.xlu1 %1439 }
 0x3b5   : > { %2751 = vrsqrt.f32 %v1449_v39  ;;  %v1450_v26 = vmax.f32 %v1440_v14, 2.5e-09 }
 0x3b6   : > { %v1442_v30 = vpop.xlane.xlu0 %1441 }
 0x3b7   : > { %v2744_v27 = vpop.eup %2743  ;;  %2753 = vrsqrt.f32 %v1450_v26  ;;  %v1451_v28 = vmax.f32 %v1442_v30, 2.5e-09  ;;  %v1035_v26 = vmul.f32 0.5, %v3426_v42 }
 0x3b8   : > { %v1444_v31 = vpop.xlane.xlu1 %1443  ;;  %v3441_v16 = vmul.f32 %v2744_v27, %v3382_v35 }
 0x3b9   : > { %v2746_v36 = vpop.eup %2745  ;;  %2755 = vrsqrt.f32 %v1451_v28  ;;  %v1452_v50 = vmax.f32 %v1444_v31, 2.5e-09 }
 0x3ba   : > { %v1538_v40 = vmul.f32 %v3441_v16, %v3441_v16  ;;  %v3446_v32 = vmul.f32 %v2746_v36, %v3387_v33 }
 0x3bb   : > { %v2748_v34 = vpop.eup %2747  ;;  %2757 = vrsqrt.f32 %v1452_v50 }
 0x3bc   : > { %1546 = vadd.xlane.f32.xlu1 %v1538_v40  ;;  %v1469_v18 = vpack.c.bf16 %v3446_v32, %v3441_v16  ;;  %v1539_v35 = vmul.f32 %v3446_v32, %v3446_v32  ;;  %v3453_v59 = vmul.f32 %v2748_v34, %v3391_v45 }
 0x3bd   : > { %v2750_v47 = vpop.eup %2749 }
 0x3be   : > { %v3456_v60 = vmul.f32 %v2750_v47, %v3396_v55  ;;  %v1540_v41 = vmul.f32 %v3453_v59, %v3453_v59 }
 0x3bf   : > { %v2752_v37 = vpop.eup %2751 }
 0x3c0   : > { %1548 = vadd.xlane.f32.xlu1 %v1539_v35  ;;  %v1470_v33 = vpack.c.bf16 %v3456_v60, %v3453_v59  ;;  %v3463_v29 = vmul.f32 %v2752_v37, %v3401_v62  ;;  %v1541_v56 = vmul.f32 %v3456_v60, %v3456_v60  ;;  %v1038_v35 = vmul.f32 0.5, %v3432_v44 }
 0x3c1   : > { %v2754_v38 = vpop.eup %2753 }
 0x3c2   : > { %v3466_v4 = vmul.f32 %v2754_v38, %v3406_v61  ;;  %v1542_v61 = vmul.f32 %v3463_v29, %v3463_v29 }
 0x3c3   : > { %v2756_v45 = vpop.eup %2755 }
 0x3c4   : > { %1550 = vadd.xlane.f32.xlu1 %v1540_v41  ;;  %v1471_v55 = vpack.c.bf16 %v3466_v4, %v3463_v29  ;;  %v3473_v52 = vmul.f32 %v2756_v45, %v3411_v1  ;;  %v1543_v7 = vmul.f32 %v3466_v4, %v3466_v4  ;;  %v1041_v41 = vmul.f32 0.5, %v3438_v51 }
 0x3c5   : > { %v2758_v0 = vpop.eup %2757 }
 0x3c6   : > { %v3476_v53 = vmul.f32 %v2758_v0, %v3416_v12  ;;  %v1544_v57 = vmul.f32 %v3473_v52, %v3473_v52  ;;  %v1036_v12 = vmul.f32 0.5, %v3428_v43 }
 0x3c8   : > { %1552 = vadd.xlane.f32.xlu1 %v1541_v56  ;;  %v1472_v62 = vpack.c.bf16 %v3476_v53, %v3473_v52  ;;  %v1545_v1 = vmul.f32 %v3476_v53, %v3476_v53 }
 0x3cc   : > { %1554 = vadd.xlane.f32.xlu1 %v1542_v61 }
 0x3d0   : > { %1556 = vadd.xlane.f32.xlu1 %v1543_v7  ;;  %v1039_v7 = vmul.f32 0.5, %v3434_v46 }
 0x3d4   : > { %1558 = vadd.xlane.f32.xlu1 %v1544_v57 }
 0x3d8   : > { %1560 = vadd.xlane.f32.xlu1 %v1545_v1 }
 0x3de   : > { %v2472_v15 = vpop.f32.mrb[0].mxu1 }
 0x3df   : > { %v1044_v39 = vsub.f32 %v2472_v15, %v1036_v12  ;;  %v979_v14 = vpop.f32.mrb[1].mxu1 }
 0x3e0   : > { %v1042_v30 = vsub.f32 %v979_v14, %v1034_v58  ;;  %v2473_v27 = vpop.f32.mrb[2].mxu1 }
 0x3e1   : > { %v1054_v28 = vmul.f32 1.442695, %v1044_v39  ;;  %v1045_v31 = vsub.f32 %v2473_v27, %v1037_v13  ;;  %v982_v36 = vpop.f32.mrb[3].mxu1 }
 0x3e2   : > { %v1050_v50 = vmul.f32 1.442695, %v1042_v30  ;;  %v1043_v40 = vsub.f32 %v982_v36, %v1035_v26 }
 0x3e3   : > { %2759 = vpow2.f32 %v1054_v28  ;;  %v1056_v34 = vmul.f32 1.442695, %v1045_v31 }
 0x3e4   : > { %2761 = vpow2.f32 %v1050_v50  ;;  %v1052_v43 = vmul.f32 1.442695, %v1043_v40 }
 0x3e5   : > { %2763 = vpow2.f32 %v1056_v34 }
 0x3e6   : > { %2765 = vpow2.f32 %v1052_v43 }
 0x3ed   : > { %v2760_v49 = vpop.eup %2759 }
 0x3ee   : > { %v2762_v47 = vpop.eup %2761  ;;  %v1068_v42 = vadd.f32 0.0001, %v2760_v49  ;;  %v2476_v37 = vpop.f32.mrb[4].mxu1 }
 0x3ef   : > { %v2764_v38 = vpop.eup %2763  ;;  %v1066_v45 = vadd.f32 0.0001, %v2762_v47  ;;  %v1048_v0 = vsub.f32 %v2476_v37, %v1040_v63  ;;  %v995_v56 = vpop.f32.mrb[5].mxu1 }
 0x3f0   : > { %v2766_v61 = vpop.eup %2765  ;;  %v1076_v57 = vmul.f32 0.17677669, %v1068_v42  ;;  %v1069_v1 = vadd.f32 0.0001, %v2764_v38  ;;  %v1046_v12 = vsub.f32 %v995_v56, %v1038_v35  ;;  %v2477_v58 = vpop.f32.mrb[6].mxu1 }
 0x3f1   : > { %v1074_v15 = vmul.f32 0.17677669, %v1066_v45  ;;  %v1067_v48 = vadd.f32 0.0001, %v2766_v61  ;;  %v1062_v13 = vmul.f32 1.442695, %v1048_v0  ;;  %v1049_v39 = vsub.f32 %v2477_v58, %v1041_v41 }
 0x3f2   : > { %v1077_v44 = vmul.f32 0.17677669, %v1069_v1  ;;  %v1058_v14 = vmul.f32 1.442695, %v1046_v12  ;;  %v998_v26 = vpop.f32.mrb[7].mxu1  ;;  %v1084_v28 = vmul.f32 %v3116_v22, %v1076_v57 }
 0x3f3   : > { %v1075_v30 = vmul.f32 0.17677669, %v1067_v48  ;;  %2767 = vpow2.f32 %v1062_v13  ;;  %v1064_v51 = vmul.f32 1.442695, %v1049_v39  ;;  %v1047_v27 = vsub.f32 %v998_v26, %v1039_v7 }
 0x3f4   : > { %2769 = vpow2.f32 %v1058_v14  ;;  %v1085_v46 = vmul.f32 %v3116_v22, %v1077_v44  ;;  %v1082_v36 = vmul.f32 %v3116_v22, %v1074_v15 }
 0x3f5   : > { %2771 = vpow2.f32 %v1064_v51  ;;  %v1060_v31 = vmul.f32 1.442695, %v1047_v27  ;;  %v1083_v50 = vmul.f32 %v3116_v22, %v1075_v30 }
 0x3f6   : > { %v1104_v40 = vpack.c.bf16 %v1085_v46, %v1084_v28 }
 0x3f7   : > { %2773 = vpow2.f32 %v1060_v31  ;;  %v1103_v34 = vpack.c.bf16 %v1083_v50, %v1082_v36  ;;  %v1090_v43 = vadd.f32 %v1083_v50, %v1082_v36 }
 0x3f9   : > { %1111 = vxpose.xlu0.c.b16.start [1/4] (short) %v1103_v34, 128  ;;  %v1091_v49 = vadd.f32 %v1090_v43, %v1084_v28 }
 0x3fb   : > { %v1092_v63 = vadd.f32 %v1091_v49, %v1085_v46 }
 0x3fd   : > { %v2768_v47 = vpop.eup %2767  ;;  %1112 = vxpose.xlu0.c.b16.cont [2/4] (short) %v1104_v40, 128 }
 0x3fe   : > { %v2770_v35 = vpop.eup %2769  ;;  %v1072_v42 = vadd.f32 0.0001, %v2768_v47 }
 0x3ff   : > { %v2772_v37 = vpop.eup %2771  ;;  %v1070_v38 = vadd.f32 0.0001, %v2770_v35 }
 0x400   : > { %v1080_v41 = vmul.f32 0.17677669, %v1072_v42  ;;  %v1073_v45 = vadd.f32 0.0001, %v2772_v37 }
 0x401   : > { %v2774_v0 = vpop.eup %2773  ;;  %v1078_v56 = vmul.f32 0.17677669, %v1070_v38 }
 0x402   : > { %v1081_v61 = vmul.f32 0.17677669, %v1073_v45  ;;  %v1071_v7 = vadd.f32 0.0001, %v2774_v0  ;;  %v1088_v12 = vmul.f32 %v3116_v22, %v1080_v41 }
 0x403   : > { %v1086_v57 = vmul.f32 %v3116_v22, %v1078_v56 }
 0x404   : > { %v1079_v1 = vmul.f32 0.17677669, %v1071_v7  ;;  %v1089_v58 = vmul.f32 %v3116_v22, %v1081_v61 }
 0x405   : > { %v1093_v15 = vadd.f32 %v1092_v63, %v1086_v57 }
 0x406   : > { %v1087_v48 = vmul.f32 %v3116_v22, %v1079_v1  ;;  %v1106_v13 = vpack.c.bf16 %v1089_v58, %v1088_v12 }
 0x408   : > { %v1105_v39 = vpack.c.bf16 %v1087_v48, %v1086_v57  ;;  %v1094_v44 = vadd.f32 %v1093_v15, %v1087_v48 }
 0x40a   : > { %1113 = vxpose.xlu0.c.b16.cont [3/4] (short) %v1105_v39, 128  ;;  %v1095_v14 = vadd.f32 %v1094_v44, %v1088_v12 }
 0x40c   : > { %v3504_v26 = vadd.f32 %v1095_v14, %v1089_v58 }
 0x40e   : > { %1114 = vxpose.xlu0.c.b16.end [4/4] (short) %v1106_v13, 128  ;;  %v1097_v41 = vrot.slane %v3504_v26, 4 }
 0x410   : > { %v1098_v12 = vadd.f32 %v1097_v41, %v3504_v26 }
 0x468   : > { %v1119_v30 = vpop.trf.xlu0 }
 0x469   : > { %2486 = vmatprep.mubr.msk.bf16.mxu1 %vm1127_vm1, %v1119_v30 }
 0x46c   : > { %v1120_v51 = vpop.trf.xlu0 }
 0x46d   : > { %2487 = vmatmul.mubr.msk.bf16.vlgmr.msra.gmra.mrb[8].mxu1 %vm1127_vm1, %v1120_v51 }
 0x46e   : > { %2527 = vmatpush3.bf16.msra.mxu1 %v3215_v19 }
 0x46f   : > { %2528 = vmatprep.subr.bf16.mxu1 %v3220_v20 }
 0x470   : > { %v1121_v27 = vpop.trf.xlu0 }
 0x471   : > { %2490 = vmatprep.mubr.msk.bf16.mxu1 %vm1127_vm1, %v1121_v27  ;;  %v1099_v27 = vrot.slane %v1098_v12, 2 }
 0x472   : > { %2529 = vmatpush3.bf16.msra.mxu1 %v3220_v20 }
 0x473   : > { %2530 = vmatprep.subr.bf16.mxu1 %v3228_v21 }
 0x474   : > { %v1122_v28 = vpop.trf.xlu0 }
 0x475   : > { %2491 = vmatmul.mubr.msk.bf16.gmra.mrb[12].mxu1 %vm1127_vm1, %v1122_v28 }
 0x476   : > { %2531 = vmatpush3.bf16.msra.mxu1 %v3228_v21 }
 0x477   : > { %2532 = vmatprep.subr.bf16.mxu1 %v3235_v23 }
 0x478   : > { %v1123_v46 = vpop.trf.xlu0 }
 0x479   : > { %2494 = vmatprep.mubr.msk.bf16.mxu1 %vm1127_vm1, %v1123_v46 }
 0x47a   : > { %2533 = vmatpush3.bf16.msra.mxu1 %v3235_v23  ;;  %v1547_v23 = vpop.xlane.xlu1 %1546 }
 0x47b   : > { %2534 = vmatprep.subr.bf16.mxu1 %v3242_v24  ;;  %v1562_v0 = vmul.f32 0.5, %v1547_v23 }
 0x47c   : > { %v1124_v19 = vpop.trf.xlu0 }
 0x47d   : > { %2495 = vmatmul.mubr.msk.bf16.gmra.mrb[16].mxu1 %vm1127_vm1, %v1124_v19 }
 0x47e   : > { %2535 = vmatpush3.bf16.msra.mxu1 %v3242_v24 }
 0x47f   : > { %2536 = vmatprep.subr.bf16.mxu1 %v3249_v25 }
 0x480   : > { %v1125_v20 = vpop.trf.xlu0 }
 0x481   : > { %2498 = vmatprep.mubr.msk.bf16.mxu1 %vm1127_vm1, %v1125_v20 }
 0x482   : > { %2537 = vmatpush3.bf16.msra.mxu1 %v3249_v25 }
 0x483   : > { %2538 = vmatprep.subr.bf16.mxu1 %v3293_v17 }
 0x484   : > { %v1126_v21 = vpop.trf.xlu0 }
 0x485   : > { %2499 = vmatmul.mubr.msk.bf16.gmra.mrb[20].mxu1 %vm1127_vm1, %v1126_v21 }
 0x486   : > { %2539 = vmatpush3.bf16.msra.mxu1 %v3293_v17  ;;  %2542 = vmatprep.mubr.bf16.mxu1 %v1469_v18  ;;  %v1549_v17 = vpop.xlane.xlu1 %1548 }
 0x487   : > { %2540 = vmatprep.subr.bf16.mxu1 %v3300_v54  ;;  %v1563_v58 = vmul.f32 0.5, %v1549_v17 }
 0x48a   : > { %2541 = vmatpush3.bf16.msra.mxu1 %v3300_v54  ;;  %v1551_v59 = vpop.xlane.xlu1 %1550 }
 0x48b   : > { %v1564_v45 = vmul.f32 0.5, %v1551_v59 }
 0x48d   : > { %2543 = vmatmul.mubr.bf16.vlgmr.msra.gmra.mrb[24].mxu1 %v1470_v33 }
 0x48e   : > { %2546 = vmatprep.mubr.bf16.mxu1 %v1471_v55  ;;  %v1553_v53 = vpop.xlane.xlu1 %1552 }
 0x48f   : > { %v1565_v7 = vmul.f32 0.5, %v1553_v53 }
 0x492   : > { %v1555_v34 = vpop.xlane.xlu1 %1554 }
 0x493   : > { %v1566_v20 = vmul.f32 0.5, %v1555_v34 }
 0x495   : > { %2547 = vmatmul.mubr.bf16.gmra.mrb[28].mxu1 %v1472_v62 }
 0x496   : > { %v1557_v47 = vpop.xlane.xlu1 %1556 }
 0x497   : > { %v1567_v17 = vmul.f32 0.5, %v1557_v47 }
 0x49a   : > { %v1559_v56 = vpop.xlane.xlu1 %1558 }
 0x49b   : > { %v1568_v19 = vmul.f32 0.5, %v1559_v56 }
 0x49e   : > { %v1561_v28 = vpop.xlane.xlu1 %1560 }
 0x49f   : > { %v1569_v21 = vmul.f32 0.5, %v1561_v28 }
 0x540   : > { %v2488_v24 = vpop.f32.mrb[8].mxu1 }
 0x541   : > { %v1186_v25 = vpop.f32.mrb[9].mxu1 }
 0x542   : > { %v2489_v16 = vpop.f32.mrb[10].mxu1 }
 0x543   : > { %v1647_v32 = vpack.c.bf16 %v2489_v16, %v2488_v24  ;;  %v1189_v18 = vpop.f32.mrb[11].mxu1 }
 0x544   : > { %v1646_v54 = vpack.c.bf16 %v1189_v18, %v1186_v25  ;;  %v1100_v25 = vadd.f32 %v1099_v27, %v1098_v12 }
 0x546   : > { %2550 = vmatprep.subr.bf16.mxu0 %v1646_v54 }
 0x547   : > { %2551 = vmatpush3.bf16.msra.mxu0 %v1646_v54 }
 0x548   : > { %v2492_v60 = vpop.f32.mrb[12].mxu1  ;;  %2552 = vmatprep.subr.bf16.mxu0 %v1647_v32 }
 0x549   : > { %v1202_v33 = vpop.f32.mrb[13].mxu1 }
 0x54a   : > { %v2493_v29 = vpop.f32.mrb[14].mxu1 }
 0x54b   : > { %v1649_v4 = vpack.c.bf16 %v2493_v29, %v2492_v60  ;;  %v1205_v55 = vpop.f32.mrb[15].mxu1  ;;  %2553 = vmatpush3.bf16.msra.mxu0 %v1647_v32 }
 0x54c   : > { %v1648_v52 = vpack.c.bf16 %v1205_v55, %v1202_v33 }
 0x54e   : > { %2554 = vmatprep.subr.bf16.mxu0 %v1648_v52 }
 0x54f   : > { %2555 = vmatpush3.bf16.msra.mxu0 %v1648_v52 }
 0x550   : > { %v2496_v62 = vpop.f32.mrb[16].mxu1  ;;  %2556 = vmatprep.subr.bf16.mxu0 %v1649_v4 }
 0x551   : > { %v1218_v31 = vpop.f32.mrb[17].mxu1 }
 0x552   : > { %v2497_v36 = vpop.f32.mrb[18].mxu1 }
 0x553   : > { %v1651_v50 = vpack.c.bf16 %v2497_v36, %v2496_v62  ;;  %v1221_v40 = vpop.f32.mrb[19].mxu1  ;;  %2557 = vmatpush3.bf16.msra.mxu0 %v1649_v4  ;;  %v1101_v4 = vrot.slane %v1100_v25, 1 }
 0x554   : > { %v1650_v43 = vpack.c.bf16 %v1221_v40, %v1218_v31 }
 0x555   : > { %v1102_v40 = vadd.f32 %v1101_v4, %v1100_v25 }
 0x556   : > { %2558 = vmatprep.subr.bf16.mxu0 %v1650_v43 }
 0x557   : > { %2559 = vmatpush3.bf16.msra.mxu0 %v1650_v43 }
 0x558   : > { %v2500_v49 = vpop.f32.mrb[20].mxu1  ;;  %2560 = vmatprep.subr.bf16.mxu0 %v1651_v50 }
 0x559   : > { %v1234_v63 = vpop.f32.mrb[21].mxu1 }
 0x55a   : > { %v2501_v35 = vpop.f32.mrb[22].mxu1 }
 0x55b   : > { %v1653_v42 = vpack.c.bf16 %v2501_v35, %v2500_v49  ;;  %v1237_v37 = vpop.f32.mrb[23].mxu1  ;;  %2561 = vmatpush3.bf16.msra.mxu0 %v1651_v50 }
 0x55c   : > { %v1652_v38 = vpack.c.bf16 %v1237_v37, %v1234_v63 }
 0x55e   : > { %2562 = vmatprep.subr.bf16.mxu0 %v1652_v38 }
 0x55f   : > { %2563 = vmatpush3.bf16.msra.mxu0 %v1652_v38 }
 0x560   : > { %v2544_v61 = vpop.f32.mrb[24].mxu1  ;;  %2564 = vmatprep.subr.bf16.mxu0 %v1653_v42 }
 0x561   : > { %v1572_v57 = vsub.f32 %v2544_v61, %v1564_v45  ;;  %v1507_v1 = vpop.f32.mrb[25].mxu1 }
 0x562   : > { %v1570_v15 = vsub.f32 %v1507_v1, %v1562_v0  ;;  %v2545_v48 = vpop.f32.mrb[26].mxu1 }
 0x563   : > { %v1582_v13 = vmul.f32 1.442695, %v1572_v57  ;;  %v1573_v39 = vsub.f32 %v2545_v48, %v1565_v7  ;;  %v1510_v44 = vpop.f32.mrb[27].mxu1  ;;  %2565 = vmatpush3.bf16.msra.mxu0 %v1653_v42 }
 0x564   : > { %v1578_v14 = vmul.f32 1.442695, %v1570_v15  ;;  %v1571_v30 = vsub.f32 %v1510_v44, %v1563_v58 }
 0x565   : > { %2775 = vpow2.f32 %v1582_v13  ;;  %v1584_v51 = vmul.f32 1.442695, %v1573_v39 }
 0x566   : > { %2777 = vpow2.f32 %v1578_v14  ;;  %v1580_v46 = vmul.f32 1.442695, %v1571_v30 }
 0x567   : > { %2779 = vpow2.f32 %v1584_v51 }
 0x568   : > { %2781 = vpow2.f32 %v1580_v46  ;;  %v2548_v26 = vpop.f32.mrb[28].mxu1 }
 0x569   : > { %v1576_v23 = vsub.f32 %v2548_v26, %v1568_v19  ;;  %v1523_v24 = vpop.f32.mrb[29].mxu1 }
 0x56a   : > { %v1574_v16 = vsub.f32 %v1523_v24, %v1566_v20  ;;  %v2549_v32 = vpop.f32.mrb[30].mxu1 }
 0x56b   : > { %v1590_v18 = vmul.f32 1.442695, %v1576_v23  ;;  %v1577_v54 = vsub.f32 %v2549_v32, %v1569_v21  ;;  %v1526_v59 = vpop.f32.mrb[31].mxu1 }
 0x56c   : > { %v1586_v60 = vmul.f32 1.442695, %v1574_v16  ;;  %v1575_v33 = vsub.f32 %v1526_v59, %v1567_v17 }
 0x56d   : > { %2783 = vpow2.f32 %v1590_v18  ;;  %v1592_v29 = vmul.f32 1.442695, %v1577_v54 }
 0x56e   : > { %2785 = vpow2.f32 %v1586_v60  ;;  %v1588_v55 = vmul.f32 1.442695, %v1575_v33 }
 0x56f   : > { %v2776_v52 = vpop.eup %2775  ;;  %2787 = vpow2.f32 %v1592_v29 }
 0x570   : > { %v2778_v53 = vpop.eup %2777  ;;  %2789 = vpow2.f32 %v1588_v55  ;;  %v1596_v62 = vadd.f32 0.0001, %v2776_v52 }
 0x571   : > { %v2780_v31 = vpop.eup %2779  ;;  %v1594_v36 = vadd.f32 0.0001, %v2778_v53 }
 0x572   : > { %v2782_v50 = vpop.eup %2781  ;;  %v1597_v34 = vadd.f32 0.0001, %v2780_v31  ;;  %v1604_v43 = vmul.f32 0.17677669, %v1596_v62 }
 0x573   : > { %v1602_v49 = vmul.f32 0.17677669, %v1594_v36  ;;  %v1595_v63 = vadd.f32 0.0001, %v2782_v50 }
 0x574   : > { %v1605_v47 = vmul.f32 0.17677669, %v1597_v34  ;;  %v1612_v35 = vmul.f32 %v1604_v43, %v1102_v40 }
 0x575   : > { %v1603_v42 = vmul.f32 0.17677669, %v1595_v63  ;;  %v1610_v37 = vmul.f32 %v1602_v49, %v1102_v40 }
 0x576   : > { %1622 = vadd.xlane.f32.xlu1 %v1612_v35  ;;  %v1643_v38 = vpack.c.bf16 %v1605_v47, %v1604_v43  ;;  %v1613_v41 = vmul.f32 %v1605_v47, %v1102_v40 }
 0x577   : > { %v2784_v45 = vpop.eup %2783  ;;  %v1642_v0 = vpack.c.bf16 %v1603_v42, %v1602_v49  ;;  %v1611_v56 = vmul.f32 %v1603_v42, %v1102_v40 }
 0x578   : > { %v2786_v61 = vpop.eup %2785  ;;  %v1600_v7 = vadd.f32 0.0001, %v2784_v45 }
 0x579   : > { %v2788_v57 = vpop.eup %2787  ;;  %v1598_v1 = vadd.f32 0.0001, %v2786_v61  ;;  %2566 = vmatprep.mubr.bf16.mxu0 %v1642_v0 }
 0x57a   : > { %v2790_v12 = vpop.eup %2789  ;;  %v1608_v58 = vmul.f32 0.17677669, %v1600_v7  ;;  %1618 = vadd.xlane.f32.xlu1 %v1610_v37  ;;  %2567 = vmatmul.mubr.bf16.vlgmr.msra.gmra.mrb[24].mxu0 %v1643_v38  ;;  %v1601_v15 = vadd.f32 0.0001, %v2788_v57 }
 0x57b   : > { %v1606_v48 = vmul.f32 0.17677669, %v1598_v1  ;;  %v1599_v13 = vadd.f32 0.0001, %v2790_v12 }
 0x57c   : > { %v1609_v39 = vmul.f32 0.17677669, %v1601_v15  ;;  %v1616_v44 = vmul.f32 %v1608_v58, %v1102_v40 }
 0x57d   : > { %v1607_v14 = vmul.f32 0.17677669, %v1599_v13  ;;  %v1614_v30 = vmul.f32 %v1606_v48, %v1102_v40 }
 0x57e   : > { %1624 = vadd.xlane.f32.xlu1 %v1613_v41  ;;  %v1617_v51 = vmul.f32 %v1609_v39, %v1102_v40  ;;  %v1645_v27 = vpack.c.bf16 %v1609_v39, %v1608_v58 }
 0x57f   : > { %v1644_v28 = vpack.c.bf16 %v1607_v14, %v1606_v48  ;;  %v1615_v46 = vmul.f32 %v1607_v14, %v1102_v40 }
 0x580   : > { %1632 = vadd.xlane.f32.xlu0 %v1617_v51 }
 0x581   : > { %2570 = vmatprep.mubr.bf16.mxu0 %v1644_v28 }
 0x582   : > { %1620 = vadd.xlane.f32.xlu1 %v1611_v56  ;;  %2571 = vmatmul.mubr.bf16.gmra.mrb[28].mxu0 %v1645_v27 }
 0x586   : > { %1626 = vadd.xlane.f32.xlu1 %v1614_v30 }
 0x58a   : > { %1628 = vadd.xlane.f32.xlu1 %v1615_v46 }
 0x58e   : > { %1630 = vadd.xlane.f32.xlu1 %v1616_v44 }
 0x603   : > { %v1623_v19 = vpop.xlane.xlu1 %1622 }
 0x604   : > { %2791 = vrcp.f32 %v1623_v19 }
 0x607   : > { %v1619_v20 = vpop.xlane.xlu1 %1618 }
 0x608   : > { %2793 = vrcp.f32 %v1619_v20 }
 0x60b   : > { %v1625_v26 = vpop.xlane.xlu1 %1624 }
 0x60c   : > { %2795 = vrcp.f32 %v1625_v26 }
 0x60d   : > { %v1633_v23 = vpop.xlane.xlu0 %1632 }
 0x60e   : > { %2797 = vrcp.f32 %v1633_v23  ;;  %v2792_v25 = vpop.eup %2791 }
 0x60f   : > { %v1621_v21 = vpop.xlane.xlu1 %1620 }
 0x610   : > { %2799 = vrcp.f32 %v1621_v21 }
 0x612   : > { %v2794_v18 = vpop.eup %2793 }
 0x613   : > { %v1627_v24 = vpop.xlane.xlu1 %1626 }
 0x614   : > { %2801 = vrcp.f32 %v1627_v24 }
 0x616   : > { %v2796_v4 = vpop.eup %2795 }
 0x617   : > { %v1629_v59 = vpop.xlane.xlu1 %1628 }
 0x618   : > { %2803 = vrcp.f32 %v1629_v59  ;;  %v2798_v62 = vpop.eup %2797 }
 0x61a   : > { %v2800_v50 = vpop.eup %2799 }
 0x61b   : > { %v1631_v31 = vpop.xlane.xlu1 %1630 }
 0x61c   : > { %2805 = vrcp.f32 %v1631_v31  ;;  %v2698_v31 = vld [vmem:[%s3741_s10 + $0x18] sm:$0xff]  }
 0x61e   : > { %v2802_v63 = vpop.eup %2801 }
 0x64d   : > { %v2568_v17 = vpop.f32.mrb[24].mxu0 }
 0x64e   : > { %v1721_v16 = vmul.f32 %v2792_v25, %v2568_v17  ;;  %v1688_v32 = vpop.f32.mrb[25].mxu0 }
 0x64f   : > { %v2569_v54 = vpop.f32.mrb[26].mxu0  ;;  %v1719_v33 = vmul.f32 %v2794_v18, %v1688_v32 }
 0x650   : > { %v3544_v60 = vadd.f32 %v3084_v3, %v1721_v16  ;;  %v1691_v29 = vpop.f32.mrb[27].mxu0  ;;  %v1722_v52 = vmul.f32 %v2796_v4, %v2569_v54 }
 0x651   : > { %v3548_v55 = vadd.f32 %v3082_v2, %v1719_v33  ;;  %v1720_v34 = vmul.f32 %v2800_v50, %v1691_v29  ;;  %v2695_v29 = vld [vmem:[%s3741_s10] sm:$0xff]   ;;  %v2700_v50 = vld [vmem:[%s3741_s10 + $0x28] sm:$0xff]  }
 0x652   : > { %1739 = vadd.xlane.f32.xlu1 %v3544_v60  ;;  %v3552_v40 = vadd.f32 %v3090_v6, %v1722_v52  ;;  %v2804_v6 = vpop.eup %2803  ;;  %2574 = vmatprep.subr.bf16.mxu1 %v2695_v29 }
 0x653   : > { %v3559_v47 = vadd.f32 %v3088_v5, %v1720_v34  ;;  %2575 = vmatpush3.bf16.msra.mxu1 %v2695_v29  ;;  %v2702_v34 = vld [vmem:[%s3741_s10 + $0x38] sm:$0xff]  }
 0x655   : > { %v2572_v53 = vpop.f32.mrb[28].mxu0 }
 0x656   : > { %v1704_v36 = vpop.f32.mrb[29].mxu0  ;;  %1735 = vadd.xlane.f32.xlu1 %v3548_v55 }
 0x657   : > { %v2573_v3 = vpop.f32.mrb[30].mxu0  ;;  %v1723_v35 = vmul.f32 %v2802_v63, %v1704_v36  ;;  %v2699_v36 = vld [vmem:[%s3741_s10 + $0x20] sm:$0xff]  }
 0x658   : > { %v1726_v43 = vmul.f32 %v2798_v62, %v2573_v3  ;;  %v1707_v49 = vpop.f32.mrb[31].mxu0  ;;  %v2696_v62 = vld [vmem:[%s3741_s10 + $0x8] sm:$0xff]   ;;  %v2701_v3 = vld [vmem:[%s3741_s10 + $0x30] sm:$0xff]  }
 0x659   : > { %v3564_v42 = vadd.f32 %v3094_v8, %v1723_v35  ;;  %v1724_v37 = vmul.f32 %v2804_v6, %v1707_v49  ;;  %2576 = vmatprep.subr.bf16.mxu1 %v2696_v62 }
 0x65a   : > { %v3555_v2 = vadd.f32 %v3102_v11, %v1726_v43  ;;  %1741 = vadd.xlane.f32.xlu1 %v3552_v40  ;;  %v2806_v11 = vpop.eup %2805  ;;  %2577 = vmatpush3.bf16.msra.mxu1 %v2696_v62 }
 0x65b   : > { %v1725_v38 = vmul.f32 %v2806_v11, %v2572_v53  ;;  %v3568_v41 = vadd.f32 %v3096_v9, %v1724_v37 }
 0x65c   : > { %1749 = vadd.xlane.f32.xlu0 %v3555_v2 }
 0x65d   : > { %v3572_v5 = vadd.f32 %v3100_v10, %v1725_v38 }
 0x65e   : > { %1737 = vadd.xlane.f32.xlu1 %v3559_v47 }
 0x662   : > { %1743 = vadd.xlane.f32.xlu1 %v3564_v42 }
 0x666   : > { %1745 = vadd.xlane.f32.xlu1 %v3568_v41 }
 0x66a   : > { %1747 = vadd.xlane.f32.xlu1 %v3572_v5 }
 0x6df   : > { %v1740_v45 = vpop.xlane.xlu1 %1739 }
 0x6e0   : > { %v1753_v0 = vmul.f32 0.03125, %v1740_v45 }
 0x6e2   : > { %v1761_v61 = vsub.f32 %v3544_v60, %v1753_v0 }
 0x6e3   : > { %v1736_v56 = vpop.xlane.xlu1 %1735 }
 0x6e4   : > { %v1751_v8 = vmul.f32 0.03125, %v1736_v56  ;;  %v3583_v10 = vmul.f32 %v3116_v22, %v1761_v61 }
 0x6e6   : > { %v1759_v7 = vsub.f32 %v3548_v55, %v1751_v8  ;;  %v1777_v39 = vmul.f32 %v3583_v10, %v3583_v10 }
 0x6e7   : > { %v1742_v57 = vpop.xlane.xlu1 %1741 }
 0x6e8   : > { %v3578_v1 = vmul.f32 %v3116_v22, %v1759_v7  ;;  %v1754_v9 = vmul.f32 0.03125, %v1742_v57 }
 0x6e9   : > { %v1750_v44 = vpop.xlane.xlu0 %1749 }
 0x6ea   : > { %v1775_v12 = vmul.f32 %v3578_v1, %v3578_v1  ;;  %v1762_v48 = vsub.f32 %v3552_v40, %v1754_v9  ;;  %v1758_v27 = vmul.f32 0.03125, %v1750_v44 }
 0x6eb   : > { %v1738_v58 = vpop.xlane.xlu1 %1737 }
 0x6ec   : > { %v1752_v15 = vmul.f32 0.03125, %v1738_v58  ;;  %1783 = vadd.xlane.f32.xlu1 %v1775_v12  ;;  %v3596_v19 = vmul.f32 %v3116_v22, %v1762_v48  ;;  %v1766_v23 = vsub.f32 %v3555_v2, %v1758_v27 }
 0x6ee   : > { %v1760_v13 = vsub.f32 %v3559_v47, %v1752_v15  ;;  %v1778_v25 = vmul.f32 %v3596_v19, %v3596_v19  ;;  %v3614_v33 = vmul.f32 %v3116_v22, %v1766_v23 }
 0x6ef   : > { %v1744_v14 = vpop.xlane.xlu1 %1743 }
 0x6f0   : > { %v1755_v30 = vmul.f32 0.03125, %v1744_v14  ;;  %1787 = vadd.xlane.f32.xlu1 %v1777_v39  ;;  %v3590_v51 = vmul.f32 %v3116_v22, %v1760_v13  ;;  %v1782_v52 = vmul.f32 %v3614_v33, %v3614_v33  ;;  %v2327_v14 = vld [vmem:[%s3739_s8] ss:$0 sm:$0xff] }
 0x6f2   : > { %v1763_v28 = vsub.f32 %v3564_v42, %v1755_v30  ;;  %v1776_v46 = vmul.f32 %v3590_v51, %v3590_v51 }
 0x6f3   : > { %v1746_v20 = vpop.xlane.xlu1 %1745 }
 0x6f4   : > { %v1756_v26 = vmul.f32 0.03125, %v1746_v20  ;;  %1785 = vadd.xlane.f32.xlu0 %v1776_v46  ;;  %v3599_v21 = vmul.f32 %v3116_v22, %v1763_v28 }
 0x6f6   : > { %v1764_v24 = vsub.f32 %v3568_v41, %v1756_v26  ;;  %v1779_v17 = vmul.f32 %v3599_v21, %v3599_v21 }
 0x6f7   : > { %v1748_v16 = vpop.xlane.xlu1 %1747 }
 0x6f8   : > { %v1757_v32 = vmul.f32 0.03125, %v1748_v16  ;;  %1789 = vadd.xlane.f32.xlu0 %v1778_v25  ;;  %1791 = vadd.xlane.f32.xlu1 %v1779_v17  ;;  %v3608_v18 = vmul.f32 %v3116_v22, %v1764_v24 }
 0x6fa   : > { %v1765_v54 = vsub.f32 %v3572_v5, %v1757_v32  ;;  %v1780_v59 = vmul.f32 %v3608_v18, %v3608_v18 }
 0x6fc   : > { %1793 = vadd.xlane.f32.xlu0 %v1780_v59  ;;  %v3620_v4 = vmul.f32 %v3116_v22, %v1765_v54  ;;  %v2697_v22 = vld [vmem:[%s3741_s10 + $0x10] sm:$0xff]  }
 0x6fd   : > { %2578 = vmatprep.subr.bf16.mxu1 %v2697_v22 }
 0x6fe   : > { %v1781_v53 = vmul.f32 %v3620_v4, %v3620_v4  ;;  %2579 = vmatpush3.bf16.msra.mxu1 %v2697_v22 }
 0x6ff   : > { %2580 = vmatprep.subr.bf16.mxu1 %v2698_v31 }
 0x700   : > { %1797 = vadd.xlane.f32.xlu0 %v1782_v52  ;;  %1795 = vadd.xlane.f32.xlu1 %v1781_v53 }
 0x702   : > { %2581 = vmatpush3.bf16.msra.mxu1 %v2698_v31 }
 0x703   : > { %2582 = vmatprep.subr.bf16.mxu1 %v2699_v36 }
 0x706   : > { %2583 = vmatpush3.bf16.msra.mxu1 %v2699_v36 }
 0x707   : > { %2584 = vmatprep.subr.bf16.mxu1 %v2700_v50 }
 0x70a   : > { %2585 = vmatpush3.bf16.msra.mxu1 %v2700_v50 }
 0x70b   : > { %2586 = vmatprep.subr.bf16.mxu1 %v2701_v3 }
 0x70e   : > { %2587 = vmatpush3.bf16.msra.mxu1 %v2701_v3 }
 0x70f   : > { %2588 = vmatprep.subr.bf16.mxu1 %v2702_v34 }
 0x712   : > { %2589 = vmatpush3.bf16.msra.mxu1 %v2702_v34 }
 0x779   : > { %v1784_v43 = vpop.xlane.xlu1 %1783 }
 0x77a   : > { %v1799_v49 = vmul.f32 0.03125, %v1784_v43 }
 0x77c   : > { %v1807_v63 = vadd.f32 1e-05, %v1799_v49 }
 0x77d   : > { %v1788_v35 = vpop.xlane.xlu1 %1787 }
 0x77e   : > { %v1801_v6 = vmul.f32 0.03125, %v1788_v35  ;;  %2807 = vrsqrt.f32 %v1807_v63 }
 0x780   : > { %v1809_v37 = vadd.f32 1e-05, %v1801_v6 }
 0x781   : > { %v1786_v11 = vpop.xlane.xlu0 %1785 }
 0x782   : > { %v1800_v38 = vmul.f32 0.03125, %v1786_v11  ;;  %2809 = vrsqrt.f32 %v1809_v37 }
 0x784   : > { %v1808_v45 = vadd.f32 1e-05, %v1800_v38 }
 0x785   : > { %v1790_v0 = vpop.xlane.xlu0 %1789  ;;  %v1792_v56 = vpop.xlane.xlu1 %1791 }
 0x786   : > { %2811 = vrsqrt.f32 %v1808_v45  ;;  %v1802_v8 = vmul.f32 0.03125, %v1790_v0  ;;  %v1803_v61 = vmul.f32 0.03125, %v1792_v56  ;;  %v2704_v0 = vld [vmem:[#allocation4 + $0x8] sm:$0xff]   ;;  %v2705_v56 = vld [vmem:[#allocation4 + $0x10] sm:$0xff]  }
 0x788   : > { %v1810_v7 = vadd.f32 1e-05, %v1802_v8  ;;  %v1811_v57 = vadd.f32 1e-05, %v1803_v61  ;;  %v2808_v12 = vpop.eup %2807  ;;  %v2708_v8 = vld [vmem:[#allocation4 + $0x28] sm:$0xff]   ;;  %v2709_v61 = vld [vmem:[#allocation4 + $0x30] sm:$0xff]  }
 0x789   : > { %v1794_v9 = vpop.xlane.xlu0 %1793  ;;  %v1823_v39 = vmul.f32 %v2808_v12, %v3578_v1  ;;  %v2328_v1 = vld [vmem:[%s3740_s9] ss:$0 sm:$0xff] }
 0x78a   : > { %2813 = vrsqrt.f32 %v1810_v7  ;;  %v1804_v58 = vmul.f32 0.03125, %v1794_v9  ;;  %v2710_v7 = vld [vmem:[#allocation4 + $0x38] sm:$0xff]  }
 0x78b   : > { %2815 = vrsqrt.f32 %v1811_v57  ;;  %v1837_v24 = vmul.f32 %v2327_v14, %v1823_v39  ;;  %v2329_v57 = vld [vmem:[%s3742_s11] ss:$0 sm:$0xff] }
 0x78c   : > { %v1812_v15 = vadd.f32 1e-05, %v1804_v58  ;;  %v2810_v44 = vpop.eup %2809 }
 0x78d   : > { %v1798_v48 = vpop.xlane.xlu0 %1797  ;;  %v1796_v13 = vpop.xlane.xlu1 %1795  ;;  %v1825_v26 = vmul.f32 %v2810_v44, %v3583_v10  ;;  %v1851_v59 = vadd.f32 %v2328_v1, %v1837_v24 }
 0x78e   : > { %2817 = vrsqrt.f32 %v1812_v15  ;;  %v1806_v30 = vmul.f32 0.03125, %v1798_v48  ;;  %v1805_v27 = vmul.f32 0.03125, %v1796_v13 }
 0x78f   : > { %v1839_v32 = vmul.f32 %v2327_v14, %v1825_v26 }
 0x790   : > { %v2812_v28 = vpop.eup %2811  ;;  %v1814_v46 = vadd.f32 1e-05, %v1806_v30  ;;  %v1813_v20 = vadd.f32 1e-05, %v1805_v27 }
 0x791   : > { %v1824_v23 = vmul.f32 %v2812_v28, %v3590_v51  ;;  %v1853_v62 = vadd.f32 %v2328_v1, %v1839_v32 }
 0x792   : > { %2819 = vrsqrt.f32 %v1814_v46 }
 0x793   : > { %2821 = vrsqrt.f32 %v1813_v20  ;;  %v1838_v25 = vmul.f32 %v2327_v14, %v1824_v23 }
 0x794   : > { %v2814_v17 = vpop.eup %2813 }
 0x795   : > { %v2816_v16 = vpop.eup %2815  ;;  %v1826_v54 = vmul.f32 %v2814_v17, %v3596_v19  ;;  %v1852_v29 = vadd.f32 %v2328_v1, %v1838_v25 }
 0x796   : > { %v1827_v52 = vmul.f32 %v2816_v16, %v3599_v21 }
 0x797   : > { %v1840_v10 = vmul.f32 %v2327_v14, %v1826_v54  ;;  %v1859_v53 = vpack.c.bf16 %v1852_v29, %v1851_v59 }
 0x798   : > { %v2818_v51 = vpop.eup %2817  ;;  %v1841_v36 = vmul.f32 %v2327_v14, %v1827_v52 }
 0x799   : > { %2590 = vmatprep.mubr.bf16.mxu1 %v1859_v53  ;;  %v1854_v22 = vadd.f32 %v2328_v1, %v1840_v10  ;;  %v1828_v31 = vmul.f32 %v2818_v51, %v3608_v18  ;;  %v2703_v18 = vld [vmem:[#allocation4] sm:$0xff]  }
 0x79a   : > { %v1855_v49 = vadd.f32 %v2328_v1, %v1841_v36  ;;  %2598 = vmatprep.subr.bf16.mxu0 %v2703_v18 }
 0x79b   : > { %v1860_v50 = vpack.c.bf16 %v1854_v22, %v1853_v62  ;;  %v1842_v3 = vmul.f32 %v2327_v14, %v1828_v31  ;;  %2599 = vmatpush3.bf16.msra.mxu0 %v2703_v18 }
 0x79c   : > { %v2820_v34 = vpop.eup %2819  ;;  %2600 = vmatprep.subr.bf16.mxu0 %v2704_v0 }
 0x79d   : > { %v2822_v43 = vpop.eup %2821  ;;  %2591 = vmatmul.mubr.bf16.vlgmr.msra.gmra.mrb[32].mxu1 %v1860_v50  ;;  %v1856_v19 = vadd.f32 %v2328_v1, %v1842_v3  ;;  %v1830_v63 = vmul.f32 %v2820_v34, %v3614_v33  ;;  %v2706_v33 = vld [vmem:[#allocation4 + $0x18] sm:$0xff]  }
 0x79e   : > { %v1829_v21 = vmul.f32 %v2822_v43, %v3620_v4  ;;  %v2707_v4 = vld [vmem:[#allocation4 + $0x20] sm:$0xff]  }
 0x79f   : > { %v1861_v35 = vpack.c.bf16 %v1856_v19, %v1855_v49  ;;  %v1844_v6 = vmul.f32 %v2327_v14, %v1830_v63  ;;  %2601 = vmatpush3.bf16.msra.mxu0 %v2704_v0 }
 0x7a0   : > { %v1843_v37 = vmul.f32 %v2327_v14, %v1829_v21  ;;  %2602 = vmatprep.subr.bf16.mxu0 %v2705_v56 }
 0x7a1   : > { %2594 = vmatprep.mubr.bf16.mxu1 %v1861_v35  ;;  %v1858_v11 = vadd.f32 %v2328_v1, %v1844_v6 }
 0x7a2   : > { %v1857_v38 = vadd.f32 %v2328_v1, %v1843_v37 }
 0x7a3   : > { %2603 = vmatpush3.bf16.msra.mxu0 %v2705_v56 }
 0x7a4   : > { %v1862_v45 = vpack.c.bf16 %v1858_v11, %v1857_v38  ;;  %2604 = vmatprep.subr.bf16.mxu0 %v2706_v33 }
 0x7a6   : > { %2595 = vmatmul.mubr.bf16.gmra.mrb[36].mxu1 %v1862_v45 }
 0x7a7   : > { %2605 = vmatpush3.bf16.msra.mxu0 %v2706_v33 }
 0x7a8   : > { %2606 = vmatprep.subr.bf16.mxu0 %v2707_v4 }
 0x7ab   : > { %2607 = vmatpush3.bf16.msra.mxu0 %v2707_v4 }
 0x7ac   : > { %2608 = vmatprep.subr.bf16.mxu0 %v2708_v8 }
 0x7af   : > { %2609 = vmatpush3.bf16.msra.mxu0 %v2708_v8 }
 0x7b0   : > { %2610 = vmatprep.subr.bf16.mxu0 %v2709_v61 }
 0x7b3   : > { %2611 = vmatpush3.bf16.msra.mxu0 %v2709_v61 }
 0x7b4   : > { %2612 = vmatprep.subr.bf16.mxu0 %v2710_v7 }
 0x7b7   : > { %2613 = vmatpush3.bf16.msra.mxu0 %v2710_v7 }
 0x870   : > { %v2592_v9 = vpop.f32.mrb[32].mxu1 }
 0x871   : > { %v3664_v12 = vadd.f32 %v2592_v9, %v2329_v57  ;;  %v1951_v58 = vpop.f32.mrb[33].mxu1 }
 0x872   : > { %v3666_v15 = vadd.f32 %v2329_v57, %v1951_v58  ;;  %v2593_v48 = vpop.f32.mrb[34].mxu1 }
 0x873   : > { %v1984_v13 = vmul.f32 %v3664_v12, %v3664_v12  ;;  %v3670_v39 = vadd.f32 %v2593_v48, %v2329_v57  ;;  %v1954_v44 = vpop.f32.mrb[35].mxu1 }
 0x874   : > { %v1982_v14 = vmul.f32 %v3666_v15, %v3666_v15  ;;  %v3674_v30 = vadd.f32 %v2329_v57, %v1954_v44 }
 0x875   : > { %v1992_v27 = vmul.f32 %v1984_v13, %v3664_v12  ;;  %v1985_v28 = vmul.f32 %v3670_v39, %v3670_v39 }
 0x876   : > { %v1990_v46 = vmul.f32 %v1982_v14, %v3666_v15  ;;  %v1983_v20 = vmul.f32 %v3674_v30, %v3674_v30 }
 0x877   : > { %v2000_v26 = vmul.f32 0.044715, %v1992_v27  ;;  %v1993_v23 = vmul.f32 %v1985_v28, %v3670_v39 }
 0x878   : > { %v1998_v24 = vmul.f32 0.044715, %v1990_v46  ;;  %v1991_v1 = vmul.f32 %v1983_v20, %v3674_v30 }
 0x879   : > { %v2008_v25 = vadd.f32 %v2000_v26, %v3664_v12  ;;  %v2001_v17 = vmul.f32 0.044715, %v1993_v23  ;;  %v2596_v16 = vpop.f32.mrb[36].mxu1 }
 0x87a   : > { %v2006_v32 = vadd.f32 %v1998_v24, %v3666_v15  ;;  %v1999_v54 = vmul.f32 0.044715, %v1991_v1  ;;  %v3686_v59 = vadd.f32 %v2596_v16, %v2329_v57  ;;  %v1967_v29 = vpop.f32.mrb[37].mxu1 }
 0x87b   : > { %v2016_v52 = vmul.f32 0.7978846, %v2008_v25  ;;  %v2009_v10 = vadd.f32 %v2001_v17, %v3670_v39  ;;  %v3689_v53 = vadd.f32 %v2329_v57, %v1967_v29  ;;  %v2597_v51 = vpop.f32.mrb[38].mxu1 }
 0x87c   : > { %v2014_v62 = vmul.f32 0.7978846, %v2006_v32  ;;  %v2007_v22 = vadd.f32 %v1999_v54, %v3674_v30  ;;  %v1988_v31 = vmul.f32 %v3686_v59, %v3686_v59  ;;  %v3694_v36 = vadd.f32 %v2597_v51, %v2329_v57  ;;  %v1970_v50 = vpop.f32.mrb[39].mxu1 }
 0x87d   : > { %2823 = vtanh.f32 %v2016_v52  ;;  %v2017_v3 = vmul.f32 0.7978846, %v2009_v10  ;;  %v1986_v34 = vmul.f32 %v3689_v53, %v3689_v53  ;;  %v1971_v43 = vadd.f32 %v2329_v57, %v1970_v50 }
 0x87e   : > { %2825 = vtanh.f32 %v2014_v62  ;;  %v2015_v49 = vmul.f32 0.7978846, %v2007_v22  ;;  %v1996_v19 = vmul.f32 %v1988_v31, %v3686_v59  ;;  %v1989_v63 = vmul.f32 %v3694_v36, %v3694_v36 }
 0x87f   : > { %2827 = vtanh.f32 %v2017_v3  ;;  %v1994_v21 = vmul.f32 %v1986_v34, %v3689_v53  ;;  %v1987_v35 = vmul.f32 %v1971_v43, %v1971_v43 }
 0x880   : > { %2829 = vtanh.f32 %v2015_v49  ;;  %v2004_v6 = vmul.f32 0.044715, %v1996_v19  ;;  %v1997_v37 = vmul.f32 %v1989_v63, %v3694_v36 }
 0x881   : > { %v2002_v11 = vmul.f32 0.044715, %v1994_v21  ;;  %v1995_v38 = vmul.f32 %v1987_v35, %v1971_v43  ;;  %v2338_v21 = vld [vmem:[%s3744_s13] ss:$0 sm:$0xff] }
 0x882   : > { %v2012_v45 = vadd.f32 %v2004_v6, %v3686_v59  ;;  %v2005_v18 = vmul.f32 0.044715, %v1997_v37 }
 0x883   : > { %v2010_v0 = vadd.f32 %v2002_v11, %v3689_v53  ;;  %v2003_v56 = vmul.f32 0.044715, %v1995_v38 }
 0x884   : > { %v2020_v33 = vmul.f32 0.7978846, %v2012_v45  ;;  %v2013_v4 = vadd.f32 %v2005_v18, %v3694_v36 }
 0x885   : > { %v2018_v8 = vmul.f32 0.7978846, %v2010_v0  ;;  %v2011_v61 = vadd.f32 %v2003_v56, %v1971_v43 }
 0x886   : > { %2831 = vtanh.f32 %v2020_v33  ;;  %v2021_v7 = vmul.f32 0.7978846, %v2013_v4 }
 0x887   : > { %v2824_v57 = vpop.eup %2823  ;;  %2833 = vtanh.f32 %v2018_v8  ;;  %v2019_v9 = vmul.f32 0.7978846, %v2011_v61 }
 0x888   : > { %v2826_v58 = vpop.eup %2825  ;;  %v2032_v48 = vadd.f32 1.0, %v2824_v57  ;;  %2835 = vtanh.f32 %v2021_v7 }
 0x889   : > { %v2828_v13 = vpop.eup %2827  ;;  %2837 = vtanh.f32 %v2019_v9  ;;  %v2030_v44 = vadd.f32 1.0, %v2826_v58 }
 0x88a   : > { %v2830_v14 = vpop.eup %2829  ;;  %v2040_v27 = vmul.f32 0.5, %v2032_v48  ;;  %v2033_v28 = vadd.f32 1.0, %v2828_v13 }
 0x88b   : > { %v2031_v46 = vadd.f32 1.0, %v2830_v14  ;;  %v2038_v20 = vmul.f32 0.5, %v2030_v44 }
 0x88c   : > { %v2041_v26 = vmul.f32 0.5, %v2033_v28  ;;  %v2048_v24 = vmul.f32 %v2040_v27, %v3664_v12 }
 0x88d   : > { %v2039_v23 = vmul.f32 0.5, %v2031_v46  ;;  %v2046_v25 = vmul.f32 %v2038_v20, %v3666_v15 }
 0x88e   : > { %v2049_v1 = vmul.f32 %v2041_v26, %v3670_v39 }
 0x88f   : > { %v2047_v17 = vmul.f32 %v2039_v23, %v3674_v30 }
 0x890   : > { %v2832_v16 = vpop.eup %2831  ;;  %v2055_v32 = vpack.c.bf16 %v2049_v1, %v2048_v24 }
 0x891   : > { %v2834_v54 = vpop.eup %2833  ;;  %v2054_v29 = vpack.c.bf16 %v2047_v17, %v2046_v25  ;;  %v2036_v52 = vadd.f32 1.0, %v2832_v16 }
 0x892   : > { %v2836_v10 = vpop.eup %2835  ;;  %v2034_v51 = vadd.f32 1.0, %v2834_v54 }
 0x893   : > { %v2838_v62 = vpop.eup %2837  ;;  %2614 = vmatprep.mubr.bf16.mxu0 %v2054_v29  ;;  %v2037_v22 = vadd.f32 1.0, %v2836_v10  ;;  %v2044_v31 = vmul.f32 0.5, %v2036_v52 }
 0x894   : > { %2615 = vmatmul.mubr.bf16.vlgmr.msra.gmra.mrb[32].mxu0 %v2055_v32  ;;  %v2035_v12 = vadd.f32 1.0, %v2838_v62  ;;  %v2042_v50 = vmul.f32 0.5, %v2034_v51 }
 0x895   : > { %v2045_v39 = vmul.f32 0.5, %v2037_v22  ;;  %v2052_v15 = vmul.f32 %v2044_v31, %v3686_v59 }
 0x896   : > { %v2043_v3 = vmul.f32 0.5, %v2035_v12  ;;  %v2050_v34 = vmul.f32 %v2042_v50, %v3689_v53 }
 0x897   : > { %v2053_v30 = vmul.f32 %v2045_v39, %v3694_v36 }
 0x898   : > { %v2051_v49 = vmul.f32 %v2043_v3, %v1971_v43 }
 0x899   : > { %v2057_v19 = vpack.c.bf16 %v2053_v30, %v2052_v15 }
 0x89a   : > { %v2056_v63 = vpack.c.bf16 %v2051_v49, %v2050_v34 }
 0x89c   : > { %2618 = vmatprep.mubr.bf16.mxu0 %v2056_v63 }
 0x89d   : > { %2619 = vmatmul.mubr.bf16.gmra.mrb[36].mxu0 %v2057_v19 }
 0x967   : > { %v2616_v35 = vpop.f32.mrb[32].mxu0 }
 0x968   : > { %v2155_v6 = vadd.f32 %v2616_v35, %v2338_v21  ;;  %v2146_v37 = vpop.f32.mrb[33].mxu0 }
 0x969   : > { %v2147_v59 = vadd.f32 %v2338_v21, %v2146_v37  ;;  %v2617_v36 = vpop.f32.mrb[34].mxu0 }
 0x96a   : > { %v2179_v53 = vadd.f32 %v2155_v6, %v3544_v60  ;;  %v2158_v43 = vadd.f32 %v2617_v36, %v2338_v21  ;;  %v2149_v11 = vpop.f32.mrb[35].mxu0 }
 0x96b   : > { %v2177_v38 = vadd.f32 %v2147_v59, %v3548_v55  ;;  %v2150_v45 = vadd.f32 %v2338_v21, %v2149_v11 }
 0x96c   : > { %2187 = vst [vmem:[%s495_s23 + $0x10] sm:$0xff] %v2179_v53  ;;  %v2180_v18 = vadd.f32 %v2158_v43, %v3552_v40 }
 0x96d   : > { %2185 = vst [vmem:[%s495_s23] sm:$0xff] %v2177_v38  ;;  %v2178_v0 = vadd.f32 %v2150_v45, %v3559_v47 }
 0x96e   : > { %2188 = vst [vmem:[%s495_s23 + $0x18] sm:$0xff] %v2180_v18 }
 0x96f   : > { %2186 = vst [vmem:[%s495_s23 + $0x8] sm:$0xff] %v2178_v0 }
 0x970   : > { %v2620_v56 = vpop.f32.mrb[36].mxu0 }
 0x971   : > { %v2171_v33 = vadd.f32 %v2620_v56, %v2338_v21  ;;  %v2162_v4 = vpop.f32.mrb[37].mxu0 }
 0x972   : > { %v2163_v8 = vadd.f32 %v2338_v21, %v2162_v4  ;;  %v2621_v61 = vpop.f32.mrb[38].mxu0 }
 0x973   : > { %v2183_v60 = vadd.f32 %v2171_v33, %v3572_v5  ;;  %v2174_v7 = vadd.f32 %v2621_v61, %v2338_v21  ;;  %v2165_v57 = vpop.f32.mrb[39].mxu0 }
 0x974   : > { %v2181_v55 = vadd.f32 %v2163_v8, %v3564_v42  ;;  %v2166_v9 = vadd.f32 %v2338_v21, %v2165_v57 }
 0x975   : > { %2191 = vst [vmem:[%s495_s23 + $0x30] sm:$0xff] %v2183_v60  ;;  %v2184_v40 = vadd.f32 %v2174_v7, %v3555_v2 }
 0x976   : > { %2189 = vst [vmem:[%s495_s23 + $0x20] sm:$0xff] %v2181_v55  ;;  %v2182_v47 = vadd.f32 %v2166_v9, %v3568_v41 }
 0x977   : > { %2192 = vst [vmem:[%s495_s23 + $0x38] sm:$0xff] %v2184_v40 }
 0x978   : > { %2190 = vst [vmem:[%s495_s23 + $0x28] sm:$0xff] %v2182_v47 }
 0x979 PF: > { %s26_s29 = sadd.s32 1, %s2909_s29  }
 0x97a   : > { %p23_p5 = scmp.ge.s32.totalorder %s26_s29, 4  }
 0x97c   :  { %25 = sbr.rel (!%p23_p5) target bundleno = 2 (0x2), region = 115 }
 0x983   :  { %2214 = vsyncpa [#allocation3], 1 }
 0x984   :  { %2216 = vsyncpa [#allocation3 + $0x1], 1 }
 0x985   :  { %2217 = vsyncpa [#allocation5], 1 }

</bundles_post_ra>
